<compile_context>
chip_gen: v6e
topology: v6e:2x2x1
jax: 0.10.0
libtpu: 0.0.40
codegen_flags: <defaults>
</compile_context>

<pallas_src>
import jax
import jax.numpy as jnp
from jax import lax
from jax.experimental import pallas as pl
from jax.experimental.pallas import tpu as pltpu

# Model dims (from the module's globals / __init__).
EMBED_DIM = 400
HIDDEN_DIM = 128
HIDDEN_DIM2 = 256          # fc/fc2 exist but their result is discarded in the reference forward
N_LAYERS = 2
OUTPUT_SIZE = 1

# Demo shapes.
VOCAB_SIZE = 64            # reference computes vocab from an empty Counter (=1); use a small synthetic vocab
BATCH = 2
SEQ = 8
SUBLANE = 8                # TPU sublane width; batch is padded up to a multiple of this
MAX_BATCH_SHARD = 128      # rows per grid step (fills MXU rows; shards spread over cores on v7x)


def _sent_rnn_kernel(pre_ref,                     # (T, Bs, 4H)  fused layer-0 pre-gates (x@W_ih0 + b0), f32
                     h0_ref, c0_ref,              # (L, Bs, H)   initial hidden/cell, f32
                     whh0_ref,                    # (H, 4H)      bf16
                     wih1_ref, whh1_ref,          # (H, 4H) each bf16
                     b1_ref,                      # (1, 4H)      b_ih1 + b_hh1 folded, f32
                     sig_ref,                     # (Bs, H)      sigmoid(top-layer h at final step)
                     hn_ref, cn_ref):             # (L, Bs, H)
    H = HIDDEN_DIM
    T = pre_ref.shape[0]
    Bs = pre_ref.shape[1]

    # Hoisted weight / bias loads (kept out of the loop body).
    whh0 = whh0_ref[...]
    wih1 = wih1_ref[...]
    whh1 = whh1_ref[...]
    b1 = jnp.broadcast_to(b1_ref[...], (Bs, 4 * H))

    def gates_to_hc(gates, c_prev):
        # PyTorch gate order: i, f, g, o. Elementwise math in f32.
        i = jax.nn.sigmoid(gates[:, 0 * H:1 * H])
        f = jax.nn.sigmoid(gates[:, 1 * H:2 * H])
        g = jnp.tanh(gates[:, 2 * H:3 * H])
        o = jax.nn.sigmoid(gates[:, 3 * H:4 * H])
        c_new = f * c_prev + i * g
        h_new = o * jnp.tanh(c_new)
        return h_new, c_new

    def step(t, carry):
        h_l0, c_l0, h_l1, c_l1 = carry

        # Layer-1 recurrent half: depends only on the previous step's h_l1, so it can issue
        # in parallel with the whole layer-0 chain below (review: split the fused matmul).
        rec1 = jnp.dot(h_l1.astype(jnp.bfloat16), whh1,
                       preferred_element_type=jnp.float32)

        # Layer 0: input projection is precomputed (pre_ref); only the recurrent matmul is
        # on the serial path.
        gates0 = pre_ref[t] + jnp.dot(h_l0.astype(jnp.bfloat16), whh0,
                                      preferred_element_type=jnp.float32)
        h_l0n, c_l0n = gates_to_hc(gates0, c_l0)

        # TODO(synk): inter-layer LSTM dropout (p=0.5) and post-LSTM Dropout(0.3) are identity
        # at inference; not modeled.

        # Layer 1: input half + recurrent half + bias.
        gates1 = (jnp.dot(h_l0n.astype(jnp.bfloat16), wih1,
                          preferred_element_type=jnp.float32)
                  + rec1 + b1)
        h_l1n, c_l1n = gates_to_hc(gates1, c_l1)
        return (h_l0n, c_l0n, h_l1n, c_l1n)

    carry0 = (h0_ref[0], c0_ref[0], h0_ref[1], c0_ref[1])
    # Full unroll for short sequences (LLO visibility); partial unroll for long T so vreg
    # live ranges stay bounded (review: don't fully unroll past ~32-64 steps).
    unroll = True if T <= 32 else 4
    h_l0, c_l0, h_l1, c_l1 = lax.fori_loop(0, T, step, carry0, unroll=unroll)

    # Final-step-only writebacks.
    sig_ref[...] = jax.nn.sigmoid(h_l1).astype(sig_ref.dtype)
    hn_ref[0] = h_l0.astype(hn_ref.dtype)
    hn_ref[1] = h_l1.astype(hn_ref.dtype)
    cn_ref[0] = c_l0.astype(cn_ref.dtype)
    cn_ref[1] = c_l1.astype(cn_ref.dtype)


@jax.jit
def sent_rnn_forward(x_tokens, hidden, params):
    """x_tokens: (B, T) int32; hidden: (h0, c0) each (N_LAYERS, B, H). Returns (out, (h_n, c_n))."""
    h0, c0 = hidden
    B, T = x_tokens.shape
    H = HIDDEN_DIM

    # Pad batch to the sublane width; for large batches, shard it over a parallel grid axis
    # so each shard fills the MXU rows and shards spread over both TensorCores on v7x.
    Bp = max(SUBLANE, ((B + SUBLANE - 1) // SUBLANE) * SUBLANE)
    if Bp > MAX_BATCH_SHARD:
        Bp = ((Bp + MAX_BATCH_SHARD - 1) // MAX_BATCH_SHARD) * MAX_BATCH_SHARD
        bshard = MAX_BATCH_SHARD
    else:
        bshard = Bp
    nshard = Bp // bshard

    # Fused pre-gate table: embedding @ W_ih0 + (b_ih0 + b_hh0), shape (VOCAB, 4H).
    # (128 KiB for the demo vocab; for very large vocabs this table should live in HBM and be
    #  gathered by DMA instead — TODO(synk).)
    table = jnp.dot(params["embedding"], params["wih0"]) + params["b0"]      # (V, 4H) f32
    # Time-major row gather directly from token ids — no (B,T,E) activation is ever built.
    pre = jnp.take(table, x_tokens.T, axis=0)                                # (T, B, 4H)
    pre = jnp.pad(pre, ((0, 0), (0, Bp - B), (0, 0)))                        # (T, Bp, 4H)

    h0p = jnp.pad(h0, ((0, 0), (0, Bp - B), (0, 0)))
    c0p = jnp.pad(c0, ((0, 0), (0, Bp - B), (0, 0)))

    # bf16 matmul operands (f32 accumulation in-kernel).
    whh0_b = params["whh0"].astype(jnp.bfloat16)
    wih1_b = params["wih1"].astype(jnp.bfloat16)
    whh1_b = params["whh1"].astype(jnp.bfloat16)
    b1 = params["b1"]                                                        # (1, 4H) f32

    sig_last, hn_p, cn_p = pl.pallas_call(
        _sent_rnn_kernel,
        out_shape=(
            jax.ShapeDtypeStruct((Bp, H), jnp.float32),               # sigmoid(final top-layer h)
            jax.ShapeDtypeStruct((N_LAYERS, Bp, H), jnp.float32),     # h_n
            jax.ShapeDtypeStruct((N_LAYERS, Bp, H), jnp.float32),     # c_n
        ),
        grid_spec=pltpu.PrefetchScalarGridSpec(
            num_scalar_prefetch=0,
            grid=(nshard,),
            in_specs=[
                pl.BlockSpec((T, bshard, 4 * H), lambda i: (0, i, 0)),        # pre-gates
                pl.BlockSpec((N_LAYERS, bshard, H), lambda i: (0, i, 0)),     # h0
                pl.BlockSpec((N_LAYERS, bshard, H), lambda i: (0, i, 0)),     # c0
                pl.BlockSpec((H, 4 * H), lambda i: (0, 0)),                   # W_hh0 (bf16)
                pl.BlockSpec((H, 4 * H), lambda i: (0, 0)),                   # W_ih1 (bf16)
                pl.BlockSpec((H, 4 * H), lambda i: (0, 0)),                   # W_hh1 (bf16)
                pl.BlockSpec((1, 4 * H), lambda i: (0, 0)),                   # b1
            ],
            out_specs=[
                pl.BlockSpec((bshard, H), lambda i: (i, 0)),
                pl.BlockSpec((N_LAYERS, bshard, H), lambda i: (0, i, 0)),
                pl.BlockSpec((N_LAYERS, bshard, H), lambda i: (0, i, 0)),
            ],
        ),
        compiler_params=pltpu.CompilerParams(
            dimension_semantics=("parallel",)),
    )(pre, h0p, c0p, whh0_b, wih1_b, whh1_b, b1)

    # TODO(synk): fc (H->H2) and fc2 (H2->1) are computed-then-discarded in the reference
    # ("out = self.sig(output)" overwrites them); omitted as dead code.

    # Reference quirk: out = sigmoid(output).view(B, -1)[:, -1] == sigmoid(output[:, T-1, H-1]).
    out = sig_last[:B, H - 1]
    h_n = hn_p[:, :B, :]
    c_n = cn_p[:, :B, :]
    return out, (h_n, c_n)


def _reference_forward(x_tokens, hidden, params):
    """Pure-JAX reference (lax.scan) for validation."""
    h0, c0 = hidden
    H = HIDDEN_DIM
    embeds = params["embedding"][x_tokens]                 # (B, T, E)
    embeds_tbe = jnp.transpose(embeds, (1, 0, 2))

    def cell(x_in, h_prev, c_prev, wih, whh, b):
        gates = x_in @ wih + h_prev @ whh + b
        i = jax.nn.sigmoid(gates[:, 0 * H:1 * H])
        f = jax.nn.sigmoid(gates[:, 1 * H:2 * H])
        g = jnp.tanh(gates[:, 2 * H:3 * H])
        o = jax.nn.sigmoid(gates[:, 3 * H:4 * H])
        c_new = f * c_prev + i * g
        return o * jnp.tanh(c_new), c_new

    def step(carry, x):
        h, c = carry
        h1, c1 = cell(x, h[0], c[0], params["wih0"], params["whh0"], params["b0"])
        h2, c2 = cell(h1, h[1], c[1], params["wih1"], params["whh1"], params["b1"])
        return (jnp.stack([h1, h2]), jnp.stack([c1, c2])), jax.nn.sigmoid(h2)

    (h_n, c_n), sig_seq = lax.scan(step, (h0, c0), embeds_tbe)
    sig_bth = jnp.transpose(sig_seq, (1, 0, 2))
    out = sig_bth.reshape(x_tokens.shape[0], -1)[:, -1]
    return out, (h_n, c_n)


def init_params(key):
    E, H = EMBED_DIM, HIDDEN_DIM
    k = 1.0 / jnp.sqrt(jnp.float32(H))
    keys = jax.random.split(key, 12)
    u = lambda kk, shape: jax.random.uniform(kk, shape, jnp.float32, -k, k)
    return {
        "embedding": jax.random.normal(keys[0], (VOCAB_SIZE, E), jnp.float32),
        # LSTM weights stored pre-transposed: (in_features, 4H); gate order i, f, g, o.
        "wih0": u(keys[1], (E, 4 * H)),
        "whh0": u(keys[2], (H, 4 * H)),
        "b0": u(keys[3], (1, 4 * H)) + u(keys[4], (1, 4 * H)),   # b_ih + b_hh folded
        "wih1": u(keys[5], (H, 4 * H)),
        "whh1": u(keys[6], (H, 4 * H)),
        "b1": u(keys[7], (1, 4 * H)) + u(keys[8], (1, 4 * H)),
        # fc / fc2 params exist in the module but their output is discarded (kept for shape parity).
        "fc_w": u(keys[9], (H, HIDDEN_DIM2)),
        "fc2_w": u(keys[10], (HIDDEN_DIM2, OUTPUT_SIZE)),
    }


if __name__ == "__main__":
    key = jax.random.PRNGKey(0)
    k_params, k_tokens = jax.random.split(key)
    params = init_params(k_params)

    x_tokens = jax.random.randint(k_tokens, (BATCH, SEQ), 0, VOCAB_SIZE, dtype=jnp.int32)
    # init_hidden: zeros of shape (n_layers, batch, hidden_dim).
    hidden0 = (jnp.zeros((N_LAYERS, BATCH, HIDDEN_DIM), jnp.float32),
               jnp.zeros((N_LAYERS, BATCH, HIDDEN_DIM), jnp.float32))

    out, (h_n, c_n) = sent_rnn_forward(x_tokens, hidden0, params)
    jax.block_until_ready((out, h_n, c_n))

    out_ref, (h_ref, c_ref) = _reference_forward(x_tokens, hidden0, params)
    assert out.shape == (BATCH,)
    assert h_n.shape == (N_LAYERS, BATCH, HIDDEN_DIM)
    assert c_n.shape == (N_LAYERS, BATCH, HIDDEN_DIM)
    # Tolerance accommodates (a) the TPU bf16 MXU path for the reference's DEFAULT-precision
    # f32 dots and (b) the kernel's explicit bf16 matmul operands; both quantize operands to
    # bf16 so per-step gate differences are ~1e-3 and accumulate mildly over the recurrence.
    assert jnp.allclose(out, out_ref, atol=3e-2), (out, out_ref)
    assert jnp.allclose(h_n, h_ref, atol=5e-2)
    assert jnp.allclose(c_n, c_ref, atol=5e-2)

    print("KERNEL_OK")
</pallas_src>

<mosaic_0001>
module attributes {stable_mosaic.version = 11 : i64} {
  func.func @_sent_rnn_kernel(%arg0: i32, %arg1: memref<8x8x512xf32, #tpu.memory_space<vmem>>, %arg2: memref<2x8x128xf32, #tpu.memory_space<vmem>>, %arg3: memref<2x8x128xf32, #tpu.memory_space<vmem>>, %arg4: memref<128x512xbf16, #tpu.memory_space<vmem>>, %arg5: memref<128x512xbf16, #tpu.memory_space<vmem>>, %arg6: memref<128x512xbf16, #tpu.memory_space<vmem>>, %arg7: memref<1x512xf32, #tpu.memory_space<vmem>>, %arg8: memref<8x128xf32, #tpu.memory_space<vmem>>, %arg9: memref<2x8x128xf32, #tpu.memory_space<vmem>>, %arg10: memref<2x8x128xf32, #tpu.memory_space<vmem>>) attributes {dimension_semantics = [#tpu.dimension_semantics<parallel>], iteration_bounds = array<i64: 1>, scalar_prefetch = 0 : i64, scratch_operands = 0 : i64, tpu.core_type = #tpu.core_type<tc>, window_params = [{transform_indices = @transform_0, window_bounds = array<i64: 8, 8, 512>}, {transform_indices = @transform_1, window_bounds = array<i64: 2, 8, 128>}, {transform_indices = @transform_2, window_bounds = array<i64: 2, 8, 128>}, {pipeline_mode = #tpu.pipeline_mode<synchronous>, transform_indices = @transform_3, window_bounds = array<i64: 128, 512>}, {pipeline_mode = #tpu.pipeline_mode<synchronous>, transform_indices = @transform_4, window_bounds = array<i64: 128, 512>}, {pipeline_mode = #tpu.pipeline_mode<synchronous>, transform_indices = @transform_5, window_bounds = array<i64: 128, 512>}, {pipeline_mode = #tpu.pipeline_mode<synchronous>, transform_indices = @transform_6, window_bounds = array<i64: 1, 512>}, {transform_indices = @transform_7, window_bounds = array<i64: 8, 128>}, {transform_indices = @transform_8, window_bounds = array<i64: 2, 8, 128>}, {transform_indices = @transform_9, window_bounds = array<i64: 2, 8, 128>}]} {
    %c0 = arith.constant 0 : index
    %c0_0 = arith.constant 0 : index
    %0 = vector.load %arg4[%c0, %c0_0] : memref<128x512xbf16, #tpu.memory_space<vmem>>, vector<128x512xbf16>
    %c0_1 = arith.constant 0 : index
    %c0_2 = arith.constant 0 : index
    %1 = vector.load %arg5[%c0_1, %c0_2] : memref<128x512xbf16, #tpu.memory_space<vmem>>, vector<128x512xbf16>
    %c0_3 = arith.constant 0 : index
    %c0_4 = arith.constant 0 : index
    %2 = vector.load %arg6[%c0_3, %c0_4] : memref<128x512xbf16, #tpu.memory_space<vmem>>, vector<128x512xbf16>
    %c0_5 = arith.constant 0 : index
    %c0_6 = arith.constant 0 : index
    %3 = vector.load %arg7[%c0_5, %c0_6] : memref<1x512xf32, #tpu.memory_space<vmem>>, vector<1x512xf32>
    %4 = vector.shape_cast %3 : vector<1x512xf32> to vector<1x512xf32>
    %5 = vector.broadcast %4 : vector<1x512xf32> to vector<8x512xf32>
    %c0_7 = arith.constant 0 : index
    %c0_8 = arith.constant 0 : index
    %c0_9 = arith.constant 0 : index
    %6 = vector.load %arg2[%c0_7, %c0_8, %c0_9] : memref<2x8x128xf32, #tpu.memory_space<vmem>>, vector<1x8x128xf32>
    %7 = vector.shape_cast %6 : vector<1x8x128xf32> to vector<8x128xf32>
    %c0_10 = arith.constant 0 : index
    %c0_11 = arith.constant 0 : index
    %c0_12 = arith.constant 0 : index
    %8 = vector.load %arg3[%c0_10, %c0_11, %c0_12] : memref<2x8x128xf32, #tpu.memory_space<vmem>>, vector<1x8x128xf32>
    %9 = vector.shape_cast %8 : vector<1x8x128xf32> to vector<8x128xf32>
    %c1 = arith.constant 1 : index
    %c0_13 = arith.constant 0 : index
    %c0_14 = arith.constant 0 : index
    %10 = vector.load %arg2[%c1, %c0_13, %c0_14] : memref<2x8x128xf32, #tpu.memory_space<vmem>>, vector<1x8x128xf32>
    %11 = vector.shape_cast %10 : vector<1x8x128xf32> to vector<8x128xf32>
    %c1_15 = arith.constant 1 : index
    %c0_16 = arith.constant 0 : index
    %c0_17 = arith.constant 0 : index
    %12 = vector.load %arg3[%c1_15, %c0_16, %c0_17] : memref<2x8x128xf32, #tpu.memory_space<vmem>>, vector<1x8x128xf32>
    %13 = vector.shape_cast %12 : vector<1x8x128xf32> to vector<8x128xf32>
    %c0_i32 = arith.constant 0 : i32
    %14 = arith.truncf %11 : vector<8x128xf32> to vector<8x128xbf16>
    %cst = arith.constant dense<0.000000e+00> : vector<8x512xf32>
    %15 = tpu.matmul %14, %2, %cst {dimension_numbers = #tpu.dot_dimension_numbers<[1], [0], [0], [1], [0, 0, 1, 1], [], []>} : vector<8x128xbf16>, vector<128x512xbf16>, vector<8x512xf32> -> vector<8x512xf32>
    %16 = arith.index_cast %c0_i32 : i32 to index
    %c0_18 = arith.constant 0 : index
    %c0_19 = arith.constant 0 : index
    %17 = vector.load %arg1[%16, %c0_18, %c0_19] : memref<8x8x512xf32, #tpu.memory_space<vmem>>, vector<1x8x512xf32>
    %18 = vector.shape_cast %17 : vector<1x8x512xf32> to vector<8x512xf32>
    %19 = arith.truncf %7 : vector<8x128xf32> to vector<8x128xbf16>
    %cst_20 = arith.constant dense<0.000000e+00> : vector<8x512xf32>
    %20 = tpu.matmul %19, %0, %cst_20 {dimension_numbers = #tpu.dot_dimension_numbers<[1], [0], [0], [1], [0, 0, 1, 1], [], []>} : vector<8x128xbf16>, vector<128x512xbf16>, vector<8x512xf32> -> vector<8x512xf32>
    %21 = arith.addf %18, %20 : vector<8x512xf32>
    %22 = vector.extract_strided_slice %21 {offsets = [0, 0], sizes = [8, 128], strides = [1, 1]} : vector<8x512xf32> to vector<8x128xf32>
    %23 = arith.negf %22 : vector<8x128xf32>
    %24 = math.exp %23 : vector<8x128xf32>
    %cst_21 = arith.constant 1.000000e+00 : f32
    %25 = vector.broadcast %cst_21 : f32 to vector<8x128xf32>
    %26 = arith.addf %25, %24 : vector<8x128xf32>
    %27 = arith.divf %25, %26 : vector<8x128xf32>
    %28 = vector.extract_strided_slice %21 {offsets = [0, 128], sizes = [8, 128], strides = [1, 1]} : vector<8x512xf32> to vector<8x128xf32>
    %29 = arith.negf %28 : vector<8x128xf32>
    %30 = math.exp %29 : vector<8x128xf32>
    %cst_22 = arith.constant 1.000000e+00 : f32
    %31 = vector.broadcast %cst_22 : f32 to vector<8x128xf32>
    %32 = arith.addf %31, %30 : vector<8x128xf32>
    %33 = arith.divf %31, %32 : vector<8x128xf32>
    %34 = vector.extract_strided_slice %21 {offsets = [0, 256], sizes = [8, 128], strides = [1, 1]} : vector<8x512xf32> to vector<8x128xf32>
    %35 = math.tanh %34 : vector<8x128xf32>
    %36 = vector.extract_strided_slice %21 {offsets = [0, 384], sizes = [8, 128], strides = [1, 1]} : vector<8x512xf32> to vector<8x128xf32>
    %37 = arith.negf %36 : vector<8x128xf32>
    %38 = math.exp %37 : vector<8x128xf32>
    %cst_23 = arith.constant 1.000000e+00 : f32
    %39 = vector.broadcast %cst_23 : f32 to vector<8x128xf32>
    %40 = arith.addf %39, %38 : vector<8x128xf32>
    %41 = arith.divf %39, %40 : vector<8x128xf32>
    %42 = arith.mulf %33, %9 : vector<8x128xf32>
    %43 = arith.mulf %27, %35 : vector<8x128xf32>
    %44 = arith.addf %42, %43 : vector<8x128xf32>
    %45 = math.tanh %44 : vector<8x128xf32>
    %46 = arith.mulf %41, %45 : vector<8x128xf32>
    %47 = arith.truncf %46 : vector<8x128xf32> to vector<8x128xbf16>
    %cst_24 = arith.constant dense<0.000000e+00> : vector<8x512xf32>
    %48 = tpu.matmul %47, %1, %cst_24 {dimension_numbers = #tpu.dot_dimension_numbers<[1], [0], [0], [1], [0, 0, 1, 1], [], []>} : vector<8x128xbf16>, vector<128x512xbf16>, vector<8x512xf32> -> vector<8x512xf32>
    %49 = arith.addf %48, %15 : vector<8x512xf32>
    %50 = arith.addf %49, %5 : vector<8x512xf32>
    %51 = vector.extract_strided_slice %50 {offsets = [0, 0], sizes = [8, 128], strides = [1, 1]} : vector<8x512xf32> to vector<8x128xf32>
    %52 = arith.negf %51 : vector<8x128xf32>
    %53 = math.exp %52 : vector<8x128xf32>
    %cst_25 = arith.constant 1.000000e+00 : f32
    %54 = vector.broadcast %cst_25 : f32 to vector<8x128xf32>
    %55 = arith.addf %54, %53 : vector<8x128xf32>
    %56 = arith.divf %54, %55 : vector<8x128xf32>
    %57 = vector.extract_strided_slice %50 {offsets = [0, 128], sizes = [8, 128], strides = [1, 1]} : vector<8x512xf32> to vector<8x128xf32>
    %58 = arith.negf %57 : vector<8x128xf32>
    %59 = math.exp %58 : vector<8x128xf32>
    %cst_26 = arith.constant 1.000000e+00 : f32
    %60 = vector.broadcast %cst_26 : f32 to vector<8x128xf32>
    %61 = arith.addf %60, %59 : vector<8x128xf32>
    %62 = arith.divf %60, %61 : vector<8x128xf32>
    %63 = vector.extract_strided_slice %50 {offsets = [0, 256], sizes = [8, 128], strides = [1, 1]} : vector<8x512xf32> to vector<8x128xf32>
    %64 = math.tanh %63 : vector<8x128xf32>
    %65 = vector.extract_strided_slice %50 {offsets = [0, 384], sizes = [8, 128], strides = [1, 1]} : vector<8x512xf32> to vector<8x128xf32>
    %66 = arith.negf %65 : vector<8x128xf32>
    %67 = math.exp %66 : vector<8x128xf32>
    %cst_27 = arith.constant 1.000000e+00 : f32
    %68 = vector.broadcast %cst_27 : f32 to vector<8x128xf32>
    %69 = arith.addf %68, %67 : vector<8x128xf32>
    %70 = arith.divf %68, %69 : vector<8x128xf32>
    %71 = arith.mulf %62, %13 : vector<8x128xf32>
    %72 = arith.mulf %56, %64 : vector<8x128xf32>
    %73 = arith.addf %71, %72 : vector<8x128xf32>
    %74 = math.tanh %73 : vector<8x128xf32>
    %75 = arith.mulf %70, %74 : vector<8x128xf32>
    %c1_i32 = arith.constant 1 : i32
    %76 = arith.truncf %75 : vector<8x128xf32> to vector<8x128xbf16>
    %cst_28 = arith.constant dense<0.000000e+00> : vector<8x512xf32>
    %77 = tpu.matmul %76, %2, %cst_28 {dimension_numbers = #tpu.dot_dimension_numbers<[1], [0], [0], [1], [0, 0, 1, 1], [], []>} : vector<8x128xbf16>, vector<128x512xbf16>, vector<8x512xf32> -> vector<8x512xf32>
    %78 = arith.index_cast %c1_i32 : i32 to index
    %c0_29 = arith.constant 0 : index
    %c0_30 = arith.constant 0 : index
    %79 = vector.load %arg1[%78, %c0_29, %c0_30] : memref<8x8x512xf32, #tpu.memory_space<vmem>>, vector<1x8x512xf32>
    %80 = vector.shape_cast %79 : vector<1x8x512xf32> to vector<8x512xf32>
    %81 = arith.truncf %46 : vector<8x128xf32> to vector<8x128xbf16>
    %cst_31 = arith.constant dense<0.000000e+00> : vector<8x512xf32>
    %82 = tpu.matmul %81, %0, %cst_31 {dimension_numbers = #tpu.dot_dimension_numbers<[1], [0], [0], [1], [0, 0, 1, 1], [], []>} : vector<8x128xbf16>, vector<128x512xbf16>, vector<8x512xf32> -> vector<8x512xf32>
    %83 = arith.addf %80, %82 : vector<8x512xf32>
    %84 = vector.extract_strided_slice %83 {offsets = [0, 0], sizes = [8, 128], strides = [1, 1]} : vector<8x512xf32> to vector<8x128xf32>
    %85 = arith.negf %84 : vector<8x128xf32>
    %86 = math.exp %85 : vector<8x128xf32>
    %cst_32 = arith.constant 1.000000e+00 : f32
    %87 = vector.broadcast %cst_32 : f32 to vector<8x128xf32>
    %88 = arith.addf %87, %86 : vector<8x128xf32>
    %89 = arith.divf %87, %88 : vector<8x128xf32>
    %90 = vector.extract_strided_slice %83 {offsets = [0, 128], sizes = [8, 128], strides = [1, 1]} : vector<8x512xf32> to vector<8x128xf32>
    %91 = arith.negf %90 : vector<8x128xf32>
    %92 = math.exp %91 : vector<8x128xf32>
    %cst_33 = arith.constant 1.000000e+00 : f32
    %93 = vector.broadcast %cst_33 : f32 to vector<8x128xf32>
    %94 = arith.addf %93, %92 : vector<8x128xf32>
    %95 = arith.divf %93, %94 : vector<8x128xf32>
    %96 = vector.extract_strided_slice %83 {offsets = [0, 256], sizes = [8, 128], strides = [1, 1]} : vector<8x512xf32> to vector<8x128xf32>
    %97 = math.tanh %96 : vector<8x128xf32>
    %98 = vector.extract_strided_slice %83 {offsets = [0, 384], sizes = [8, 128], strides = [1, 1]} : vector<8x512xf32> to vector<8x128xf32>
    %99 = arith.negf %98 : vector<8x128xf32>
    %100 = math.exp %99 : vector<8x128xf32>
    %cst_34 = arith.constant 1.000000e+00 : f32
    %101 = vector.broadcast %cst_34 : f32 to vector<8x128xf32>
    %102 = arith.addf %101, %100 : vector<8x128xf32>
    %103 = arith.divf %101, %102 : vector<8x128xf32>
    %104 = arith.mulf %95, %44 : vector<8x128xf32>
    %105 = arith.mulf %89, %97 : vector<8x128xf32>
    %106 = arith.addf %104, %105 : vector<8x128xf32>
    %107 = math.tanh %106 : vector<8x128xf32>
    %108 = arith.mulf %103, %107 : vector<8x128xf32>
    %109 = arith.truncf %108 : vector<8x128xf32> to vector<8x128xbf16>
    %cst_35 = arith.constant dense<0.000000e+00> : vector<8x512xf32>
    %110 = tpu.matmul %109, %1, %cst_35 {dimension_numbers = #tpu.dot_dimension_numbers<[1], [0], [0], [1], [0, 0, 1, 1], [], []>} : vector<8x128xbf16>, vector<128x512xbf16>, vector<8x512xf32> -> vector<8x512xf32>
    %111 = arith.addf %110, %77 : vector<8x512xf32>
    %112 = arith.addf %111, %5 : vector<8x512xf32>
    %113 = vector.extract_strided_slice %112 {offsets = [0, 0], sizes = [8, 128], strides = [1, 1]} : vector<8x512xf32> to vector<8x128xf32>
    %114 = arith.negf %113 : vector<8x128xf32>
    %115 = math.exp %114 : vector<8x128xf32>
    %cst_36 = arith.constant 1.000000e+00 : f32
    %116 = vector.broadcast %cst_36 : f32 to vector<8x128xf32>
    %117 = arith.addf %116, %115 : vector<8x128xf32>
    %118 = arith.divf %116, %117 : vector<8x128xf32>
    %119 = vector.extract_strided_slice %112 {offsets = [0, 128], sizes = [8, 128], strides = [1, 1]} : vector<8x512xf32> to vector<8x128xf32>
    %120 = arith.negf %119 : vector<8x128xf32>
    %121 = math.exp %120 : vector<8x128xf32>
    %cst_37 = arith.constant 1.000000e+00 : f32
    %122 = vector.broadcast %cst_37 : f32 to vector<8x128xf32>
    %123 = arith.addf %122, %121 : vector<8x128xf32>
    %124 = arith.divf %122, %123 : vector<8x128xf32>
    %125 = vector.extract_strided_slice %112 {offsets = [0, 256], sizes = [8, 128], strides = [1, 1]} : vector<8x512xf32> to vector<8x128xf32>
    %126 = math.tanh %125 : vector<8x128xf32>
    %127 = vector.extract_strided_slice %112 {offsets = [0, 384], sizes = [8, 128], strides = [1, 1]} : vector<8x512xf32> to vector<8x128xf32>
    %128 = arith.negf %127 : vector<8x128xf32>
    %129 = math.exp %128 : vector<8x128xf32>
    %cst_38 = arith.constant 1.000000e+00 : f32
    %130 = vector.broadcast %cst_38 : f32 to vector<8x128xf32>
    %131 = arith.addf %130, %129 : vector<8x128xf32>
    %132 = arith.divf %130, %131 : vector<8x128xf32>
    %133 = arith.mulf %124, %73 : vector<8x128xf32>
    %134 = arith.mulf %118, %126 : vector<8x128xf32>
    %135 = arith.addf %133, %134 : vector<8x128xf32>
    %136 = math.tanh %135 : vector<8x128xf32>
    %137 = arith.mulf %132, %136 : vector<8x128xf32>
    %c2_i32 = arith.constant 2 : i32
    %138 = arith.truncf %137 : vector<8x128xf32> to vector<8x128xbf16>
    %cst_39 = arith.constant dense<0.000000e+00> : vector<8x512xf32>
    %139 = tpu.matmul %138, %2, %cst_39 {dimension_numbers = #tpu.dot_dimension_numbers<[1], [0], [0], [1], [0, 0, 1, 1], [], []>} : vector<8x128xbf16>, vector<128x512xbf16>, vector<8x512xf32> -> vector<8x512xf32>
    %140 = arith.index_cast %c2_i32 : i32 to index
    %c0_40 = arith.constant 0 : index
    %c0_41 = arith.constant 0 : index
    %141 = vector.load %arg1[%140, %c0_40, %c0_41] : memref<8x8x512xf32, #tpu.memory_space<vmem>>, vector<1x8x512xf32>
    %142 = vector.shape_cast %141 : vector<1x8x512xf32> to vector<8x512xf32>
    %143 = arith.truncf %108 : vector<8x128xf32> to vector<8x128xbf16>
    %cst_42 = arith.constant dense<0.000000e+00> : vector<8x512xf32>
    %144 = tpu.matmul %143, %0, %cst_42 {dimension_numbers = #tpu.dot_dimension_numbers<[1], [0], [0], [1], [0, 0, 1, 1], [], []>} : vector<8x128xbf16>, vector<128x512xbf16>, vector<8x512xf32> -> vector<8x512xf32>
    %145 = arith.addf %142, %144 : vector<8x512xf32>
    %146 = vector.extract_strided_slice %145 {offsets = [0, 0], sizes = [8, 128], strides = [1, 1]} : vector<8x512xf32> to vector<8x128xf32>
    %147 = arith.negf %146 : vector<8x128xf32>
    %148 = math.exp %147 : vector<8x128xf32>
    %cst_43 = arith.constant 1.000000e+00 : f32
    %149 = vector.broadcast %cst_43 : f32 to vector<8x128xf32>
    %150 = arith.addf %149, %148 : vector<8x128xf32>
    %151 = arith.divf %149, %150 : vector<8x128xf32>
    %152 = vector.extract_strided_slice %145 {offsets = [0, 128], sizes = [8, 128], strides = [1, 1]} : vector<8x512xf32> to vector<8x128xf32>
    %153 = arith.negf %152 : vector<8x128xf32>
    %154 = math.exp %153 : vector<8x128xf32>
    %cst_44 = arith.constant 1.000000e+00 : f32
    %155 = vector.broadcast %cst_44 : f32 to vector<8x128xf32>
    %156 = arith.addf %155, %154 : vector<8x128xf32>
    %157 = arith.divf %155, %156 : vector<8x128xf32>
    %158 = vector.extract_strided_slice %145 {offsets = [0, 256], sizes = [8, 128], strides = [1, 1]} : vector<8x512xf32> to vector<8x128xf32>
    %159 = math.tanh %158 : vector<8x128xf32>
    %160 = vector.extract_strided_slice %145 {offsets = [0, 384], sizes = [8, 128], strides = [1, 1]} : vector<8x512xf32> to vector<8x128xf32>
    %161 = arith.negf %160 : vector<8x128xf32>
    %162 = math.exp %161 : vector<8x128xf32>
    %cst_45 = arith.constant 1.000000e+00 : f32
    %163 = vector.broadcast %cst_45 : f32 to vector<8x128xf32>
    %164 = arith.addf %163, %162 : vector<8x128xf32>
    %165 = arith.divf %163, %164 : vector<8x128xf32>
    %166 = arith.mulf %157, %106 : vector<8x128xf32>
    %167 = arith.mulf %151, %159 : vector<8x128xf32>
    %168 = arith.addf %166, %167 : vector<8x128xf32>
    %169 = math.tanh %168 : vector<8x128xf32>
    %170 = arith.mulf %165, %169 : vector<8x128xf32>
    %171 = arith.truncf %170 : vector<8x128xf32> to vector<8x128xbf16>
    %cst_46 = arith.constant dense<0.000000e+00> : vector<8x512xf32>
    %172 = tpu.matmul %171, %1, %cst_46 {dimension_numbers = #tpu.dot_dimension_numbers<[1], [0], [0], [1], [0, 0, 1, 1], [], []>} : vector<8x128xbf16>, vector<128x512xbf16>, vector<8x512xf32> -> vector<8x512xf32>
    %173 = arith.addf %172, %139 : vector<8x512xf32>
    %174 = arith.addf %173, %5 : vector<8x512xf32>
    %175 = vector.extract_strided_slice %174 {offsets = [0, 0], sizes = [8, 128], strides = [1, 1]} : vector<8x512xf32> to vector<8x128xf32>
    %176 = arith.negf %175 : vector<8x128xf32>
    %177 = math.exp %176 : vector<8x128xf32>
    %cst_47 = arith.constant 1.000000e+00 : f32
    %178 = vector.broadcast %cst_47 : f32 to vector<8x128xf32>
    %179 = arith.addf %178, %177 : vector<8x128xf32>
    %180 = arith.divf %178, %179 : vector<8x128xf32>
    %181 = vector.extract_strided_slice %174 {offsets = [0, 128], sizes = [8, 128], strides = [1, 1]} : vector<8x512xf32> to vector<8x128xf32>
    %182 = arith.negf %181 : vector<8x128xf32>
    %183 = math.exp %182 : vector<8x128xf32>
    %cst_48 = arith.constant 1.000000e+00 : f32
    %184 = vector.broadcast %cst_48 : f32 to vector<8x128xf32>
    %185 = arith.addf %184, %183 : vector<8x128xf32>
    %186 = arith.divf %184, %185 : vector<8x128xf32>
    %187 = vector.extract_strided_slice %174 {offsets = [0, 256], sizes = [8, 128], strides = [1, 1]} : vector<8x512xf32> to vector<8x128xf32>
    %188 = math.tanh %187 : vector<8x128xf32>
    %189 = vector.extract_strided_slice %174 {offsets = [0, 384], sizes = [8, 128], strides = [1, 1]} : vector<8x512xf32> to vector<8x128xf32>
    %190 = arith.negf %189 : vector<8x128xf32>
    %191 = math.exp %190 : vector<8x128xf32>
    %cst_49 = arith.constant 1.000000e+00 : f32
    %192 = vector.broadcast %cst_49 : f32 to vector<8x128xf32>
    %193 = arith.addf %192, %191 : vector<8x128xf32>
    %194 = arith.divf %192, %193 : vector<8x128xf32>
    %195 = arith.mulf %186, %135 : vector<8x128xf32>
    %196 = arith.mulf %180, %188 : vector<8x128xf32>
    %197 = arith.addf %195, %196 : vector<8x128xf32>
    %198 = math.tanh %197 : vector<8x128xf32>
    %199 = arith.mulf %194, %198 : vector<8x128xf32>
    %c3_i32 = arith.constant 3 : i32
    %200 = arith.truncf %199 : vector<8x128xf32> to vector<8x128xbf16>
    %cst_50 = arith.constant dense<0.000000e+00> : vector<8x512xf32>
    %201 = tpu.matmul %200, %2, %cst_50 {dimension_numbers = #tpu.dot_dimension_numbers<[1], [0], [0], [1], [0, 0, 1, 1], [], []>} : vector<8x128xbf16>, vector<128x512xbf16>, vector<8x512xf32> -> vector<8x512xf32>
    %202 = arith.index_cast %c3_i32 : i32 to index
    %c0_51 = arith.constant 0 : index
    %c0_52 = arith.constant 0 : index
    %203 = vector.load %arg1[%202, %c0_51, %c0_52] : memref<8x8x512xf32, #tpu.memory_space<vmem>>, vector<1x8x512xf32>
    %204 = vector.shape_cast %203 : vector<1x8x512xf32> to vector<8x512xf32>
    %205 = arith.truncf %170 : vector<8x128xf32> to vector<8x128xbf16>
    %cst_53 = arith.constant dense<0.000000e+00> : vector<8x512xf32>
    %206 = tpu.matmul %205, %0, %cst_53 {dimension_numbers = #tpu.dot_dimension_numbers<[1], [0], [0], [1], [0, 0, 1, 1], [], []>} : vector<8x128xbf16>, vector<128x512xbf16>, vector<8x512xf32> -> vector<8x512xf32>
    %207 = arith.addf %204, %206 : vector<8x512xf32>
    %208 = vector.extract_strided_slice %207 {offsets = [0, 0], sizes = [8, 128], strides = [1, 1]} : vector<8x512xf32> to vector<8x128xf32>
    %209 = arith.negf %208 : vector<8x128xf32>
    %210 = math.exp %209 : vector<8x128xf32>
    %cst_54 = arith.constant 1.000000e+00 : f32
    %211 = vector.broadcast %cst_54 : f32 to vector<8x128xf32>
    %212 = arith.addf %211, %210 : vector<8x128xf32>
    %213 = arith.divf %211, %212 : vector<8x128xf32>
    %214 = vector.extract_strided_slice %207 {offsets = [0, 128], sizes = [8, 128], strides = [1, 1]} : vector<8x512xf32> to vector<8x128xf32>
    %215 = arith.negf %214 : vector<8x128xf32>
    %216 = math.exp %215 : vector<8x128xf32>
    %cst_55 = arith.constant 1.000000e+00 : f32
    %217 = vector.broadcast %cst_55 : f32 to vector<8x128xf32>
    %218 = arith.addf %217, %216 : vector<8x128xf32>
    %219 = arith.divf %217, %218 : vector<8x128xf32>
    %220 = vector.extract_strided_slice %207 {offsets = [0, 256], sizes = [8, 128], strides = [1, 1]} : vector<8x512xf32> to vector<8x128xf32>
    %221 = math.tanh %220 : vector<8x128xf32>
    %222 = vector.extract_strided_slice %207 {offsets = [0, 384], sizes = [8, 128], strides = [1, 1]} : vector<8x512xf32> to vector<8x128xf32>
    %223 = arith.negf %222 : vector<8x128xf32>
    %224 = math.exp %223 : vector<8x128xf32>
    %cst_56 = arith.constant 1.000000e+00 : f32
    %225 = vector.broadcast %cst_56 : f32 to vector<8x128xf32>
    %226 = arith.addf %225, %224 : vector<8x128xf32>
    %227 = arith.divf %225, %226 : vector<8x128xf32>
    %228 = arith.mulf %219, %168 : vector<8x128xf32>
    %229 = arith.mulf %213, %221 : vector<8x128xf32>
    %230 = arith.addf %228, %229 : vector<8x128xf32>
    %231 = math.tanh %230 : vector<8x128xf32>
    %232 = arith.mulf %227, %231 : vector<8x128xf32>
    %233 = arith.truncf %232 : vector<8x128xf32> to vector<8x128xbf16>
    %cst_57 = arith.constant dense<0.000000e+00> : vector<8x512xf32>
    %234 = tpu.matmul %233, %1, %cst_57 {dimension_numbers = #tpu.dot_dimension_numbers<[1], [0], [0], [1], [0, 0, 1, 1], [], []>} : vector<8x128xbf16>, vector<128x512xbf16>, vector<8x512xf32> -> vector<8x512xf32>
    %235 = arith.addf %234, %201 : vector<8x512xf32>
    %236 = arith.addf %235, %5 : vector<8x512xf32>
    %237 = vector.extract_strided_slice %236 {offsets = [0, 0], sizes = [8, 128], strides = [1, 1]} : vector<8x512xf32> to vector<8x128xf32>
    %238 = arith.negf %237 : vector<8x128xf32>
    %239 = math.exp %238 : vector<8x128xf32>
    %cst_58 = arith.constant 1.000000e+00 : f32
    %240 = vector.broadcast %cst_58 : f32 to vector<8x128xf32>
    %241 = arith.addf %240, %239 : vector<8x128xf32>
    %242 = arith.divf %240, %241 : vector<8x128xf32>
    %243 = vector.extract_strided_slice %236 {offsets = [0, 128], sizes = [8, 128], strides = [1, 1]} : vector<8x512xf32> to vector<8x128xf32>
    %244 = arith.negf %243 : vector<8x128xf32>
    %245 = math.exp %244 : vector<8x128xf32>
    %cst_59 = arith.constant 1.000000e+00 : f32
    %246 = vector.broadcast %cst_59 : f32 to vector<8x128xf32>
    %247 = arith.addf %246, %245 : vector<8x128xf32>
    %248 = arith.divf %246, %247 : vector<8x128xf32>
    %249 = vector.extract_strided_slice %236 {offsets = [0, 256], sizes = [8, 128], strides = [1, 1]} : vector<8x512xf32> to vector<8x128xf32>
    %250 = math.tanh %249 : vector<8x128xf32>
    %251 = vector.extract_strided_slice %236 {offsets = [0, 384], sizes = [8, 128], strides = [1, 1]} : vector<8x512xf32> to vector<8x128xf32>
    %252 = arith.negf %251 : vector<8x128xf32>
    %253 = math.exp %252 : vector<8x128xf32>
    %cst_60 = arith.constant 1.000000e+00 : f32
    %254 = vector.broadcast %cst_60 : f32 to vector<8x128xf32>
    %255 = arith.addf %254, %253 : vector<8x128xf32>
    %256 = arith.divf %254, %255 : vector<8x128xf32>
    %257 = arith.mulf %248, %197 : vector<8x128xf32>
    %258 = arith.mulf %242, %250 : vector<8x128xf32>
    %259 = arith.addf %257, %258 : vector<8x128xf32>
    %260 = math.tanh %259 : vector<8x128xf32>
    %261 = arith.mulf %256, %260 : vector<8x128xf32>
    %c4_i32 = arith.constant 4 : i32
    %262 = arith.truncf %261 : vector<8x128xf32> to vector<8x128xbf16>
    %cst_61 = arith.constant dense<0.000000e+00> : vector<8x512xf32>
    %263 = tpu.matmul %262, %2, %cst_61 {dimension_numbers = #tpu.dot_dimension_numbers<[1], [0], [0], [1], [0, 0, 1, 1], [], []>} : vector<8x128xbf16>, vector<128x512xbf16>, vector<8x512xf32> -> vector<8x512xf32>
    %264 = arith.index_cast %c4_i32 : i32 to index
    %c0_62 = arith.constant 0 : index
    %c0_63 = arith.constant 0 : index
    %265 = vector.load %arg1[%264, %c0_62, %c0_63] : memref<8x8x512xf32, #tpu.memory_space<vmem>>, vector<1x8x512xf32>
    %266 = vector.shape_cast %265 : vector<1x8x512xf32> to vector<8x512xf32>
    %267 = arith.truncf %232 : vector<8x128xf32> to vector<8x128xbf16>
    %cst_64 = arith.constant dense<0.000000e+00> : vector<8x512xf32>
    %268 = tpu.matmul %267, %0, %cst_64 {dimension_numbers = #tpu.dot_dimension_numbers<[1], [0], [0], [1], [0, 0, 1, 1], [], []>} : vector<8x128xbf16>, vector<128x512xbf16>, vector<8x512xf32> -> vector<8x512xf32>
    %269 = arith.addf %266, %268 : vector<8x512xf32>
    %270 = vector.extract_strided_slice %269 {offsets = [0, 0], sizes = [8, 128], strides = [1, 1]} : vector<8x512xf32> to vector<8x128xf32>
    %271 = arith.negf %270 : vector<8x128xf32>
    %272 = math.exp %271 : vector<8x128xf32>
    %cst_65 = arith.constant 1.000000e+00 : f32
    %273 = vector.broadcast %cst_65 : f32 to vector<8x128xf32>
    %274 = arith.addf %273, %272 : vector<8x128xf32>
    %275 = arith.divf %273, %274 : vector<8x128xf32>
    %276 = vector.extract_strided_slice %269 {offsets = [0, 128], sizes = [8, 128], strides = [1, 1]} : vector<8x512xf32> to vector<8x128xf32>
    %277 = arith.negf %276 : vector<8x128xf32>
    %278 = math.exp %277 : vector<8x128xf32>
    %cst_66 = arith.constant 1.000000e+00 : f32
    %279 = vector.broadcast %cst_66 : f32 to vector<8x128xf32>
    %280 = arith.addf %279, %278 : vector<8x128xf32>
    %281 = arith.divf %279, %280 : vector<8x128xf32>
    %282 = vector.extract_strided_slice %269 {offsets = [0, 256], sizes = [8, 128], strides = [1, 1]} : vector<8x512xf32> to vector<8x128xf32>
    %283 = math.tanh %282 : vector<8x128xf32>
    %284 = vector.extract_strided_slice %269 {offsets = [0, 384], sizes = [8, 128], strides = [1, 1]} : vector<8x512xf32> to vector<8x128xf32>
    %285 = arith.negf %284 : vector<8x128xf32>
    %286 = math.exp %285 : vector<8x128xf32>
    %cst_67 = arith.constant 1.000000e+00 : f32
    %287 = vector.broadcast %cst_67 : f32 to vector<8x128xf32>
    %288 = arith.addf %287, %286 : vector<8x128xf32>
    %289 = arith.divf %287, %288 : vector<8x128xf32>
    %290 = arith.mulf %281, %230 : vector<8x128xf32>
    %291 = arith.mulf %275, %283 : vector<8x128xf32>
    %292 = arith.addf %290, %291 : vector<8x128xf32>
    %293 = math.tanh %292 : vector<8x128xf32>
    %294 = arith.mulf %289, %293 : vector<8x128xf32>
    %295 = arith.truncf %294 : vector<8x128xf32> to vector<8x128xbf16>
    %cst_68 = arith.constant dense<0.000000e+00> : vector<8x512xf32>
    %296 = tpu.matmul %295, %1, %cst_68 {dimension_numbers = #tpu.dot_dimension_numbers<[1], [0], [0], [1], [0, 0, 1, 1], [], []>} : vector<8x128xbf16>, vector<128x512xbf16>, vector<8x512xf32> -> vector<8x512xf32>
    %297 = arith.addf %296, %263 : vector<8x512xf32>
    %298 = arith.addf %297, %5 : vector<8x512xf32>
    %299 = vector.extract_strided_slice %298 {offsets = [0, 0], sizes = [8, 128], strides = [1, 1]} : vector<8x512xf32> to vector<8x128xf32>
    %300 = arith.negf %299 : vector<8x128xf32>
    %301 = math.exp %300 : vector<8x128xf32>
    %cst_69 = arith.constant 1.000000e+00 : f32
    %302 = vector.broadcast %cst_69 : f32 to vector<8x128xf32>
    %303 = arith.addf %302, %301 : vector<8x128xf32>
    %304 = arith.divf %302, %303 : vector<8x128xf32>
    %305 = vector.extract_strided_slice %298 {offsets = [0, 128], sizes = [8, 128], strides = [1, 1]} : vector<8x512xf32> to vector<8x128xf32>
    %306 = arith.negf %305 : vector<8x128xf32>
    %307 = math.exp %306 : vector<8x128xf32>
    %cst_70 = arith.constant 1.000000e+00 : f32
    %308 = vector.broadcast %cst_70 : f32 to vector<8x128xf32>
    %309 = arith.addf %308, %307 : vector<8x128xf32>
    %310 = arith.divf %308, %309 : vector<8x128xf32>
    %311 = vector.extract_strided_slice %298 {offsets = [0, 256], sizes = [8, 128], strides = [1, 1]} : vector<8x512xf32> to vector<8x128xf32>
    %312 = math.tanh %311 : vector<8x128xf32>
    %313 = vector.extract_strided_slice %298 {offsets = [0, 384], sizes = [8, 128], strides = [1, 1]} : vector<8x512xf32> to vector<8x128xf32>
    %314 = arith.negf %313 : vector<8x128xf32>
    %315 = math.exp %314 : vector<8x128xf32>
    %cst_71 = arith.constant 1.000000e+00 : f32
    %316 = vector.broadcast %cst_71 : f32 to vector<8x128xf32>
    %317 = arith.addf %316, %315 : vector<8x128xf32>
    %318 = arith.divf %316, %317 : vector<8x128xf32>
    %319 = arith.mulf %310, %259 : vector<8x128xf32>
    %320 = arith.mulf %304, %312 : vector<8x128xf32>
    %321 = arith.addf %319, %320 : vector<8x128xf32>
    %322 = math.tanh %321 : vector<8x128xf32>
    %323 = arith.mulf %318, %322 : vector<8x128xf32>
    %c5_i32 = arith.constant 5 : i32
    %324 = arith.truncf %323 : vector<8x128xf32> to vector<8x128xbf16>
    %cst_72 = arith.constant dense<0.000000e+00> : vector<8x512xf32>
    %325 = tpu.matmul %324, %2, %cst_72 {dimension_numbers = #tpu.dot_dimension_numbers<[1], [0], [0], [1], [0, 0, 1, 1], [], []>} : vector<8x128xbf16>, vector<128x512xbf16>, vector<8x512xf32> -> vector<8x512xf32>
    %326 = arith.index_cast %c5_i32 : i32 to index
    %c0_73 = arith.constant 0 : index
    %c0_74 = arith.constant 0 : index
    %327 = vector.load %arg1[%326, %c0_73, %c0_74] : memref<8x8x512xf32, #tpu.memory_space<vmem>>, vector<1x8x512xf32>
    %328 = vector.shape_cast %327 : vector<1x8x512xf32> to vector<8x512xf32>
    %329 = arith.truncf %294 : vector<8x128xf32> to vector<8x128xbf16>
    %cst_75 = arith.constant dense<0.000000e+00> : vector<8x512xf32>
    %330 = tpu.matmul %329, %0, %cst_75 {dimension_numbers = #tpu.dot_dimension_numbers<[1], [0], [0], [1], [0, 0, 1, 1], [], []>} : vector<8x128xbf16>, vector<128x512xbf16>, vector<8x512xf32> -> vector<8x512xf32>
    %331 = arith.addf %328, %330 : vector<8x512xf32>
    %332 = vector.extract_strided_slice %331 {offsets = [0, 0], sizes = [8, 128], strides = [1, 1]} : vector<8x512xf32> to vector<8x128xf32>
    %333 = arith.negf %332 : vector<8x128xf32>
    %334 = math.exp %333 : vector<8x128xf32>
    %cst_76 = arith.constant 1.000000e+00 : f32
    %335 = vector.broadcast %cst_76 : f32 to vector<8x128xf32>
    %336 = arith.addf %335, %334 : vector<8x128xf32>
    %337 = arith.divf %335, %336 : vector<8x128xf32>
    %338 = vector.extract_strided_slice %331 {offsets = [0, 128], sizes = [8, 128], strides = [1, 1]} : vector<8x512xf32> to vector<8x128xf32>
    %339 = arith.negf %338 : vector<8x128xf32>
    %340 = math.exp %339 : vector<8x128xf32>
    %cst_77 = arith.constant 1.000000e+00 : f32
    %341 = vector.broadcast %cst_77 : f32 to vector<8x128xf32>
    %342 = arith.addf %341, %340 : vector<8x128xf32>
    %343 = arith.divf %341, %342 : vector<8x128xf32>
    %344 = vector.extract_strided_slice %331 {offsets = [0, 256], sizes = [8, 128], strides = [1, 1]} : vector<8x512xf32> to vector<8x128xf32>
    %345 = math.tanh %344 : vector<8x128xf32>
    %346 = vector.extract_strided_slice %331 {offsets = [0, 384], sizes = [8, 128], strides = [1, 1]} : vector<8x512xf32> to vector<8x128xf32>
    %347 = arith.negf %346 : vector<8x128xf32>
    %348 = math.exp %347 : vector<8x128xf32>
    %cst_78 = arith.constant 1.000000e+00 : f32
    %349 = vector.broadcast %cst_78 : f32 to vector<8x128xf32>
    %350 = arith.addf %349, %348 : vector<8x128xf32>
    %351 = arith.divf %349, %350 : vector<8x128xf32>
    %352 = arith.mulf %343, %292 : vector<8x128xf32>
    %353 = arith.mulf %337, %345 : vector<8x128xf32>
    %354 = arith.addf %352, %353 : vector<8x128xf32>
    %355 = math.tanh %354 : vector<8x128xf32>
    %356 = arith.mulf %351, %355 : vector<8x128xf32>
    %357 = arith.truncf %356 : vector<8x128xf32> to vector<8x128xbf16>
    %cst_79 = arith.constant dense<0.000000e+00> : vector<8x512xf32>
    %358 = tpu.matmul %357, %1, %cst_79 {dimension_numbers = #tpu.dot_dimension_numbers<[1], [0], [0], [1], [0, 0, 1, 1], [], []>} : vector<8x128xbf16>, vector<128x512xbf16>, vector<8x512xf32> -> vector<8x512xf32>
    %359 = arith.addf %358, %325 : vector<8x512xf32>
    %360 = arith.addf %359, %5 : vector<8x512xf32>
    %361 = vector.extract_strided_slice %360 {offsets = [0, 0], sizes = [8, 128], strides = [1, 1]} : vector<8x512xf32> to vector<8x128xf32>
    %362 = arith.negf %361 : vector<8x128xf32>
    %363 = math.exp %362 : vector<8x128xf32>
    %cst_80 = arith.constant 1.000000e+00 : f32
    %364 = vector.broadcast %cst_80 : f32 to vector<8x128xf32>
    %365 = arith.addf %364, %363 : vector<8x128xf32>
    %366 = arith.divf %364, %365 : vector<8x128xf32>
    %367 = vector.extract_strided_slice %360 {offsets = [0, 128], sizes = [8, 128], strides = [1, 1]} : vector<8x512xf32> to vector<8x128xf32>
    %368 = arith.negf %367 : vector<8x128xf32>
    %369 = math.exp %368 : vector<8x128xf32>
    %cst_81 = arith.constant 1.000000e+00 : f32
    %370 = vector.broadcast %cst_81 : f32 to vector<8x128xf32>
    %371 = arith.addf %370, %369 : vector<8x128xf32>
    %372 = arith.divf %370, %371 : vector<8x128xf32>
    %373 = vector.extract_strided_slice %360 {offsets = [0, 256], sizes = [8, 128], strides = [1, 1]} : vector<8x512xf32> to vector<8x128xf32>
    %374 = math.tanh %373 : vector<8x128xf32>
    %375 = vector.extract_strided_slice %360 {offsets = [0, 384], sizes = [8, 128], strides = [1, 1]} : vector<8x512xf32> to vector<8x128xf32>
    %376 = arith.negf %375 : vector<8x128xf32>
    %377 = math.exp %376 : vector<8x128xf32>
    %cst_82 = arith.constant 1.000000e+00 : f32
    %378 = vector.broadcast %cst_82 : f32 to vector<8x128xf32>
    %379 = arith.addf %378, %377 : vector<8x128xf32>
    %380 = arith.divf %378, %379 : vector<8x128xf32>
    %381 = arith.mulf %372, %321 : vector<8x128xf32>
    %382 = arith.mulf %366, %374 : vector<8x128xf32>
    %383 = arith.addf %381, %382 : vector<8x128xf32>
    %384 = math.tanh %383 : vector<8x128xf32>
    %385 = arith.mulf %380, %384 : vector<8x128xf32>
    %c6_i32 = arith.constant 6 : i32
    %386 = arith.truncf %385 : vector<8x128xf32> to vector<8x128xbf16>
    %cst_83 = arith.constant dense<0.000000e+00> : vector<8x512xf32>
    %387 = tpu.matmul %386, %2, %cst_83 {dimension_numbers = #tpu.dot_dimension_numbers<[1], [0], [0], [1], [0, 0, 1, 1], [], []>} : vector<8x128xbf16>, vector<128x512xbf16>, vector<8x512xf32> -> vector<8x512xf32>
    %388 = arith.index_cast %c6_i32 : i32 to index
    %c0_84 = arith.constant 0 : index
    %c0_85 = arith.constant 0 : index
    %389 = vector.load %arg1[%388, %c0_84, %c0_85] : memref<8x8x512xf32, #tpu.memory_space<vmem>>, vector<1x8x512xf32>
    %390 = vector.shape_cast %389 : vector<1x8x512xf32> to vector<8x512xf32>
    %391 = arith.truncf %356 : vector<8x128xf32> to vector<8x128xbf16>
    %cst_86 = arith.constant dense<0.000000e+00> : vector<8x512xf32>
    %392 = tpu.matmul %391, %0, %cst_86 {dimension_numbers = #tpu.dot_dimension_numbers<[1], [0], [0], [1], [0, 0, 1, 1], [], []>} : vector<8x128xbf16>, vector<128x512xbf16>, vector<8x512xf32> -> vector<8x512xf32>
    %393 = arith.addf %390, %392 : vector<8x512xf32>
    %394 = vector.extract_strided_slice %393 {offsets = [0, 0], sizes = [8, 128], strides = [1, 1]} : vector<8x512xf32> to vector<8x128xf32>
    %395 = arith.negf %394 : vector<8x128xf32>
    %396 = math.exp %395 : vector<8x128xf32>
    %cst_87 = arith.constant 1.000000e+00 : f32
    %397 = vector.broadcast %cst_87 : f32 to vector<8x128xf32>
    %398 = arith.addf %397, %396 : vector<8x128xf32>
    %399 = arith.divf %397, %398 : vector<8x128xf32>
    %400 = vector.extract_strided_slice %393 {offsets = [0, 128], sizes = [8, 128], strides = [1, 1]} : vector<8x512xf32> to vector<8x128xf32>
    %401 = arith.negf %400 : vector<8x128xf32>
    %402 = math.exp %401 : vector<8x128xf32>
    %cst_88 = arith.constant 1.000000e+00 : f32
    %403 = vector.broadcast %cst_88 : f32 to vector<8x128xf32>
    %404 = arith.addf %403, %402 : vector<8x128xf32>
    %405 = arith.divf %403, %404 : vector<8x128xf32>
    %406 = vector.extract_strided_slice %393 {offsets = [0, 256], sizes = [8, 128], strides = [1, 1]} : vector<8x512xf32> to vector<8x128xf32>
    %407 = math.tanh %406 : vector<8x128xf32>
    %408 = vector.extract_strided_slice %393 {offsets = [0, 384], sizes = [8, 128], strides = [1, 1]} : vector<8x512xf32> to vector<8x128xf32>
    %409 = arith.negf %408 : vector<8x128xf32>
    %410 = math.exp %409 : vector<8x128xf32>
    %cst_89 = arith.constant 1.000000e+00 : f32
    %411 = vector.broadcast %cst_89 : f32 to vector<8x128xf32>
    %412 = arith.addf %411, %410 : vector<8x128xf32>
    %413 = arith.divf %411, %412 : vector<8x128xf32>
    %414 = arith.mulf %405, %354 : vector<8x128xf32>
    %415 = arith.mulf %399, %407 : vector<8x128xf32>
    %416 = arith.addf %414, %415 : vector<8x128xf32>
    %417 = math.tanh %416 : vector<8x128xf32>
    %418 = arith.mulf %413, %417 : vector<8x128xf32>
    %419 = arith.truncf %418 : vector<8x128xf32> to vector<8x128xbf16>
    %cst_90 = arith.constant dense<0.000000e+00> : vector<8x512xf32>
    %420 = tpu.matmul %419, %1, %cst_90 {dimension_numbers = #tpu.dot_dimension_numbers<[1], [0], [0], [1], [0, 0, 1, 1], [], []>} : vector<8x128xbf16>, vector<128x512xbf16>, vector<8x512xf32> -> vector<8x512xf32>
    %421 = arith.addf %420, %387 : vector<8x512xf32>
    %422 = arith.addf %421, %5 : vector<8x512xf32>
    %423 = vector.extract_strided_slice %422 {offsets = [0, 0], sizes = [8, 128], strides = [1, 1]} : vector<8x512xf32> to vector<8x128xf32>
    %424 = arith.negf %423 : vector<8x128xf32>
    %425 = math.exp %424 : vector<8x128xf32>
    %cst_91 = arith.constant 1.000000e+00 : f32
    %426 = vector.broadcast %cst_91 : f32 to vector<8x128xf32>
    %427 = arith.addf %426, %425 : vector<8x128xf32>
    %428 = arith.divf %426, %427 : vector<8x128xf32>
    %429 = vector.extract_strided_slice %422 {offsets = [0, 128], sizes = [8, 128], strides = [1, 1]} : vector<8x512xf32> to vector<8x128xf32>
    %430 = arith.negf %429 : vector<8x128xf32>
    %431 = math.exp %430 : vector<8x128xf32>
    %cst_92 = arith.constant 1.000000e+00 : f32
    %432 = vector.broadcast %cst_92 : f32 to vector<8x128xf32>
    %433 = arith.addf %432, %431 : vector<8x128xf32>
    %434 = arith.divf %432, %433 : vector<8x128xf32>
    %435 = vector.extract_strided_slice %422 {offsets = [0, 256], sizes = [8, 128], strides = [1, 1]} : vector<8x512xf32> to vector<8x128xf32>
    %436 = math.tanh %435 : vector<8x128xf32>
    %437 = vector.extract_strided_slice %422 {offsets = [0, 384], sizes = [8, 128], strides = [1, 1]} : vector<8x512xf32> to vector<8x128xf32>
    %438 = arith.negf %437 : vector<8x128xf32>
    %439 = math.exp %438 : vector<8x128xf32>
    %cst_93 = arith.constant 1.000000e+00 : f32
    %440 = vector.broadcast %cst_93 : f32 to vector<8x128xf32>
    %441 = arith.addf %440, %439 : vector<8x128xf32>
    %442 = arith.divf %440, %441 : vector<8x128xf32>
    %443 = arith.mulf %434, %383 : vector<8x128xf32>
    %444 = arith.mulf %428, %436 : vector<8x128xf32>
    %445 = arith.addf %443, %444 : vector<8x128xf32>
    %446 = math.tanh %445 : vector<8x128xf32>
    %447 = arith.mulf %442, %446 : vector<8x128xf32>
    %c7_i32 = arith.constant 7 : i32
    %448 = arith.truncf %447 : vector<8x128xf32> to vector<8x128xbf16>
    %cst_94 = arith.constant dense<0.000000e+00> : vector<8x512xf32>
    %449 = tpu.matmul %448, %2, %cst_94 {dimension_numbers = #tpu.dot_dimension_numbers<[1], [0], [0], [1], [0, 0, 1, 1], [], []>} : vector<8x128xbf16>, vector<128x512xbf16>, vector<8x512xf32> -> vector<8x512xf32>
    %450 = arith.index_cast %c7_i32 : i32 to index
    %c0_95 = arith.constant 0 : index
    %c0_96 = arith.constant 0 : index
    %451 = vector.load %arg1[%450, %c0_95, %c0_96] : memref<8x8x512xf32, #tpu.memory_space<vmem>>, vector<1x8x512xf32>
    %452 = vector.shape_cast %451 : vector<1x8x512xf32> to vector<8x512xf32>
    %453 = arith.truncf %418 : vector<8x128xf32> to vector<8x128xbf16>
    %cst_97 = arith.constant dense<0.000000e+00> : vector<8x512xf32>
    %454 = tpu.matmul %453, %0, %cst_97 {dimension_numbers = #tpu.dot_dimension_numbers<[1], [0], [0], [1], [0, 0, 1, 1], [], []>} : vector<8x128xbf16>, vector<128x512xbf16>, vector<8x512xf32> -> vector<8x512xf32>
    %455 = arith.addf %452, %454 : vector<8x512xf32>
    %456 = vector.extract_strided_slice %455 {offsets = [0, 0], sizes = [8, 128], strides = [1, 1]} : vector<8x512xf32> to vector<8x128xf32>
    %457 = arith.negf %456 : vector<8x128xf32>
    %458 = math.exp %457 : vector<8x128xf32>
    %cst_98 = arith.constant 1.000000e+00 : f32
    %459 = vector.broadcast %cst_98 : f32 to vector<8x128xf32>
    %460 = arith.addf %459, %458 : vector<8x128xf32>
    %461 = arith.divf %459, %460 : vector<8x128xf32>
    %462 = vector.extract_strided_slice %455 {offsets = [0, 128], sizes = [8, 128], strides = [1, 1]} : vector<8x512xf32> to vector<8x128xf32>
    %463 = arith.negf %462 : vector<8x128xf32>
    %464 = math.exp %463 : vector<8x128xf32>
    %cst_99 = arith.constant 1.000000e+00 : f32
    %465 = vector.broadcast %cst_99 : f32 to vector<8x128xf32>
    %466 = arith.addf %465, %464 : vector<8x128xf32>
    %467 = arith.divf %465, %466 : vector<8x128xf32>
    %468 = vector.extract_strided_slice %455 {offsets = [0, 256], sizes = [8, 128], strides = [1, 1]} : vector<8x512xf32> to vector<8x128xf32>
    %469 = math.tanh %468 : vector<8x128xf32>
    %470 = vector.extract_strided_slice %455 {offsets = [0, 384], sizes = [8, 128], strides = [1, 1]} : vector<8x512xf32> to vector<8x128xf32>
    %471 = arith.negf %470 : vector<8x128xf32>
    %472 = math.exp %471 : vector<8x128xf32>
    %cst_100 = arith.constant 1.000000e+00 : f32
    %473 = vector.broadcast %cst_100 : f32 to vector<8x128xf32>
    %474 = arith.addf %473, %472 : vector<8x128xf32>
    %475 = arith.divf %473, %474 : vector<8x128xf32>
    %476 = arith.mulf %467, %416 : vector<8x128xf32>
    %477 = arith.mulf %461, %469 : vector<8x128xf32>
    %478 = arith.addf %476, %477 : vector<8x128xf32>
    %479 = math.tanh %478 : vector<8x128xf32>
    %480 = arith.mulf %475, %479 : vector<8x128xf32>
    %481 = arith.truncf %480 : vector<8x128xf32> to vector<8x128xbf16>
    %cst_101 = arith.constant dense<0.000000e+00> : vector<8x512xf32>
    %482 = tpu.matmul %481, %1, %cst_101 {dimension_numbers = #tpu.dot_dimension_numbers<[1], [0], [0], [1], [0, 0, 1, 1], [], []>} : vector<8x128xbf16>, vector<128x512xbf16>, vector<8x512xf32> -> vector<8x512xf32>
    %483 = arith.addf %482, %449 : vector<8x512xf32>
    %484 = arith.addf %483, %5 : vector<8x512xf32>
    %485 = vector.extract_strided_slice %484 {offsets = [0, 0], sizes = [8, 128], strides = [1, 1]} : vector<8x512xf32> to vector<8x128xf32>
    %486 = arith.negf %485 : vector<8x128xf32>
    %487 = math.exp %486 : vector<8x128xf32>
    %cst_102 = arith.constant 1.000000e+00 : f32
    %488 = vector.broadcast %cst_102 : f32 to vector<8x128xf32>
    %489 = arith.addf %488, %487 : vector<8x128xf32>
    %490 = arith.divf %488, %489 : vector<8x128xf32>
    %491 = vector.extract_strided_slice %484 {offsets = [0, 128], sizes = [8, 128], strides = [1, 1]} : vector<8x512xf32> to vector<8x128xf32>
    %492 = arith.negf %491 : vector<8x128xf32>
    %493 = math.exp %492 : vector<8x128xf32>
    %cst_103 = arith.constant 1.000000e+00 : f32
    %494 = vector.broadcast %cst_103 : f32 to vector<8x128xf32>
    %495 = arith.addf %494, %493 : vector<8x128xf32>
    %496 = arith.divf %494, %495 : vector<8x128xf32>
    %497 = vector.extract_strided_slice %484 {offsets = [0, 256], sizes = [8, 128], strides = [1, 1]} : vector<8x512xf32> to vector<8x128xf32>
    %498 = math.tanh %497 : vector<8x128xf32>
    %499 = vector.extract_strided_slice %484 {offsets = [0, 384], sizes = [8, 128], strides = [1, 1]} : vector<8x512xf32> to vector<8x128xf32>
    %500 = arith.negf %499 : vector<8x128xf32>
    %501 = math.exp %500 : vector<8x128xf32>
    %cst_104 = arith.constant 1.000000e+00 : f32
    %502 = vector.broadcast %cst_104 : f32 to vector<8x128xf32>
    %503 = arith.addf %502, %501 : vector<8x128xf32>
    %504 = arith.divf %502, %503 : vector<8x128xf32>
    %505 = arith.mulf %496, %445 : vector<8x128xf32>
    %506 = arith.mulf %490, %498 : vector<8x128xf32>
    %507 = arith.addf %505, %506 : vector<8x128xf32>
    %508 = math.tanh %507 : vector<8x128xf32>
    %509 = arith.mulf %504, %508 : vector<8x128xf32>
    %c8_i32 = arith.constant 8 : i32
    %510 = arith.negf %509 : vector<8x128xf32>
    %511 = math.exp %510 : vector<8x128xf32>
    %cst_105 = arith.constant 1.000000e+00 : f32
    %512 = vector.broadcast %cst_105 : f32 to vector<8x128xf32>
    %513 = arith.addf %512, %511 : vector<8x128xf32>
    %514 = arith.divf %512, %513 : vector<8x128xf32>
    %c0_106 = arith.constant 0 : index
    %c0_107 = arith.constant 0 : index
    %515 = vector.load %arg8[%c0_106, %c0_107] : memref<8x128xf32, #tpu.memory_space<vmem>>, vector<8x128xf32>
    tpu.vector_store %arg8[%c0_106, %c0_107], %514 {strides = array<i32>} : memref<8x128xf32, #tpu.memory_space<vmem>>, vector<8x128xf32>,
    %c0_108 = arith.constant 0 : index
    %c0_109 = arith.constant 0 : index
    %c0_110 = arith.constant 0 : index
    %516 = vector.load %arg9[%c0_108, %c0_109, %c0_110] : memref<2x8x128xf32, #tpu.memory_space<vmem>>, vector<1x8x128xf32>
    %517 = vector.shape_cast %516 : vector<1x8x128xf32> to vector<8x128xf32>
    %518 = vector.shape_cast %480 : vector<8x128xf32> to vector<1x8x128xf32>
    tpu.vector_store %arg9[%c0_108, %c0_109, %c0_110], %518 {strides = array<i32>} : memref<2x8x128xf32, #tpu.memory_space<vmem>>, vector<1x8x128xf32>,
    %c1_111 = arith.constant 1 : index
    %c0_112 = arith.constant 0 : index
    %c0_113 = arith.constant 0 : index
    %519 = vector.load %arg9[%c1_111, %c0_112, %c0_113] : memref<2x8x128xf32, #tpu.memory_space<vmem>>, vector<1x8x128xf32>
    %520 = vector.shape_cast %519 : vector<1x8x128xf32> to vector<8x128xf32>
    %521 = vector.shape_cast %509 : vector<8x128xf32> to vector<1x8x128xf32>
    tpu.vector_store %arg9[%c1_111, %c0_112, %c0_113], %521 {strides = array<i32>} : memref<2x8x128xf32, #tpu.memory_space<vmem>>, vector<1x8x128xf32>,
    %c0_114 = arith.constant 0 : index
    %c0_115 = arith.constant 0 : index
    %c0_116 = arith.constant 0 : index
    %522 = vector.load %arg10[%c0_114, %c0_115, %c0_116] : memref<2x8x128xf32, #tpu.memory_space<vmem>>, vector<1x8x128xf32>
    %523 = vector.shape_cast %522 : vector<1x8x128xf32> to vector<8x128xf32>
    %524 = vector.shape_cast %478 : vector<8x128xf32> to vector<1x8x128xf32>
    tpu.vector_store %arg10[%c0_114, %c0_115, %c0_116], %524 {strides = array<i32>} : memref<2x8x128xf32, #tpu.memory_space<vmem>>, vector<1x8x128xf32>,
    %c1_117 = arith.constant 1 : index
    %c0_118 = arith.constant 0 : index
    %c0_119 = arith.constant 0 : index
    %525 = vector.load %arg10[%c1_117, %c0_118, %c0_119] : memref<2x8x128xf32, #tpu.memory_space<vmem>>, vector<1x8x128xf32>
    %526 = vector.shape_cast %525 : vector<1x8x128xf32> to vector<8x128xf32>
    %527 = vector.shape_cast %507 : vector<8x128xf32> to vector<1x8x128xf32>
    tpu.vector_store %arg10[%c1_117, %c0_118, %c0_119], %527 {strides = array<i32>} : memref<2x8x128xf32, #tpu.memory_space<vmem>>, vector<1x8x128xf32>,
    return
  }
  func.func @transform_0(%arg0: i32) -> (i32, i32, i32) {
    %c0_i32 = arith.constant 0 : i32
    %c0_i32_0 = arith.constant 0 : i32
    %c0_i32_1 = arith.constant 0 : i32
    return %c0_i32, %arg0, %c0_i32_0 : i32, i32, i32
  }
  func.func @transform_1(%arg0: i32) -> (i32, i32, i32) {
    %c0_i32 = arith.constant 0 : i32
    %c0_i32_0 = arith.constant 0 : i32
    %c0_i32_1 = arith.constant 0 : i32
    return %c0_i32, %arg0, %c0_i32_0 : i32, i32, i32
  }
  func.func @transform_2(%arg0: i32) -> (i32, i32, i32) {
    %c0_i32 = arith.constant 0 : i32
    %c0_i32_0 = arith.constant 0 : i32
    %c0_i32_1 = arith.constant 0 : i32
    return %c0_i32, %arg0, %c0_i32_0 : i32, i32, i32
  }
  func.func @transform_3(%arg0: i32) -> (i32, i32) {
    %c0_i32 = arith.constant 0 : i32
    %c0_i32_0 = arith.constant 0 : i32
    %c0_i32_1 = arith.constant 0 : i32
    return %c0_i32, %c0_i32_0 : i32, i32
  }
  func.func @transform_4(%arg0: i32) -> (i32, i32) {
    %c0_i32 = arith.constant 0 : i32
    %c0_i32_0 = arith.constant 0 : i32
    %c0_i32_1 = arith.constant 0 : i32
    return %c0_i32, %c0_i32_0 : i32, i32
  }
  func.func @transform_5(%arg0: i32) -> (i32, i32) {
    %c0_i32 = arith.constant 0 : i32
    %c0_i32_0 = arith.constant 0 : i32
    %c0_i32_1 = arith.constant 0 : i32
    return %c0_i32, %c0_i32_0 : i32, i32
  }
  func.func @transform_6(%arg0: i32) -> (i32, i32) {
    %c0_i32 = arith.constant 0 : i32
    %c0_i32_0 = arith.constant 0 : i32
    %c0_i32_1 = arith.constant 0 : i32
    return %c0_i32, %c0_i32_0 : i32, i32
  }
  func.func @transform_7(%arg0: i32) -> (i32, i32) {
    %c0_i32 = arith.constant 0 : i32
    %c0_i32_0 = arith.constant 0 : i32
    return %arg0, %c0_i32 : i32, i32
  }
  func.func @transform_8(%arg0: i32) -> (i32, i32, i32) {
    %c0_i32 = arith.constant 0 : i32
    %c0_i32_0 = arith.constant 0 : i32
    %c0_i32_1 = arith.constant 0 : i32
    return %c0_i32, %arg0, %c0_i32_0 : i32, i32, i32
  }
  func.func @transform_9(%arg0: i32) -> (i32, i32, i32) {
    %c0_i32 = arith.constant 0 : i32
    %c0_i32_0 = arith.constant 0 : i32
    %c0_i32_1 = arith.constant 0 : i32
    return %c0_i32, %arg0, %c0_i32_0 : i32, i32, i32
  }
}

</mosaic_0001>

<bundles_post_ra>
// kernel: sent_rnn_forward.1
= control target key start
LH: loop header
LB: loop body
LE: loop exit
PB: predicated region body
PF: predicated region fallthrough
CT: control target
= control target key end

     0   :  { %v6576_v1 = vmov 0   ;;  %s6566_s5 = inlined_call_operand.vmem [shape: bf16[128,512], index: 5, kind: input, shape index: {}]   ;;  %s6567_s3 = inlined_call_operand.vmem [shape: bf16[128,512], index: 3, kind: input, shape index: {}]   ;;  %s6568_s1 = inlined_call_operand.vmem [shape: f32[2,8,128], index: 1, kind: input, shape index: {}]   ;;  %s6569_s4 = inlined_call_operand.vmem [shape: bf16[128,512], index: 4, kind: input, shape index: {}]   ;;  %s6570_s0 = inlined_call_operand.vmem [shape: f32[8,8,512], index: 0, kind: input, shape index: {}]   ;;  %s6571_s2 = inlined_call_operand.vmem [shape: f32[2,8,128], index: 2, kind: input, shape index: {}]   ;;  %s6572_s6 = inlined_call_operand.vmem [shape: f32[1,512], index: 6, kind: input, shape index: {}]   ;;  %s6573_s9 = inlined_call_operand.vmem [shape: f32[2,8,128], index: 9, kind: output, shape index: {2}]   ;;  %s6574_s8 = inlined_call_operand.vmem [shape: f32[2,8,128], index: 8, kind: output, shape index: {1}]   ;;  %s6575_s7 = inlined_call_operand.vmem [shape: f32[8,128], index: 7, kind: output, shape index: {0}]  }
   0x1   :  { %v3959_v0 = vld [vmem:[%s6566_s5 + $0xe4] ss:$16 sps:$4 sm:$0xff]   ;;  %347 = vmatprep.mubr.bf16.mxu0 %v6576_v1  ;;  %388 = vmatprep.mubr.bf16.mxu1 %v6576_v1  ;;  %v3966_v2 = vld [vmem:[%s6566_s5 + $0xe0] ss:$16 sps:$4 sm:$0xff]   ;;  %v3989_v6 = vld [vmem:[%s6566_s5 + $0xec] ss:$16 sps:$4 sm:$0xff]  }
   0x2   :  { %315 = vmatprep.subr.bf16.mxu0 %v3959_v0  ;;  %v3972_v3 = vld [vmem:[%s6566_s5 + $0xc4] ss:$16 sps:$4 sm:$0xff]   ;;  %v3978_v4 = vld [vmem:[%s6566_s5 + $0xc0] ss:$16 sps:$4 sm:$0xff]   ;;  %6926 = vst [vmem:[#allocation2_spill] sm:$0xff] %v3989_v6  ;;  %356 = vmatprep.subr.bf16.mxu1 %v3989_v6  ;;  %v3131_v30 = vld [vmem:[%s6568_s1 + $0x8] sm:$0xff] }
   0x3   :  { %316 = vmatpush1.bf16.msra.mxu0 %v3966_v2  ;;  %v3984_v5 = vld [vmem:[%s6566_s5 + $0xa4] ss:$16 sps:$4 sm:$0xff]   ;;  %v3994_v7 = vld [vmem:[%s6566_s5 + $0xe8] ss:$16 sps:$4 sm:$0xff]   ;;  %v4000_v8 = vld [vmem:[%s6566_s5 + $0xa0] ss:$16 sps:$4 sm:$0xff]   ;;  %v154_v34 = vpack.c.bf16 %v3131_v30, %v3131_v30 }
   0x4   :  { %317 = vmatprep.subr.bf16.mxu0 %v3972_v3  ;;  %v4007_v9 = vld [vmem:[%s6566_s5 + $0x84] ss:$16 sps:$4 sm:$0xff]   ;;  %357 = vmatpush1.bf16.msra.mxu1 %v3994_v7  ;;  %v4013_v10 = vld [vmem:[%s6566_s5 + $0xcc] ss:$16 sps:$4 sm:$0xff]   ;;  %v4018_v11 = vld [vmem:[%s6566_s5 + $0xc8] ss:$16 sps:$4 sm:$0xff]  }
   0x5   :  { %358 = vmatprep.subr.bf16.mxu1 %v4013_v10  ;;  %v4025_v12 = vld [vmem:[%s6566_s5 + $0x80] ss:$16 sps:$4 sm:$0xff]   ;;  %v4030_v13 = vld [vmem:[%s6566_s5 + $0x64] ss:$16 sps:$4 sm:$0xff]   ;;  %v4035_v14 = vld [vmem:[%s6566_s5 + $0xac] ss:$16 sps:$4 sm:$0xff]  }
   0x6   :  { %v4042_v15 = vld [vmem:[%s6566_s5 + $0xa8] ss:$16 sps:$4 sm:$0xff]   ;;  %v4048_v16 = vld [vmem:[%s6566_s5 + $0x8c] ss:$16 sps:$4 sm:$0xff]   ;;  %v4054_v17 = vld [vmem:[%s6566_s5 + $0x60] ss:$16 sps:$4 sm:$0xff]  }
   0x7   :  { %318 = vmatpush1.bf16.msra.mxu0 %v3978_v4  ;;  %v4060_v18 = vld [vmem:[%s6566_s5 + $0x44] ss:$16 sps:$4 sm:$0xff]   ;;  %v4066_v19 = vld [vmem:[%s6566_s5 + $0x88] ss:$16 sps:$4 sm:$0xff]   ;;  %v4072_v20 = vld [vmem:[%s6566_s5 + $0x6c] ss:$16 sps:$4 sm:$0xff]  }
   0x8   :  { %319 = vmatprep.subr.bf16.mxu0 %v3984_v5  ;;  %359 = vmatpush1.bf16.msra.mxu1 %v4018_v11  ;;  %v4078_v21 = vld [vmem:[%s6566_s5 + $0x40] ss:$16 sps:$4 sm:$0xff]   ;;  %v4084_v22 = vld [vmem:[%s6566_s5 + $0x24] ss:$16 sps:$4 sm:$0xff]   ;;  %v4090_v23 = vld [vmem:[%s6566_s5 + $0x68] ss:$16 sps:$4 sm:$0xff]  }
   0x9   :  { %360 = vmatprep.subr.bf16.mxu1 %v4035_v14  ;;  %v4096_v24 = vld [vmem:[%s6566_s5 + $0x4c] ss:$16 sps:$4 sm:$0xff]   ;;  %v4101_v25 = vld [vmem:[%s6566_s5 + $0x20] ss:$16 sps:$4 sm:$0xff]   ;;  %v4107_v26 = vld [vmem:[%s6566_s5 + $0x4] ss:$16 sps:$4 sm:$0xff]  }
   0xa   :  { %v4114_v27 = vld [vmem:[%s6566_s5 + $0x48] ss:$16 sps:$4 sm:$0xff]   ;;  %v4120_v28 = vld [vmem:[%s6566_s5 + $0x2c] ss:$16 sps:$4 sm:$0xff]   ;;  %v4125_v29 = vld [vmem:[%s6566_s5] ss:$16 sps:$4 sm:$0xff]  }
   0xb   :  { %320 = vmatpush1.bf16.msra.mxu0 %v4000_v8  ;;  %v4135_v31 = vld [vmem:[%s6567_s3 + $0xe4] ss:$16 sps:$4 sm:$0xff]   ;;  %v4141_v32 = vld [vmem:[%s6566_s5 + $0x28] ss:$16 sps:$4 sm:$0xff]   ;;  %v4147_v33 = vld [vmem:[%s6566_s5 + $0xc] ss:$16 sps:$4 sm:$0xff]  }
   0xc   :  { %321 = vmatprep.subr.bf16.mxu0 %v4007_v9  ;;  %361 = vmatpush1.bf16.msra.mxu1 %v4042_v15  ;;  %v4152_v35 = vld [vmem:[%s6567_s3 + $0xe0] ss:$16 sps:$4 sm:$0xff]   ;;  %v4158_v36 = vld [vmem:[%s6567_s3 + $0xc4] ss:$16 sps:$4 sm:$0xff]   ;;  %v4165_v37 = vld [vmem:[%s6566_s5 + $0x8] ss:$16 sps:$4 sm:$0xff]  }
   0xd   :  { %362 = vmatprep.subr.bf16.mxu1 %v4048_v16  ;;  %v4171_v38 = vld [vmem:[%s6567_s3 + $0xec] ss:$16 sps:$4 sm:$0xff]   ;;  %v4177_v39 = vld [vmem:[%s6567_s3 + $0xc0] ss:$16 sps:$4 sm:$0xff]   ;;  %v4184_v40 = vld [vmem:[%s6567_s3 + $0xa4] ss:$16 sps:$4 sm:$0xff]  }
   0xe   :  { %v4190_v41 = vld [vmem:[%s6567_s3 + $0xe8] ss:$16 sps:$4 sm:$0xff]   ;;  %v4196_v42 = vld [vmem:[%s6567_s3 + $0xcc] ss:$16 sps:$4 sm:$0xff]   ;;  %v4202_v43 = vld [vmem:[%s6567_s3 + $0xa0] ss:$16 sps:$4 sm:$0xff]  }
   0xf   :  { %322 = vmatpush1.bf16.msra.mxu0 %v4025_v12  ;;  %v4208_v44 = vld [vmem:[%s6567_s3 + $0x84] ss:$16 sps:$4 sm:$0xff]   ;;  %v4214_v45 = vld [vmem:[%s6567_s3 + $0xc8] ss:$16 sps:$4 sm:$0xff]   ;;  %v4220_v46 = vld [vmem:[%s6567_s3 + $0xac] ss:$16 sps:$4 sm:$0xff]  }
  0x10   :  { %323 = vmatprep.subr.bf16.mxu0 %v4030_v13  ;;  %363 = vmatpush1.bf16.msra.mxu1 %v4066_v19  ;;  %6927 = vst [vmem:[#allocation3_spill] sm:$0xff] %v4208_v44  ;;  %v4227_v47 = vld [vmem:[%s6567_s3 + $0x80] ss:$16 sps:$4 sm:$0xff]   ;;  %v4233_v48 = vld [vmem:[%s6567_s3 + $0x64] ss:$16 sps:$4 sm:$0xff]  }
  0x11   :  { %364 = vmatprep.subr.bf16.mxu1 %v4072_v20  ;;  %6928 = vst [vmem:[#allocation4_spill] sm:$0xff] %v4227_v47  ;;  %6929 = vst [vmem:[#allocation5_spill] sm:$0xff] %v4233_v48  ;;  %v4239_v49 = vld [vmem:[%s6567_s3 + $0xa8] ss:$16 sps:$4 sm:$0xff]   ;;  %v4245_v50 = vld [vmem:[%s6567_s3 + $0x8c] ss:$16 sps:$4 sm:$0xff]  }
  0x12   :  { %6930 = vst [vmem:[#allocation6_spill] sm:$0xff] %v4245_v50  ;;  %v4251_v51 = vld [vmem:[%s6567_s3 + $0x60] ss:$16 sps:$4 sm:$0xff]   ;;  %v4257_v52 = vld [vmem:[%s6567_s3 + $0x44] ss:$16 sps:$4 sm:$0xff]  }
  0x13   :  { %324 = vmatpush1.bf16.msra.mxu0 %v4054_v17  ;;  %6931 = vst [vmem:[#allocation7_spill] sm:$0xff] %v4251_v51  ;;  %6932 = vst [vmem:[#allocation8_spill] sm:$0xff] %v4257_v52  ;;  %v4263_v53 = vld [vmem:[%s6567_s3 + $0x88] ss:$16 sps:$4 sm:$0xff]   ;;  %v4269_v54 = vld [vmem:[%s6567_s3 + $0x6c] ss:$16 sps:$4 sm:$0xff]  }
  0x14   :  { %325 = vmatprep.subr.bf16.mxu0 %v4060_v18  ;;  %365 = vmatpush1.bf16.msra.mxu1 %v4090_v23  ;;  %6933 = vst [vmem:[#allocation9_spill] sm:$0xff] %v4263_v53  ;;  %6934 = vst [vmem:[#allocation10_spill] sm:$0xff] %v4269_v54  ;;  %v4275_v55 = vld [vmem:[%s6567_s3 + $0x40] ss:$16 sps:$4 sm:$0xff]   ;;  %v4281_v56 = vld [vmem:[%s6567_s3 + $0x24] ss:$16 sps:$4 sm:$0xff]  }
  0x15   :  { %366 = vmatprep.subr.bf16.mxu1 %v4096_v24  ;;  %6935 = vst [vmem:[#allocation11_spill] sm:$0xff] %v4275_v55  ;;  %6936 = vst [vmem:[#allocation12_spill] sm:$0xff] %v4281_v56  ;;  %v4287_v57 = vld [vmem:[%s6567_s3 + $0x68] ss:$16 sps:$4 sm:$0xff]   ;;  %v4293_v58 = vld [vmem:[%s6567_s3 + $0x4c] ss:$16 sps:$4 sm:$0xff]  }
  0x16   :  { %6937 = vst [vmem:[#allocation13_spill] sm:$0xff] %v4287_v57  ;;  %6938 = vst [vmem:[#allocation14_spill] sm:$0xff] %v4293_v58  ;;  %v4299_v59 = vld [vmem:[%s6567_s3 + $0x20] ss:$16 sps:$4 sm:$0xff]   ;;  %v4305_v60 = vld [vmem:[%s6567_s3 + $0x4] ss:$16 sps:$4 sm:$0xff]  }
  0x17   :  { %326 = vmatpush1.bf16.msra.mxu0 %v4078_v21  ;;  %6939 = vst [vmem:[#allocation15_spill] sm:$0xff] %v4299_v59  ;;  %6940 = vst [vmem:[#allocation16_spill] sm:$0xff] %v4305_v60  ;;  %v4311_v61 = vld [vmem:[%s6567_s3 + $0x48] ss:$16 sps:$4 sm:$0xff]   ;;  %v4317_v62 = vld [vmem:[%s6567_s3 + $0x2c] ss:$16 sps:$4 sm:$0xff]  }
  0x18   :  { %327 = vmatprep.subr.bf16.mxu0 %v4084_v22  ;;  %367 = vmatpush1.bf16.msra.mxu1 %v4114_v27  ;;  %6941 = vst [vmem:[#allocation17_spill] sm:$0xff] %v4311_v61  ;;  %6942 = vst [vmem:[#allocation18_spill] sm:$0xff] %v4317_v62  ;;  %v148_v63 = vld [vmem:[%s6568_s1] sm:$0xff] }
  0x19   :  { %368 = vmatprep.subr.bf16.mxu1 %v4120_v28  ;;  %v4326_v30 = vld [vmem:[%s6567_s3] ss:$16 sps:$4 sm:$0xff]  }
  0x1a   :  { %6943 = vst [vmem:[#allocation19_spill] sm:$0xff] %v4326_v30 }
  0x1b   :  { %328 = vmatpush1.bf16.msra.mxu0 %v4101_v25 }
  0x1c   :  { %329 = vmatprep.subr.bf16.mxu0 %v4107_v26  ;;  %369 = vmatpush1.bf16.msra.mxu1 %v4141_v32 }
  0x1d   :  { %370 = vmatprep.subr.bf16.mxu1 %v4147_v33 }
  0x1f   :  { %330 = vmatpush1.bf16.msra.mxu0 %v4125_v29 }
  0x20   :  { %562 = vmatprep.subr.bf16.mxu0 %v4135_v31  ;;  %371 = vmatpush1.bf16.msra.mxu1 %v4165_v37 }
  0x21   :  { %603 = vmatprep.subr.bf16.mxu1 %v4171_v38 }
  0x22   :  { %348 = vmatmul.mubr.bf16.vlgmr.msra.gmra.mxu0 %v154_v34 }
  0x23   :  { %563 = vmatpush1.bf16.msra.mxu0 %v4152_v35  ;;  %594 = vmatprep.mubr.bf16.mxu0 %v6576_v1 }
  0x24   :  { %564 = vmatprep.subr.bf16.mxu0 %v4158_v36  ;;  %389 = vmatmul.mubr.bf16.vlgmr.msra.gmra.mxu1 %v154_v34  ;;  %v4333_v34 = vld [vmem:[%s6567_s3 + $0x28] ss:$16 sps:$4 sm:$0xff]  }
  0x25   :  { %604 = vmatpush1.bf16.msra.mxu1 %v4190_v41  ;;  %635 = vmatprep.mubr.bf16.mxu1 %v6576_v1  ;;  %6944 = vst [vmem:[#allocation20_spill] sm:$0xff] %v4333_v34  ;;  %v4339_v1 = vld [vmem:[%s6567_s3 + $0xc] ss:$16 sps:$4 sm:$0xff]  }
  0x26   :  { %605 = vmatprep.subr.bf16.mxu1 %v4196_v42  ;;  %6945 = vst [vmem:[#allocation21_spill] sm:$0xff] %v4339_v1 }
  0x27   :  { %565 = vmatpush1.bf16.msra.mxu0 %v4177_v39 }
  0x28   :  { %566 = vmatprep.subr.bf16.mxu0 %v4184_v40 }
  0x29   :  { %606 = vmatpush1.bf16.msra.mxu1 %v4214_v45 }
  0x2a   :  { %607 = vmatprep.subr.bf16.mxu1 %v4220_v46 }
  0x2b   :  { %567 = vmatpush1.bf16.msra.mxu0 %v4202_v43 }
  0x2c   :  { %568 = vmatprep.subr.bf16.mxu0 %v4208_v44 }
  0x2d   :  { %608 = vmatpush1.bf16.msra.mxu1 %v4239_v49 }
  0x2e   :  { %609 = vmatprep.subr.bf16.mxu1 %v4245_v50 }
  0x2f   :  { %569 = vmatpush1.bf16.msra.mxu0 %v4227_v47 }
  0x30   :  { %570 = vmatprep.subr.bf16.mxu0 %v4233_v48 }
  0x31   :  { %610 = vmatpush1.bf16.msra.mxu1 %v4263_v53 }
  0x32   :  { %611 = vmatprep.subr.bf16.mxu1 %v4269_v54 }
  0x33   :  { %571 = vmatpush1.bf16.msra.mxu0 %v4251_v51 }
  0x34   :  { %572 = vmatprep.subr.bf16.mxu0 %v4257_v52 }
  0x35   :  { %612 = vmatpush1.bf16.msra.mxu1 %v4287_v57 }
  0x36   :  { %613 = vmatprep.subr.bf16.mxu1 %v4293_v58 }
  0x37   :  { %573 = vmatpush1.bf16.msra.mxu0 %v4275_v55 }
  0x38   :  { %574 = vmatprep.subr.bf16.mxu0 %v4281_v56  ;;  %v6947_v56 = vmov 0  }
  0x39   :  { %614 = vmatpush1.bf16.msra.mxu1 %v4311_v61  ;;  %v4490_v61 = vld [vmem:[%s6569_s4 + $0x48] ss:$16 sps:$4 sm:$0xff]  }
  0x3a   :  { %615 = vmatprep.subr.bf16.mxu1 %v4317_v62  ;;  %v4485_v62 = vld [vmem:[%s6569_s4 + $0x40] ss:$16 sps:$4 sm:$0xff]   ;;  %6971 = vst [vmem:[#allocation46_spill] sm:$0xff] %v4490_v61 }
  0x3b   :  { %575 = vmatpush1.bf16.msra.mxu0 %v4299_v59  ;;  %v401_v59 = vpack.c.bf16 %v148_v63, %v148_v63  ;;  %v4355_v63 = vld [vmem:[%s6569_s4 + $0xe4] ss:$16 sps:$4 sm:$0xff]   ;;  %6970 = vst [vmem:[#allocation45_spill] sm:$0xff] %v4485_v62 }
  0x3c   :  { %576 = vmatprep.subr.bf16.mxu0 %v4305_v60  ;;  %v4346_v60 = vld [vmem:[%s6567_s3 + $0x8] ss:$16 sps:$4 sm:$0xff]   ;;  %6948 = vst [vmem:[#allocation23_spill] sm:$0xff] %v4355_v63 }
  0x3d   :  { %616 = vmatpush1.bf16.msra.mxu1 %v4333_v34  ;;  %6946 = vst [vmem:[#allocation22_spill] sm:$0xff] %v4346_v60  ;;  %v4389_v34 = vld [vmem:[%s6569_s4 + $0xc0] ss:$16 sps:$4 sm:$0xff]  }
  0x3e   :  { %617 = vmatprep.subr.bf16.mxu1 %v4339_v1  ;;  %v4366_v1 = vld [vmem:[%s6569_s4 + $0xe0] ss:$16 sps:$4 sm:$0xff]   ;;  %6954 = vst [vmem:[#allocation29_spill] sm:$0xff] %v4389_v34 }
  0x3f   :  { %577 = vmatpush1.bf16.msra.mxu0 %v4326_v30  ;;  %v4360_v30 = vld [vmem:[%s6569_s4 + $0xec] ss:$16 sps:$4 sm:$0xff]   ;;  %6950 = vst [vmem:[#allocation25_spill] sm:$0xff] %v4366_v1 }
  0x40   :  { %6949 = vst [vmem:[#allocation24_spill] sm:$0xff] %v4360_v30  ;;  %833 = vmatprep.subr.bf16.mxu0 %v4355_v63  ;;  %v4379_v63 = vld [vmem:[%s6569_s4 + $0xc4] ss:$16 sps:$4 sm:$0xff]  }
  0x41   :  { %618 = vmatpush1.bf16.msra.mxu1 %v4346_v60  ;;  %6952 = vst [vmem:[#allocation27_spill] sm:$0xff] %v4379_v63  ;;  %v4384_v60 = vld [vmem:[%s6569_s4 + $0xcc] ss:$16 sps:$4 sm:$0xff]  }
  0x42   :  { %595 = vmatmul.mubr.bf16.vlgmr.msra.gmra.mxu0 %v401_v59  ;;  %874 = vmatprep.subr.bf16.mxu1 %v4360_v30  ;;  %6953 = vst [vmem:[#allocation28_spill] sm:$0xff] %v4384_v60  ;;  %v4408_v30 = vld [vmem:[%s6569_s4 + $0xac] ss:$16 sps:$4 sm:$0xff]  }
  0x43   :  { %865 = vmatprep.mubr.bf16.mxu0 %v6947_v56  ;;  %834 = vmatpush1.bf16.msra.mxu0 %v4366_v1  ;;  %v4394_v1 = vld [vmem:[%s6569_s4 + $0xc8] ss:$16 sps:$4 sm:$0xff]   ;;  %6957 = vst [vmem:[#allocation32_spill] sm:$0xff] %v4408_v30 }
  0x44   :  { %636 = vmatmul.mubr.bf16.vlgmr.msra.gmra.mxu1 %v401_v59  ;;  %v4371_v59 = vld [vmem:[%s6569_s4 + $0xe8] ss:$16 sps:$4 sm:$0xff]   ;;  %6955 = vst [vmem:[#allocation30_spill] sm:$0xff] %v4394_v1  ;;  %835 = vmatprep.subr.bf16.mxu0 %v4379_v63  ;;  %v4413_v63 = vld [vmem:[%s6569_s4 + $0xa0] ss:$16 sps:$4 sm:$0xff]  }
  0x45   :  { %906 = vmatprep.mubr.bf16.mxu1 %v6947_v56  ;;  %6951 = vst [vmem:[#allocation26_spill] sm:$0xff] %v4371_v59  ;;  %875 = vmatpush1.bf16.msra.mxu1 %v4371_v59  ;;  %v4403_v59 = vld [vmem:[%s6569_s4 + $0xa4] ss:$16 sps:$4 sm:$0xff]   ;;  %6958 = vst [vmem:[#allocation33_spill] sm:$0xff] %v4413_v63 }
  0x46   :  { %876 = vmatprep.subr.bf16.mxu1 %v4384_v60  ;;  %6956 = vst [vmem:[#allocation31_spill] sm:$0xff] %v4403_v59  ;;  %v4432_v60 = vld [vmem:[%s6569_s4 + $0x8c] ss:$16 sps:$4 sm:$0xff]  }
  0x47   :  { %836 = vmatpush1.bf16.msra.mxu0 %v4389_v34  ;;  %v4418_v34 = vld [vmem:[%s6569_s4 + $0xa8] ss:$16 sps:$4 sm:$0xff]   ;;  %6961 = vst [vmem:[#allocation36_spill] sm:$0xff] %v4432_v60 }
  0x48   :  { %6959 = vst [vmem:[#allocation34_spill] sm:$0xff] %v4418_v34  ;;  %837 = vmatprep.subr.bf16.mxu0 %v4403_v59  ;;  %v4437_v59 = vld [vmem:[%s6569_s4 + $0x80] ss:$16 sps:$4 sm:$0xff]  }
  0x49   :  { %877 = vmatpush1.bf16.msra.mxu1 %v4394_v1  ;;  %v4427_v1 = vld [vmem:[%s6569_s4 + $0x84] ss:$16 sps:$4 sm:$0xff]   ;;  %6962 = vst [vmem:[#allocation37_spill] sm:$0xff] %v4437_v59 }
  0x4a   :  { %878 = vmatprep.subr.bf16.mxu1 %v4408_v30  ;;  %6960 = vst [vmem:[#allocation35_spill] sm:$0xff] %v4427_v1  ;;  %v4456_v30 = vld [vmem:[%s6569_s4 + $0x6c] ss:$16 sps:$4 sm:$0xff]  }
  0x4b   :  { %838 = vmatpush1.bf16.msra.mxu0 %v4413_v63  ;;  %v4442_v63 = vld [vmem:[%s6569_s4 + $0x88] ss:$16 sps:$4 sm:$0xff]   ;;  %6965 = vst [vmem:[#allocation40_spill] sm:$0xff] %v4456_v30 }
  0x4c   :  { %6963 = vst [vmem:[#allocation38_spill] sm:$0xff] %v4442_v63  ;;  %839 = vmatprep.subr.bf16.mxu0 %v4427_v1  ;;  %v4461_v1 = vld [vmem:[%s6569_s4 + $0x60] ss:$16 sps:$4 sm:$0xff]  }
  0x4d   :  { %879 = vmatpush1.bf16.msra.mxu1 %v4418_v34  ;;  %v4451_v34 = vld [vmem:[%s6569_s4 + $0x64] ss:$16 sps:$4 sm:$0xff]   ;;  %6966 = vst [vmem:[#allocation41_spill] sm:$0xff] %v4461_v1 }
  0x4e   :  { %880 = vmatprep.subr.bf16.mxu1 %v4432_v60  ;;  %6964 = vst [vmem:[#allocation39_spill] sm:$0xff] %v4451_v34  ;;  %v4476_v60 = vld [vmem:[%s6569_s4 + $0x4c] ss:$16 sps:$4 sm:$0xff]  }
  0x4f   :  { %840 = vmatpush1.bf16.msra.mxu0 %v4437_v59  ;;  %v4466_v59 = vld [vmem:[%s6569_s4 + $0x68] ss:$16 sps:$4 sm:$0xff]   ;;  %6969 = vst [vmem:[#allocation44_spill] sm:$0xff] %v4476_v60 }
  0x50   :  { %6967 = vst [vmem:[#allocation42_spill] sm:$0xff] %v4466_v59  ;;  %841 = vmatprep.subr.bf16.mxu0 %v4451_v34 }
  0x51   :  { %881 = vmatpush1.bf16.msra.mxu1 %v4442_v63  ;;  %v4471_v63 = vld [vmem:[%s6569_s4 + $0x44] ss:$16 sps:$4 sm:$0xff]  }
  0x52   :  { %6968 = vst [vmem:[#allocation43_spill] sm:$0xff] %v4471_v63  ;;  %882 = vmatprep.subr.bf16.mxu1 %v4456_v30 }
  0x53   :  { %842 = vmatpush1.bf16.msra.mxu0 %v4461_v1  ;;  %v4497_v1 = vld [vmem:[%s6569_s4 + $0x24] ss:$16 sps:$4 sm:$0xff]  }
  0x54   :  { %843 = vmatprep.subr.bf16.mxu0 %v4471_v63  ;;  %6972 = vst [vmem:[#allocation47_spill] sm:$0xff] %v4497_v1  ;;  %v4509_v63 = vld [vmem:[%s6569_s4 + $0x20] ss:$16 sps:$4 sm:$0xff]  }
  0x55   :  { %883 = vmatpush1.bf16.msra.mxu1 %v4466_v59  ;;  %v4502_v59 = vld [vmem:[%s6569_s4 + $0x2c] ss:$16 sps:$4 sm:$0xff]   ;;  %6974 = vst [vmem:[#allocation49_spill] sm:$0xff] %v4509_v63 }
  0x56   :  { %884 = vmatprep.subr.bf16.mxu1 %v4476_v60  ;;  %6973 = vst [vmem:[#allocation48_spill] sm:$0xff] %v4502_v59  ;;  %v4514_v60 = vld [vmem:[%s6569_s4 + $0x28] ss:$16 sps:$4 sm:$0xff]  }
  0x57   :  { %844 = vmatpush1.bf16.msra.mxu0 %v4485_v62  ;;  %6975 = vst [vmem:[#allocation50_spill] sm:$0xff] %v4514_v60  ;;  %v4521_v62 = vld [vmem:[%s6569_s4 + $0x4] ss:$16 sps:$4 sm:$0xff]  }
  0x58   :  { %845 = vmatprep.subr.bf16.mxu0 %v4497_v1  ;;  %6976 = vst [vmem:[#allocation51_spill] sm:$0xff] %v4521_v62  ;;  %v4533_v1 = vld [vmem:[%s6569_s4] ss:$16 sps:$4 sm:$0xff]  }
  0x59   :  { %885 = vmatpush1.bf16.msra.mxu1 %v4490_v61  ;;  %v4526_v61 = vld [vmem:[%s6569_s4 + $0xc] ss:$16 sps:$4 sm:$0xff]   ;;  %6978 = vst [vmem:[#allocation53_spill] sm:$0xff] %v4533_v1 }
  0x5a   :  { %886 = vmatprep.subr.bf16.mxu1 %v4502_v59  ;;  %6977 = vst [vmem:[#allocation52_spill] sm:$0xff] %v4526_v61  ;;  %v4538_v59 = vld [vmem:[%s6569_s4 + $0x8] ss:$16 sps:$4 sm:$0xff]  }
  0x5b   :  { %846 = vmatpush1.bf16.msra.mxu0 %v4509_v63  ;;  %6979 = vst [vmem:[#allocation54_spill] sm:$0xff] %v4538_v59 }
  0x5c   :  { %847 = vmatprep.subr.bf16.mxu0 %v4521_v62 }
  0x5d   :  { %887 = vmatpush1.bf16.msra.mxu1 %v4514_v60 }
  0x5e   :  { %888 = vmatprep.subr.bf16.mxu1 %v4526_v61 }
  0x5f   :  { %848 = vmatpush1.bf16.msra.mxu0 %v4533_v1 }
  0x60   :  { %944 = vmatprep.subr.bf16.mxu0 %v3959_v0  ;;  %v398_v0 = vld [vmem:[%s6570_s0 + $0x8] sm:$0xff] }
  0x61   :  { %889 = vmatpush1.bf16.msra.mxu1 %v4538_v59  ;;  %v397_v59 = vld [vmem:[%s6570_s0] sm:$0xff] }
  0x62   :  { %985 = vmatprep.subr.bf16.mxu1 %v3989_v6 }
  0xe2   :  { %v4546_v60 = vpop.f32.mrf.mxu0 }
  0xe4   :  { %v4548_v63 = vpop.f32.mrf.mxu0  ;;  %v4550_v34 = vpop.f32.mrf.mxu1 }
  0xe6   :  { %v353_v30 = vpop.f32.mrf.mxu0  ;;  %v4552_v58 = vpop.f32.mrf.mxu1 }
  0xe8   :  { %v354_v55 = vpop.f32.mrf.mxu0  ;;  %v394_v62 = vpop.f32.mrf.mxu1 }
  0xe9   :  { %v400_v62 = vld [vmem:[%s6570_s0 + $0x18] sm:$0xff] }
  0xea   :  { %v395_v61 = vpop.f32.mrf.mxu1 }
 0x102   :  { %v596_v1 = vpop.f32.mrf.mxu0 }
 0x103   :  { %v644_v6 = vadd.f32 %v596_v1, %v397_v59  ;;  %v399_v1 = vld [vmem:[%s6570_s0 + $0x10] sm:$0xff] }
 0x104   :  { %v598_v52 = vpop.f32.mrf.mxu0  ;;  %v637_v54 = vpop.f32.mrf.mxu1 }
 0x105   :  { %v3197_v57 = vmul.f32 -1.442695, %v644_v6  ;;  %v645_v30 = vadd.f32 %v598_v52, %v398_v0  ;;  %v646_v6 = vadd.f32 %v637_v54, %v399_v1 }
 0x106   :  { %v600_v51 = vpop.f32.mrf.mxu0  ;;  %v639_v61 = vpop.f32.mrf.mxu1 }
 0x107   :  { %3453 = vpow2.f32 %v3197_v57  ;;  %v3198_v55 = vmul.f32 -1.442695, %v645_v30  ;;  %v647_v59 = vadd.f32 %v639_v61, %v400_v62 }
 0x108   :  { %v601_v48 = vpop.f32.mrf.mxu0  ;;  %v641_v53 = vpop.f32.mrf.mxu1 }
 0x109   :  { %3455 = vpow2.f32 %v3198_v55  ;;  %v3199_v52 = vmul.f32 -1.442695, %v647_v59 }
 0x10a   :  { %v642_v47 = vpop.f32.mrf.mxu1  ;;  %3457 = vtanh.f32 %v646_v6 }
 0x10b   :  { %3459 = vpow2.f32 %v3199_v52  ;;  %v149_v47 = vld [vmem:[%s6571_s2] sm:$0xff] }
 0x114   :  { %v3454_v51 = vpop.eup %3453 }
 0x115   :  { %v651_v57 = vadd.f32 1.0, %v3454_v51 }
 0x116   :  { %v3456_v0 = vpop.eup %3455 }
 0x117   :  { %3461 = vrcp.f32 %v651_v57  ;;  %v657_v48 = vadd.f32 1.0, %v3456_v0  ;;  %v3458_v30 = vpop.eup %3457 }
 0x118   :  { %v3460_v55 = vpop.eup %3459 }
 0x119   :  { %3463 = vrcp.f32 %v657_v48  ;;  %v664_v44 = vadd.f32 1.0, %v3460_v55  ;;  %v3132_v55 = vld [vmem:[%s6571_s2 + $0x8] sm:$0xff] }
 0x11b   :  { %3465 = vrcp.f32 %v664_v44 }
 0x124   :  { %v3462_v50 = vpop.eup %3461 }
 0x125   :  { %v668_v54 = vmul.f32 %v3462_v50, %v3458_v30 }
 0x126   :  { %v3464_v53 = vpop.eup %3463 }
 0x127   :  { %v667_v61 = vmul.f32 %v3464_v53, %v149_v47 }
 0x128   :  { %v3466_v1 = vpop.eup %3465 }
 0x129   :  { %v4569_v62 = vadd.f32 %v668_v54, %v667_v61 }
 0x12b   :  { %3467 = vtanh.f32 %v4569_v62 }
 0x138   :  { %v3468_v59 = vpop.eup %3467 }
 0x139   :  { %v671_v6 = vmul.f32 %v3468_v59, %v3466_v1 }
 0x13b   :  { %v4572_v52 = vpack.c.bf16 %v671_v6, %v671_v6 }
 0x13d   :  { %866 = vmatmul.mubr.bf16.vlgmr.msra.gmra.mxu0 %v4572_v52  ;;  %907 = vmatmul.mubr.bf16.vlgmr.msra.gmra.mxu1 %v4572_v52 }
 0x13e   :  { %945 = vmatpush1.bf16.msra.mxu0 %v3966_v2  ;;  %986 = vmatpush1.bf16.msra.mxu1 %v3994_v7  ;;  %v128_v2 = vlaneseq }
 0x13f   :  { %946 = vmatprep.subr.bf16.mxu0 %v3972_v3  ;;  %987 = vmatprep.subr.bf16.mxu1 %v4013_v10 }
 0x140   :  { %976 = vmatprep.mubr.bf16.mxu0 %v6947_v56  ;;  %1017 = vmatprep.mubr.bf16.mxu1 %v6947_v56  ;;  %v129_v3 = vshrl.u32 %v128_v2, 7 }
 0x142   :  { %947 = vmatpush1.bf16.msra.mxu0 %v3978_v4  ;;  %988 = vmatpush1.bf16.msra.mxu1 %v4018_v11  ;;  %v130_v4 = vsub.s32 0, %v129_v3  ;;  %v134_v7 = vsub.s32 1, %v129_v3 }
 0x143   :  { %948 = vmatprep.subr.bf16.mxu0 %v3984_v5  ;;  %989 = vmatprep.subr.bf16.mxu1 %v4035_v14  ;;  %v126_v5 = vld [vmem:[%s6572_s6] sm:$0xf] }
 0x146   :  { %949 = vmatpush1.bf16.msra.mxu0 %v4000_v8  ;;  %990 = vmatpush1.bf16.msra.mxu1 %v4042_v15  ;;  %v4613_v8 = vrot.slane %v126_v5, %v130_v4  ;;  %v6984_v4 = vld [vmem:[#allocation5_spill] sm:$0xff] }
 0x147   :  { %950 = vmatprep.subr.bf16.mxu0 %v4007_v9  ;;  %991 = vmatprep.subr.bf16.mxu1 %v4048_v16 }
 0x14a   :  { %951 = vmatpush1.bf16.msra.mxu0 %v4025_v12  ;;  %992 = vmatpush1.bf16.msra.mxu1 %v4066_v19  ;;  %v4616_v12 = vrot.slane %v126_v5, %v134_v7  ;;  %v6991_v7 = vld [vmem:[#allocation17_spill] sm:$0xff] }
 0x14b   :  { %952 = vmatprep.subr.bf16.mxu0 %v4030_v13  ;;  %993 = vmatprep.subr.bf16.mxu1 %v4072_v20 }
 0x14e   :  { %953 = vmatpush1.bf16.msra.mxu0 %v4054_v17  ;;  %994 = vmatpush1.bf16.msra.mxu1 %v4090_v23 }
 0x14f   :  { %954 = vmatprep.subr.bf16.mxu0 %v4060_v18  ;;  %995 = vmatprep.subr.bf16.mxu1 %v4096_v24 }
 0x152   :  { %955 = vmatpush1.bf16.msra.mxu0 %v4078_v21  ;;  %996 = vmatpush1.bf16.msra.mxu1 %v4114_v27  ;;  %v142_v21 = vsub.s32 3, %v129_v3  ;;  %v138_v27 = vsub.s32 2, %v129_v3 }
 0x153   :  { %956 = vmatprep.subr.bf16.mxu0 %v4084_v22  ;;  %997 = vmatprep.subr.bf16.mxu1 %v4120_v28 }
 0x154   :  { %v4625_v44 = vrot.slane %v126_v5, %v138_v27  ;;  %v7008_v27 = vld [vmem:[#allocation31_spill] sm:$0xff] }
 0x156   :  { %957 = vmatpush1.bf16.msra.mxu0 %v4101_v25  ;;  %998 = vmatpush1.bf16.msra.mxu1 %v4141_v32  ;;  %v4621_v25 = vrot.slane %v126_v5, %v142_v21  ;;  %v6990_v5 = vld [vmem:[#allocation11_spill] sm:$0xff]  ;;  %v7003_v21 = vld [vmem:[#allocation26_spill] sm:$0xff] }
 0x157   :  { %958 = vmatprep.subr.bf16.mxu0 %v4107_v26  ;;  %999 = vmatprep.subr.bf16.mxu1 %v4147_v33 }
 0x15a   :  { %959 = vmatpush1.bf16.msra.mxu0 %v4125_v29  ;;  %1000 = vmatpush1.bf16.msra.mxu1 %v4165_v37 }
 0x15b   :  { %1031 = vmatprep.subr.bf16.mxu0 %v4135_v31  ;;  %1072 = vmatprep.subr.bf16.mxu1 %v4171_v38 }
 0x1fd   :  { %v867_v9 = vpop.f32.mrf.mxu0  ;;  %v908_v10 = vpop.f32.mrf.mxu1 }
 0x1fe   :  { %v868_v11 = vadd.f32 %v867_v9, %v4546_v60  ;;  %v909_v50 = vadd.f32 %v908_v10, %v4550_v34  ;;  %v6992_v9 = vld [vmem:[#allocation12_spill] sm:$0xff]  ;;  %v6993_v10 = vld [vmem:[#allocation18_spill] sm:$0xff] }
 0x1ff   :  { %v869_v13 = vpop.f32.mrf.mxu0  ;;  %v910_v14 = vpop.f32.mrf.mxu1 }
 0x200   :  { %v915_v15 = vadd.f32 %v868_v11, %v4613_v8  ;;  %v870_v16 = vadd.f32 %v869_v13, %v4548_v63  ;;  %v911_v26 = vadd.f32 %v910_v14, %v4552_v58  ;;  %v917_v51 = vadd.f32 %v909_v50, %v4625_v44  ;;  %v6994_v11 = vld [vmem:[#allocation15_spill] sm:$0xff]  ;;  %v6995_v13 = vld [vmem:[#allocation20_spill] sm:$0xff]  ;;  %v7011_v50 = vld [vmem:[#allocation34_spill] sm:$0xff] }
 0x201   :  { %v871_v17 = vpop.f32.mrf.mxu0  ;;  %v912_v18 = vpop.f32.mrf.mxu1  ;;  %v6996_v14 = vld [vmem:[#allocation16_spill] sm:$0xff] }
 0x202   :  { %v3232_v19 = vmul.f32 -1.442695, %v915_v15  ;;  %v916_v20 = vadd.f32 %v870_v16, %v4616_v12  ;;  %v918_v29 = vadd.f32 %v911_v26, %v4621_v25  ;;  %v6997_v15 = vld [vmem:[#allocation21_spill] sm:$0xff]  ;;  %v6998_v16 = vld [vmem:[#allocation19_spill] sm:$0xff]  ;;  %v6999_v17 = vld [vmem:[#allocation22_spill] sm:$0xff] }
 0x203   :  { %v872_v22 = vpop.f32.mrf.mxu0  ;;  %v913_v23 = vpop.f32.mrf.mxu1  ;;  %v7000_v18 = vld [vmem:[#allocation23_spill] sm:$0xff]  ;;  %v7007_v26 = vld [vmem:[#allocation30_spill] sm:$0xff] }
 0x204   :  { %3469 = vpow2.f32 %v3232_v19  ;;  %v3233_v24 = vmul.f32 -1.442695, %v916_v20  ;;  %v3234_v60 = vmul.f32 -1.442695, %v918_v29  ;;  %v7001_v19 = vld [vmem:[#allocation24_spill] sm:$0xff]  ;;  %v7002_v20 = vld [vmem:[#allocation25_spill] sm:$0xff] }
 0x205   :  { %v7004_v22 = vld [vmem:[#allocation27_spill] sm:$0xff]  ;;  %v7005_v23 = vld [vmem:[#allocation28_spill] sm:$0xff] }
 0x206   :  { %3471 = vpow2.f32 %v3233_v24  ;;  %v7006_v24 = vld [vmem:[#allocation29_spill] sm:$0xff]  ;;  %v7009_v29 = vld [vmem:[#allocation32_spill] sm:$0xff] }
 0x207   :  { %3473 = vpow2.f32 %v3234_v60  ;;  %v7012_v60 = vld [vmem:[#allocation35_spill] sm:$0xff] }
 0x211   :  { %v3470_v63 = vpop.eup %3469 }
 0x212   :  { %v922_v57 = vadd.f32 1.0, %v3470_v63  ;;  %v7013_v63 = vld [vmem:[#allocation36_spill] sm:$0xff] }
 0x213   :  { %v3472_v0 = vpop.eup %3471 }
 0x214   :  { %3475 = vrcp.f32 %v922_v57  ;;  %v928_v48 = vadd.f32 1.0, %v3472_v0  ;;  %v3474_v30 = vpop.eup %3473  ;;  %v7015_v57 = vld [vmem:[#allocation38_spill] sm:$0xff]  ;;  %v7016_v0 = vld [vmem:[#allocation39_spill] sm:$0xff] }
 0x215   :  { %3477 = vtanh.f32 %v917_v51  ;;  %v935_v34 = vadd.f32 1.0, %v3474_v30  ;;  %v7014_v51 = vld [vmem:[#allocation37_spill] sm:$0xff] }
 0x216   :  { %3479 = vrcp.f32 %v928_v48  ;;  %v7017_v48 = vld [vmem:[#allocation40_spill] sm:$0xff]  ;;  %v7018_v30 = vld [vmem:[#allocation41_spill] sm:$0xff] }
 0x217   :  { %3481 = vrcp.f32 %v935_v34  ;;  %v7023_v34 = vld [vmem:[#allocation46_spill] sm:$0xff] }
 0x221   :  { %v3476_v58 = vpop.eup %3475 }
 0x222   :  { %v3478_v47 = vpop.eup %3477 }
 0x223   :  { %v3480_v53 = vpop.eup %3479  ;;  %v939_v61 = vmul.f32 %v3478_v47, %v3476_v58  ;;  %v7019_v58 = vld [vmem:[#allocation42_spill] sm:$0xff]  ;;  %v7021_v47 = vld [vmem:[#allocation44_spill] sm:$0xff] }
 0x224   :  { %v938_v54 = vmul.f32 %v3480_v53, %v3132_v55  ;;  %v3482_v59 = vpop.eup %3481  ;;  %v7020_v55 = vld [vmem:[#allocation43_spill] sm:$0xff]  ;;  %v7022_v53 = vld [vmem:[#allocation45_spill] sm:$0xff] }
 0x226   :  { %v4632_v1 = vadd.f32 %v939_v61, %v938_v54  ;;  %v7024_v61 = vld [vmem:[#allocation47_spill] sm:$0xff]  ;;  %v7025_v54 = vld [vmem:[#allocation48_spill] sm:$0xff] }
 0x228   :  { %3483 = vtanh.f32 %v4632_v1 }
 0x235   :  { %v3484_v6 = vpop.eup %3483 }
 0x236   :  { %v942_v2 = vmul.f32 %v3484_v6, %v3482_v59  ;;  %v7026_v59 = vld [vmem:[#allocation49_spill] sm:$0xff]  ;;  %v7027_v6 = vld [vmem:[#allocation50_spill] sm:$0xff] }
 0x238   :  { %v943_v3 = vpack.c.bf16 %v942_v2, %v942_v2  ;;  %v7028_v2 = vld [vmem:[#allocation51_spill] sm:$0xff] }
 0x23a   :  { %977 = vmatmul.mubr.bf16.vlgmr.msra.gmra.mxu0 %v943_v3  ;;  %1018 = vmatmul.mubr.bf16.vlgmr.msra.gmra.mxu1 %v943_v3  ;;  %v7029_v3 = vld [vmem:[#allocation52_spill] sm:$0xff] }
 0x23b   :  { %1032 = vmatpush1.bf16.msra.mxu0 %v4152_v35  ;;  %1073 = vmatpush1.bf16.msra.mxu1 %v4190_v41  ;;  %v6980_v35 = vld [vmem:[#allocation3_spill] sm:$0xff]  ;;  %v6982_v41 = vld [vmem:[#allocation4_spill] sm:$0xff] }
 0x23c   :  { %1033 = vmatprep.subr.bf16.mxu0 %v4158_v36  ;;  %1074 = vmatprep.subr.bf16.mxu1 %v4196_v42  ;;  %v6981_v36 = vld [vmem:[#allocation6_spill] sm:$0xff]  ;;  %v6983_v42 = vld [vmem:[#allocation9_spill] sm:$0xff] }
 0x23d   :  { %1063 = vmatprep.mubr.bf16.mxu0 %v6947_v56  ;;  %1104 = vmatprep.mubr.bf16.mxu1 %v6947_v56 }
 0x23f   :  { %1034 = vmatpush1.bf16.msra.mxu0 %v4177_v39  ;;  %1075 = vmatpush1.bf16.msra.mxu1 %v4214_v45  ;;  %v6985_v39 = vld [vmem:[#allocation10_spill] sm:$0xff]  ;;  %v6986_v45 = vld [vmem:[#allocation7_spill] sm:$0xff] }
 0x240   :  { %1035 = vmatprep.subr.bf16.mxu0 %v4184_v40  ;;  %1076 = vmatprep.subr.bf16.mxu1 %v4220_v46  ;;  %v6987_v40 = vld [vmem:[#allocation13_spill] sm:$0xff]  ;;  %v6988_v46 = vld [vmem:[#allocation8_spill] sm:$0xff] }
 0x243   :  { %1036 = vmatpush1.bf16.msra.mxu0 %v4202_v43  ;;  %1077 = vmatpush1.bf16.msra.mxu1 %v4239_v49  ;;  %v6989_v43 = vld [vmem:[#allocation14_spill] sm:$0xff] }
 0x244   :  { %1037 = vmatprep.subr.bf16.mxu0 %v6980_v35  ;;  %1078 = vmatprep.subr.bf16.mxu1 %v6981_v36  ;;  %v7030_v35 = vld [vmem:[#allocation53_spill] sm:$0xff] }
 0x247   :  { %1038 = vmatpush1.bf16.msra.mxu0 %v6982_v41  ;;  %1079 = vmatpush1.bf16.msra.mxu1 %v6983_v42  ;;  %v7031_v41 = vld [vmem:[#allocation54_spill] sm:$0xff] }
 0x248   :  { %1039 = vmatprep.subr.bf16.mxu0 %v6984_v4  ;;  %1080 = vmatprep.subr.bf16.mxu1 %v6985_v39  ;;  %v4706_v4 = vld [vmem:[%s6566_s5 + $0xe4] ss:$16 sps:$4 sm:$0xff]  }
 0x249   :  { %7032 = vst [vmem:[#allocation3_spill] sm:$0xff] %v4706_v4 }
 0x24b   :  { %1040 = vmatpush1.bf16.msra.mxu0 %v6986_v45  ;;  %1081 = vmatpush1.bf16.msra.mxu1 %v6987_v40 }
 0x24c   :  { %1041 = vmatprep.subr.bf16.mxu0 %v6988_v46  ;;  %1082 = vmatprep.subr.bf16.mxu1 %v6989_v43 }
 0x24f   :  { %1042 = vmatpush1.bf16.msra.mxu0 %v6990_v5  ;;  %1083 = vmatpush1.bf16.msra.mxu1 %v6991_v7 }
 0x250   :  { %1043 = vmatprep.subr.bf16.mxu0 %v6992_v9  ;;  %1084 = vmatprep.subr.bf16.mxu1 %v6993_v10 }
 0x253   :  { %1044 = vmatpush1.bf16.msra.mxu0 %v6994_v11  ;;  %1085 = vmatpush1.bf16.msra.mxu1 %v6995_v13 }
 0x254   :  { %1045 = vmatprep.subr.bf16.mxu0 %v6996_v14  ;;  %1086 = vmatprep.subr.bf16.mxu1 %v6997_v15 }
 0x257   :  { %1046 = vmatpush1.bf16.msra.mxu0 %v6998_v16  ;;  %1087 = vmatpush1.bf16.msra.mxu1 %v6999_v17 }
 0x258   :  { %1142 = vmatprep.subr.bf16.mxu0 %v7000_v18  ;;  %1183 = vmatprep.subr.bf16.mxu1 %v7001_v19 }
 0x25a   :  { %1064 = vmatmul.mubr.bf16.vlgmr.msra.gmra.mxu0 %v4572_v52  ;;  %1105 = vmatmul.mubr.bf16.vlgmr.msra.gmra.mxu1 %v4572_v52  ;;  %v7010_v52 = vld [vmem:[#allocation33_spill] sm:$0xff] }
 0x25b   :  { %1143 = vmatpush1.bf16.msra.mxu0 %v7002_v20  ;;  %1184 = vmatpush1.bf16.msra.mxu1 %v7003_v21 }
 0x25c   :  { %1144 = vmatprep.subr.bf16.mxu0 %v7004_v22  ;;  %1185 = vmatprep.subr.bf16.mxu1 %v7005_v23 }
 0x25d   :  { %1174 = vmatprep.mubr.bf16.mxu0 %v6947_v56  ;;  %1215 = vmatprep.mubr.bf16.mxu1 %v6947_v56 }
 0x25f   :  { %1145 = vmatpush1.bf16.msra.mxu0 %v7006_v24  ;;  %1186 = vmatpush1.bf16.msra.mxu1 %v7007_v26 }
 0x260   :  { %1146 = vmatprep.subr.bf16.mxu0 %v7008_v27  ;;  %1187 = vmatprep.subr.bf16.mxu1 %v7009_v29 }
 0x263   :  { %1147 = vmatpush1.bf16.msra.mxu0 %v7010_v52  ;;  %1188 = vmatpush1.bf16.msra.mxu1 %v7011_v50 }
 0x264   :  { %1148 = vmatprep.subr.bf16.mxu0 %v7012_v60  ;;  %1189 = vmatprep.subr.bf16.mxu1 %v7013_v63 }
 0x267   :  { %1149 = vmatpush1.bf16.msra.mxu0 %v7014_v51  ;;  %1190 = vmatpush1.bf16.msra.mxu1 %v7015_v57  ;;  %v3238_v51 = vld [vmem:[%s6570_s0 + $0x38] sm:$0xff] }
 0x268   :  { %1150 = vmatprep.subr.bf16.mxu0 %v7016_v0  ;;  %1191 = vmatprep.subr.bf16.mxu1 %v7017_v48 }
 0x26b   :  { %1151 = vmatpush1.bf16.msra.mxu0 %v7018_v30  ;;  %1192 = vmatpush1.bf16.msra.mxu1 %v7019_v58 }
 0x26c   :  { %1152 = vmatprep.subr.bf16.mxu0 %v7020_v55  ;;  %1193 = vmatprep.subr.bf16.mxu1 %v7021_v47 }
 0x26f   :  { %1153 = vmatpush1.bf16.msra.mxu0 %v7022_v53  ;;  %1194 = vmatpush1.bf16.msra.mxu1 %v7023_v34  ;;  %v3235_v53 = vld [vmem:[%s6570_s0 + $0x20] sm:$0xff] }
 0x270   :  { %1154 = vmatprep.subr.bf16.mxu0 %v7024_v61  ;;  %1195 = vmatprep.subr.bf16.mxu1 %v7025_v54  ;;  %v7033_v54 = vld [vmem:[#allocation2_spill] sm:$0xff] }
 0x273   :  { %1155 = vmatpush1.bf16.msra.mxu0 %v7026_v59  ;;  %1196 = vmatpush1.bf16.msra.mxu1 %v7027_v6 }
 0x274   :  { %1156 = vmatprep.subr.bf16.mxu0 %v7028_v2  ;;  %1197 = vmatprep.subr.bf16.mxu1 %v7029_v3 }
 0x277   :  { %1157 = vmatpush1.bf16.msra.mxu0 %v7030_v35  ;;  %1198 = vmatpush1.bf16.msra.mxu1 %v7031_v41 }
 0x278   :  { %1253 = vmatprep.subr.bf16.mxu0 %v4706_v4  ;;  %1294 = vmatprep.subr.bf16.mxu1 %v7033_v54  ;;  %v3236_v54 = vld [vmem:[%s6570_s0 + $0x28] sm:$0xff] }
 0x2fa   :  { %v4710_v59 = vpop.f32.mrf.mxu0  ;;  %v4712_v6 = vpop.f32.mrf.mxu1 }
 0x2fc   :  { %v4714_v2 = vpop.f32.mrf.mxu0  ;;  %v4716_v3 = vpop.f32.mrf.mxu1 }
 0x2fe   :  { %v982_v35 = vpop.f32.mrf.mxu0  ;;  %v1023_v61 = vpop.f32.mrf.mxu1 }
 0x300   :  { %v983_v41 = vpop.f32.mrf.mxu0  ;;  %v1024_v34 = vpop.f32.mrf.mxu1 }
 0x31a   :  { %v1065_v47 = vpop.f32.mrf.mxu0  ;;  %v1106_v4 = vpop.f32.mrf.mxu1 }
 0x31b   :  { %v1113_v55 = vadd.f32 %v3235_v53, %v1065_v47  ;;  %v3237_v47 = vld [vmem:[%s6570_s0 + $0x30] sm:$0xff] }
 0x31c   :  { %v1067_v58 = vpop.f32.mrf.mxu0  ;;  %v1108_v30 = vpop.f32.mrf.mxu1 }
 0x31d   :  { %v3239_v48 = vmul.f32 -1.442695, %v1113_v55  ;;  %v1114_v0 = vadd.f32 %v3236_v54, %v1067_v58  ;;  %v1116_v63 = vadd.f32 %v3238_v51, %v1108_v30  ;;  %v1115_v55 = vadd.f32 %v3237_v47, %v1106_v4 }
 0x31e   :  { %v1069_v57 = vpop.f32.mrf.mxu0  ;;  %v1110_v35 = vpop.f32.mrf.mxu1 }
 0x31f   :  { %3485 = vpow2.f32 %v3239_v48  ;;  %v3240_v61 = vmul.f32 -1.442695, %v1114_v0  ;;  %v3241_v53 = vmul.f32 -1.442695, %v1116_v63 }
 0x320   :  { %v1070_v34 = vpop.f32.mrf.mxu0  ;;  %v1111_v41 = vpop.f32.mrf.mxu1 }
 0x321   :  { %3487 = vpow2.f32 %v3240_v61 }
 0x322   :  { %3489 = vpow2.f32 %v3241_v53  ;;  %v4741_v53 = vld [vmem:[%s6566_s5 + $0xe0] ss:$16 sps:$4 sm:$0xff]  }
 0x32c   :  { %v3486_v60 = vpop.eup %3485 }
 0x32d   :  { %v1120_v58 = vadd.f32 1.0, %v3486_v60 }
 0x32e   :  { %v3488_v57 = vpop.eup %3487 }
 0x32f   :  { %3491 = vrcp.f32 %v1120_v58  ;;  %v1126_v0 = vadd.f32 1.0, %v3488_v57  ;;  %v3490_v48 = vpop.eup %3489  ;;  %v4759_v58 = vld [vmem:[%s6566_s5 + $0xcc] ss:$16 sps:$4 sm:$0xff]   ;;  %v4767_v57 = vld [vmem:[%s6566_s5 + $0xc0] ss:$16 sps:$4 sm:$0xff]  }
 0x330   :  { %3493 = vtanh.f32 %v1115_v55  ;;  %v1133_v34 = vadd.f32 1.0, %v3490_v48  ;;  %v4753_v55 = vld [vmem:[%s6566_s5 + $0xc4] ss:$16 sps:$4 sm:$0xff]  }
 0x331   :  { %3495 = vrcp.f32 %v1126_v0  ;;  %v4773_v0 = vld [vmem:[%s6566_s5 + $0xc8] ss:$16 sps:$4 sm:$0xff]   ;;  %v4779_v48 = vld [vmem:[%s6566_s5 + $0xa4] ss:$16 sps:$4 sm:$0xff]  }
 0x332   :  { %3497 = vrcp.f32 %v1133_v34  ;;  %7034 = vst [vmem:[#allocation6_spill] sm:$0xff] %v4779_v48  ;;  %v4803_v34 = vld [vmem:[%s6566_s5 + $0x84] ss:$16 sps:$4 sm:$0xff]  }
 0x333   :  { %7038 = vst [vmem:[#allocation10_spill] sm:$0xff] %v4803_v34 }
 0x33c   :  { %v3492_v54 = vpop.eup %3491 }
 0x33d   :  { %v3494_v35 = vpop.eup %3493 }
 0x33e   :  { %v3496_v61 = vpop.eup %3495  ;;  %v1137_v51 = vmul.f32 %v3494_v35, %v3492_v54  ;;  %v4785_v54 = vld [vmem:[%s6566_s5 + $0xac] ss:$16 sps:$4 sm:$0xff]   ;;  %v4791_v35 = vld [vmem:[%s6566_s5 + $0xa0] ss:$16 sps:$4 sm:$0xff]  }
 0x33f   :  { %v1136_v30 = vmul.f32 %v3496_v61, %v4569_v62  ;;  %v3498_v60 = vpop.eup %3497  ;;  %v4747_v62 = vld [vmem:[%s6566_s5 + $0xe8] ss:$16 sps:$4 sm:$0xff]   ;;  %7035 = vst [vmem:[#allocation4_spill] sm:$0xff] %v4785_v54  ;;  %7036 = vst [vmem:[#allocation9_spill] sm:$0xff] %v4791_v35 }
 0x340   :  { %v4797_v61 = vld [vmem:[%s6566_s5 + $0xa8] ss:$16 sps:$4 sm:$0xff]  }
 0x341   :  { %v4731_v41 = vadd.f32 %v1137_v51, %v1136_v30  ;;  %7037 = vst [vmem:[#allocation5_spill] sm:$0xff] %v4797_v61  ;;  %v4809_v51 = vld [vmem:[%s6566_s5 + $0x8c] ss:$16 sps:$4 sm:$0xff]   ;;  %v4815_v30 = vld [vmem:[%s6566_s5 + $0x80] ss:$16 sps:$4 sm:$0xff]  }
 0x342   :  { %7039 = vst [vmem:[#allocation7_spill] sm:$0xff] %v4809_v51  ;;  %7040 = vst [vmem:[#allocation13_spill] sm:$0xff] %v4815_v30 }
 0x343   :  { %3499 = vtanh.f32 %v4731_v41 }
 0x350   :  { %v3500_v63 = vpop.eup %3499 }
 0x351   :  { %v1140_v4 = vmul.f32 %v3500_v63, %v3498_v60  ;;  %v4821_v60 = vld [vmem:[%s6566_s5 + $0x88] ss:$16 sps:$4 sm:$0xff]   ;;  %v4827_v63 = vld [vmem:[%s6566_s5 + $0x64] ss:$16 sps:$4 sm:$0xff]  }
 0x352   :  { %7041 = vst [vmem:[#allocation8_spill] sm:$0xff] %v4821_v60  ;;  %7042 = vst [vmem:[#allocation14_spill] sm:$0xff] %v4827_v63 }
 0x353   :  { %v4734_v47 = vpack.c.bf16 %v1140_v4, %v1140_v4  ;;  %v4833_v4 = vld [vmem:[%s6566_s5 + $0x6c] ss:$16 sps:$4 sm:$0xff]  }
 0x354   :  { %7043 = vst [vmem:[#allocation11_spill] sm:$0xff] %v4833_v4 }
 0x355   :  { %1175 = vmatmul.mubr.bf16.vlgmr.msra.gmra.mxu0 %v4734_v47  ;;  %1216 = vmatmul.mubr.bf16.vlgmr.msra.gmra.mxu1 %v4734_v47 }
 0x356   :  { %1254 = vmatpush1.bf16.msra.mxu0 %v4741_v53  ;;  %1295 = vmatpush1.bf16.msra.mxu1 %v4747_v62 }
 0x357   :  { %1255 = vmatprep.subr.bf16.mxu0 %v4753_v55  ;;  %1296 = vmatprep.subr.bf16.mxu1 %v4759_v58 }
 0x358   :  { %1285 = vmatprep.mubr.bf16.mxu0 %v6947_v56  ;;  %1326 = vmatprep.mubr.bf16.mxu1 %v6947_v56 }
 0x35a   :  { %1256 = vmatpush1.bf16.msra.mxu0 %v4767_v57  ;;  %1297 = vmatpush1.bf16.msra.mxu1 %v4773_v0 }
 0x35b   :  { %1257 = vmatprep.subr.bf16.mxu0 %v4779_v48  ;;  %1298 = vmatprep.subr.bf16.mxu1 %v4785_v54 }
 0x35e   :  { %1258 = vmatpush1.bf16.msra.mxu0 %v4791_v35  ;;  %1299 = vmatpush1.bf16.msra.mxu1 %v4797_v61 }
 0x35f   :  { %1259 = vmatprep.subr.bf16.mxu0 %v4803_v34  ;;  %1300 = vmatprep.subr.bf16.mxu1 %v4809_v51 }
 0x362   :  { %1260 = vmatpush1.bf16.msra.mxu0 %v4815_v30  ;;  %1301 = vmatpush1.bf16.msra.mxu1 %v4821_v60  ;;  %v4839_v30 = vld [vmem:[%s6566_s5 + $0x60] ss:$16 sps:$4 sm:$0xff]   ;;  %v4845_v60 = vld [vmem:[%s6566_s5 + $0x68] ss:$16 sps:$4 sm:$0xff]  }
 0x363   :  { %1261 = vmatprep.subr.bf16.mxu0 %v4827_v63  ;;  %1302 = vmatprep.subr.bf16.mxu1 %v4833_v4  ;;  %7044 = vst [vmem:[#allocation17_spill] sm:$0xff] %v4839_v30  ;;  %7045 = vst [vmem:[#allocation12_spill] sm:$0xff] %v4845_v60  ;;  %v4851_v63 = vld [vmem:[%s6566_s5 + $0x44] ss:$16 sps:$4 sm:$0xff]   ;;  %v4857_v4 = vld [vmem:[%s6566_s5 + $0x4c] ss:$16 sps:$4 sm:$0xff]  }
 0x364   :  { %7046 = vst [vmem:[#allocation18_spill] sm:$0xff] %v4851_v63  ;;  %7047 = vst [vmem:[#allocation15_spill] sm:$0xff] %v4857_v4 }
 0x366   :  { %1262 = vmatpush1.bf16.msra.mxu0 %v4839_v30  ;;  %1303 = vmatpush1.bf16.msra.mxu1 %v4845_v60  ;;  %v4863_v30 = vld [vmem:[%s6566_s5 + $0x40] ss:$16 sps:$4 sm:$0xff]   ;;  %v4869_v60 = vld [vmem:[%s6566_s5 + $0x48] ss:$16 sps:$4 sm:$0xff]  }
 0x367   :  { %1263 = vmatprep.subr.bf16.mxu0 %v4851_v63  ;;  %1304 = vmatprep.subr.bf16.mxu1 %v4857_v4  ;;  %7048 = vst [vmem:[#allocation20_spill] sm:$0xff] %v4863_v30  ;;  %7049 = vst [vmem:[#allocation16_spill] sm:$0xff] %v4869_v60  ;;  %v4875_v63 = vld [vmem:[%s6566_s5 + $0x24] ss:$16 sps:$4 sm:$0xff]  }
 0x368   :  { %7050 = vst [vmem:[#allocation21_spill] sm:$0xff] %v4875_v63 }
 0x36a   :  { %1264 = vmatpush1.bf16.msra.mxu0 %v4863_v30  ;;  %1305 = vmatpush1.bf16.msra.mxu1 %v4869_v60  ;;  %v4882_v30 = vld [vmem:[%s6566_s5 + $0x20] ss:$16 sps:$4 sm:$0xff]   ;;  %v4889_v60 = vld [vmem:[%s6566_s5 + $0x4] ss:$16 sps:$4 sm:$0xff]  }
 0x36b   :  { %1265 = vmatprep.subr.bf16.mxu0 %v4875_v63  ;;  %1306 = vmatprep.subr.bf16.mxu1 %v4120_v28  ;;  %7051 = vst [vmem:[#allocation19_spill] sm:$0xff] %v4882_v30  ;;  %7052 = vst [vmem:[#allocation22_spill] sm:$0xff] %v4889_v60  ;;  %v4896_v28 = vld [vmem:[%s6566_s5] ss:$16 sps:$4 sm:$0xff]  }
 0x36c   :  { %7053 = vst [vmem:[#allocation23_spill] sm:$0xff] %v4896_v28 }
 0x36e   :  { %1266 = vmatpush1.bf16.msra.mxu0 %v4882_v30  ;;  %1307 = vmatpush1.bf16.msra.mxu1 %v4141_v32 }
 0x36f   :  { %1267 = vmatprep.subr.bf16.mxu0 %v4889_v60  ;;  %1308 = vmatprep.subr.bf16.mxu1 %v4147_v33 }
 0x372   :  { %1268 = vmatpush1.bf16.msra.mxu0 %v4896_v28  ;;  %1309 = vmatpush1.bf16.msra.mxu1 %v4165_v37 }
 0x373   :  { %1340 = vmatprep.subr.bf16.mxu0 %v4135_v31  ;;  %1381 = vmatprep.subr.bf16.mxu1 %v4171_v38 }
 0x415   :  { %v1176_v32 = vpop.f32.mrf.mxu0  ;;  %v1217_v30 = vpop.f32.mrf.mxu1 }
 0x416   :  { %v1177_v63 = vadd.f32 %v1176_v32, %v4710_v59  ;;  %v1218_v32 = vadd.f32 %v1217_v30, %v4712_v6 }
 0x417   :  { %v1178_v60 = vpop.f32.mrf.mxu0  ;;  %v1219_v4 = vpop.f32.mrf.mxu1 }
 0x418   :  { %v1224_v33 = vadd.f32 %v1177_v63, %v4613_v8  ;;  %v1179_v51 = vadd.f32 %v1178_v60, %v4714_v2  ;;  %v1220_v38 = vadd.f32 %v1219_v4, %v4716_v3  ;;  %v1226_v2 = vadd.f32 %v1218_v32, %v4625_v44  ;;  %v4935_v32 = vld [vmem:[%s6567_s3 + $0xcc] ss:$16 sps:$4 sm:$0xff]  }
 0x419   :  { %v1180_v34 = vpop.f32.mrf.mxu0  ;;  %v1221_v61 = vpop.f32.mrf.mxu1 }
 0x41a   :  { %v3242_v35 = vmul.f32 -1.442695, %v1224_v33  ;;  %v1225_v28 = vadd.f32 %v1179_v51, %v4616_v12  ;;  %v1227_v59 = vadd.f32 %v1220_v38, %v4621_v25  ;;  %v4917_v38 = vld [vmem:[%s6567_s3 + $0xe0] ss:$16 sps:$4 sm:$0xff]  }
 0x41b   :  { %v1181_v37 = vpop.f32.mrf.mxu0  ;;  %v1222_v54 = vpop.f32.mrf.mxu1 }
 0x41c   :  { %3501 = vpow2.f32 %v3242_v35  ;;  %v3243_v31 = vmul.f32 -1.442695, %v1225_v28  ;;  %v3244_v48 = vmul.f32 -1.442695, %v1227_v59  ;;  %v4929_v59 = vld [vmem:[%s6567_s3 + $0xc4] ss:$16 sps:$4 sm:$0xff]  }
 0x41e   :  { %3503 = vpow2.f32 %v3243_v31 }
 0x41f   :  { %3505 = vpow2.f32 %v3244_v48 }
 0x429   :  { %v3502_v63 = vpop.eup %3501 }
 0x42a   :  { %v1231_v34 = vadd.f32 1.0, %v3502_v63  ;;  %v4943_v63 = vld [vmem:[%s6567_s3 + $0xc0] ss:$16 sps:$4 sm:$0xff]  }
 0x42b   :  { %v3504_v61 = vpop.eup %3503 }
 0x42c   :  { %3507 = vrcp.f32 %v1231_v34  ;;  %v1237_v51 = vadd.f32 1.0, %v3504_v61  ;;  %v3506_v54 = vpop.eup %3505  ;;  %v4955_v34 = vld [vmem:[%s6567_s3 + $0xa4] ss:$16 sps:$4 sm:$0xff]   ;;  %v4961_v61 = vld [vmem:[%s6567_s3 + $0xac] ss:$16 sps:$4 sm:$0xff]  }
 0x42d   :  { %3509 = vtanh.f32 %v1226_v2  ;;  %v1244_v3 = vadd.f32 1.0, %v3506_v54  ;;  %v4949_v2 = vld [vmem:[%s6567_s3 + $0xc8] ss:$16 sps:$4 sm:$0xff]   ;;  %v4974_v54 = vld [vmem:[%s6567_s3 + $0x84] ss:$16 sps:$4 sm:$0xff]  }
 0x42e   :  { %3511 = vrcp.f32 %v1237_v51  ;;  %v4967_v51 = vld [vmem:[%s6567_s3 + $0xa0] ss:$16 sps:$4 sm:$0xff]  }
 0x42f   :  { %3513 = vrcp.f32 %v1244_v3 }
 0x439   :  { %v3508_v35 = vpop.eup %3507 }
 0x43a   :  { %v3510_v60 = vpop.eup %3509 }
 0x43b   :  { %v3512_v28 = vpop.eup %3511  ;;  %v1248_v4 = vmul.f32 %v3510_v60, %v3508_v35  ;;  %v4981_v35 = vld [vmem:[%s6567_s3 + $0x80] ss:$16 sps:$4 sm:$0xff]  }
 0x43c   :  { %v1247_v33 = vmul.f32 %v3512_v28, %v4632_v1  ;;  %v3514_v30 = vpop.eup %3513  ;;  %v4923_v1 = vld [vmem:[%s6567_s3 + $0xe8] ss:$16 sps:$4 sm:$0xff]   ;;  %v3245_v60 = vld [vmem:[%s6570_s0 + $0x40] sm:$0xff] }
 0x43e   :  { %v4911_v6 = vadd.f32 %v1248_v4, %v1247_v33  ;;  %v3246_v4 = vld [vmem:[%s6570_s0 + $0x48] sm:$0xff] }
 0x440   :  { %3515 = vtanh.f32 %v4911_v6 }
 0x44d   :  { %v3516_v37 = vpop.eup %3515 }
 0x44e   :  { %v1251_v48 = vmul.f32 %v3516_v37, %v3514_v30 }
 0x450   :  { %v1252_v31 = vpack.c.bf16 %v1251_v48, %v1251_v48 }
 0x452   :  { %1286 = vmatmul.mubr.bf16.vlgmr.msra.gmra.mxu0 %v1252_v31  ;;  %1327 = vmatmul.mubr.bf16.vlgmr.msra.gmra.mxu1 %v1252_v31 }
 0x453   :  { %1341 = vmatpush1.bf16.msra.mxu0 %v4917_v38  ;;  %1382 = vmatpush1.bf16.msra.mxu1 %v4923_v1 }
 0x454   :  { %1342 = vmatprep.subr.bf16.mxu0 %v4929_v59  ;;  %1383 = vmatprep.subr.bf16.mxu1 %v4935_v32 }
 0x455   :  { %1372 = vmatprep.mubr.bf16.mxu0 %v6947_v56  ;;  %1413 = vmatprep.mubr.bf16.mxu1 %v6947_v56 }
 0x457   :  { %1343 = vmatpush1.bf16.msra.mxu0 %v4943_v63  ;;  %1384 = vmatpush1.bf16.msra.mxu1 %v4949_v2 }
 0x458   :  { %1344 = vmatprep.subr.bf16.mxu0 %v4955_v34  ;;  %1385 = vmatprep.subr.bf16.mxu1 %v4961_v61 }
 0x45b   :  { %1345 = vmatpush1.bf16.msra.mxu0 %v4967_v51  ;;  %1386 = vmatpush1.bf16.msra.mxu1 %v4239_v49  ;;  %v4988_v49 = vld [vmem:[%s6567_s3 + $0x64] ss:$16 sps:$4 sm:$0xff]  }
 0x45c   :  { %1346 = vmatprep.subr.bf16.mxu0 %v4974_v54  ;;  %1387 = vmatprep.subr.bf16.mxu1 %v6981_v36  ;;  %7054 = vst [vmem:[#allocation24_spill] sm:$0xff] %v4988_v49  ;;  %v7055_v36 = vld [vmem:[#allocation35_spill] sm:$0xff] }
 0x45f   :  { %1347 = vmatpush1.bf16.msra.mxu0 %v4981_v35  ;;  %1388 = vmatpush1.bf16.msra.mxu1 %v6983_v42  ;;  %v7056_v42 = vld [vmem:[#allocation36_spill] sm:$0xff] }
 0x460   :  { %1348 = vmatprep.subr.bf16.mxu0 %v4988_v49  ;;  %1389 = vmatprep.subr.bf16.mxu1 %v6985_v39  ;;  %v7057_v39 = vld [vmem:[#allocation37_spill] sm:$0xff] }
 0x463   :  { %1349 = vmatpush1.bf16.msra.mxu0 %v6986_v45  ;;  %1390 = vmatpush1.bf16.msra.mxu1 %v6987_v40  ;;  %v7058_v45 = vld [vmem:[#allocation38_spill] sm:$0xff]  ;;  %v7059_v40 = vld [vmem:[#allocation39_spill] sm:$0xff] }
 0x464   :  { %1350 = vmatprep.subr.bf16.mxu0 %v6988_v46  ;;  %1391 = vmatprep.subr.bf16.mxu1 %v6989_v43  ;;  %v7060_v46 = vld [vmem:[#allocation40_spill] sm:$0xff]  ;;  %v7061_v43 = vld [vmem:[#allocation41_spill] sm:$0xff] }
 0x467   :  { %1351 = vmatpush1.bf16.msra.mxu0 %v6990_v5  ;;  %1392 = vmatpush1.bf16.msra.mxu1 %v6991_v7  ;;  %v7062_v5 = vld [vmem:[#allocation42_spill] sm:$0xff]  ;;  %v7063_v7 = vld [vmem:[#allocation43_spill] sm:$0xff] }
 0x468   :  { %1352 = vmatprep.subr.bf16.mxu0 %v6992_v9  ;;  %1393 = vmatprep.subr.bf16.mxu1 %v6993_v10  ;;  %v7064_v9 = vld [vmem:[#allocation44_spill] sm:$0xff]  ;;  %v7065_v10 = vld [vmem:[#allocation45_spill] sm:$0xff] }
 0x46b   :  { %1353 = vmatpush1.bf16.msra.mxu0 %v6994_v11  ;;  %1394 = vmatpush1.bf16.msra.mxu1 %v6995_v13  ;;  %v7066_v11 = vld [vmem:[#allocation46_spill] sm:$0xff]  ;;  %v7067_v13 = vld [vmem:[#allocation47_spill] sm:$0xff] }
 0x46c   :  { %1354 = vmatprep.subr.bf16.mxu0 %v6996_v14  ;;  %1395 = vmatprep.subr.bf16.mxu1 %v6997_v15  ;;  %v7068_v14 = vld [vmem:[#allocation48_spill] sm:$0xff]  ;;  %v7069_v15 = vld [vmem:[#allocation49_spill] sm:$0xff] }
 0x46f   :  { %1355 = vmatpush1.bf16.msra.mxu0 %v6998_v16  ;;  %1396 = vmatpush1.bf16.msra.mxu1 %v6999_v17  ;;  %v7070_v16 = vld [vmem:[#allocation50_spill] sm:$0xff]  ;;  %v7071_v17 = vld [vmem:[#allocation51_spill] sm:$0xff] }
 0x470   :  { %1451 = vmatprep.subr.bf16.mxu0 %v7000_v18  ;;  %1492 = vmatprep.subr.bf16.mxu1 %v7001_v19  ;;  %v7072_v18 = vld [vmem:[#allocation52_spill] sm:$0xff]  ;;  %v7073_v19 = vld [vmem:[#allocation53_spill] sm:$0xff] }
 0x472   :  { %1373 = vmatmul.mubr.bf16.vlgmr.msra.gmra.mxu0 %v4734_v47  ;;  %1414 = vmatmul.mubr.bf16.vlgmr.msra.gmra.mxu1 %v4734_v47 }
 0x473   :  { %1452 = vmatpush1.bf16.msra.mxu0 %v7002_v20  ;;  %1493 = vmatpush1.bf16.msra.mxu1 %v7003_v21  ;;  %v7074_v20 = vld [vmem:[#allocation54_spill] sm:$0xff]  ;;  %v7075_v21 = vld [vmem:[#allocation3_spill] sm:$0xff] }
 0x474   :  { %1453 = vmatprep.subr.bf16.mxu0 %v7004_v22  ;;  %1494 = vmatprep.subr.bf16.mxu1 %v7005_v23  ;;  %v5046_v22 = vld [vmem:[%s6566_s5 + $0xec] ss:$16 sps:$4 sm:$0xff]  }
 0x475   :  { %1483 = vmatprep.mubr.bf16.mxu0 %v6947_v56  ;;  %1524 = vmatprep.mubr.bf16.mxu1 %v6947_v56  ;;  %7076 = vst [vmem:[#allocation25_spill] sm:$0xff] %v5046_v22 }
 0x477   :  { %1454 = vmatpush1.bf16.msra.mxu0 %v7006_v24  ;;  %1495 = vmatpush1.bf16.msra.mxu1 %v7007_v26 }
 0x478   :  { %1455 = vmatprep.subr.bf16.mxu0 %v7008_v27  ;;  %1496 = vmatprep.subr.bf16.mxu1 %v7009_v29 }
 0x47b   :  { %1456 = vmatpush1.bf16.msra.mxu0 %v7010_v52  ;;  %1497 = vmatpush1.bf16.msra.mxu1 %v7011_v50 }
 0x47c   :  { %1457 = vmatprep.subr.bf16.mxu0 %v7055_v36  ;;  %1498 = vmatprep.subr.bf16.mxu1 %v7056_v42 }
 0x47f   :  { %1458 = vmatpush1.bf16.msra.mxu0 %v7057_v39  ;;  %1499 = vmatpush1.bf16.msra.mxu1 %v7058_v45 }
 0x480   :  { %1459 = vmatprep.subr.bf16.mxu0 %v7059_v40  ;;  %1500 = vmatprep.subr.bf16.mxu1 %v7060_v46  ;;  %v3248_v46 = vld [vmem:[%s6570_s0 + $0x58] sm:$0xff] }
 0x483   :  { %1460 = vmatpush1.bf16.msra.mxu0 %v7061_v43  ;;  %1501 = vmatpush1.bf16.msra.mxu1 %v7062_v5  ;;  %v3247_v5 = vld [vmem:[%s6570_s0 + $0x50] sm:$0xff] }
 0x484   :  { %1461 = vmatprep.subr.bf16.mxu0 %v7063_v7  ;;  %1502 = vmatprep.subr.bf16.mxu1 %v7064_v9 }
 0x487   :  { %1462 = vmatpush1.bf16.msra.mxu0 %v7065_v10  ;;  %1503 = vmatpush1.bf16.msra.mxu1 %v7066_v11 }
 0x488   :  { %1463 = vmatprep.subr.bf16.mxu0 %v7067_v13  ;;  %1504 = vmatprep.subr.bf16.mxu1 %v7068_v14 }
 0x48b   :  { %1464 = vmatpush1.bf16.msra.mxu0 %v7069_v15  ;;  %1505 = vmatpush1.bf16.msra.mxu1 %v7070_v16 }
 0x48c   :  { %1465 = vmatprep.subr.bf16.mxu0 %v7071_v17  ;;  %1506 = vmatprep.subr.bf16.mxu1 %v7072_v18 }
 0x48f   :  { %1466 = vmatpush1.bf16.msra.mxu0 %v7073_v19  ;;  %1507 = vmatpush1.bf16.msra.mxu1 %v7074_v20 }
 0x490   :  { %1562 = vmatprep.subr.bf16.mxu0 %v7075_v21  ;;  %1603 = vmatprep.subr.bf16.mxu1 %v5046_v22 }
 0x512   :  { %v5049_v23 = vpop.f32.mrf.mxu0  ;;  %v5051_v24 = vpop.f32.mrf.mxu1 }
 0x514   :  { %v5053_v26 = vpop.f32.mrf.mxu0  ;;  %v5055_v27 = vpop.f32.mrf.mxu1 }
 0x516   :  { %v1291_v29 = vpop.f32.mrf.mxu0  ;;  %v1332_v52 = vpop.f32.mrf.mxu1 }
 0x518   :  { %v1292_v50 = vpop.f32.mrf.mxu0  ;;  %v1333_v47 = vpop.f32.mrf.mxu1 }
 0x532   :  { %v1374_v28 = vpop.f32.mrf.mxu0  ;;  %v1415_v3 = vpop.f32.mrf.mxu1 }
 0x533   :  { %v1422_v33 = vadd.f32 %v3245_v60, %v1374_v28  ;;  %v1424_v10 = vadd.f32 %v3247_v5, %v1415_v3  ;;  %v7078_v3 = vld [vmem:[#allocation4_spill] sm:$0xff] }
 0x534   :  { %v1376_v30 = vpop.f32.mrf.mxu0  ;;  %v1417_v37 = vpop.f32.mrf.mxu1  ;;  %v7092_v5 = vld [vmem:[#allocation16_spill] sm:$0xff] }
 0x535   :  { %v3249_v48 = vmul.f32 -1.442695, %v1422_v33  ;;  %v1423_v31 = vadd.f32 %v3246_v4, %v1376_v30  ;;  %v1425_v43 = vadd.f32 %v3248_v46, %v1417_v37  ;;  %v7079_v4 = vld [vmem:[#allocation9_spill] sm:$0xff]  ;;  %v7081_v30 = vld [vmem:[#allocation10_spill] sm:$0xff]  ;;  %v7082_v37 = vld [vmem:[#allocation7_spill] sm:$0xff] }
 0x536   :  { %v1378_v36 = vpop.f32.mrf.mxu0  ;;  %v1419_v42 = vpop.f32.mrf.mxu1  ;;  %v7080_v33 = vld [vmem:[#allocation5_spill] sm:$0xff]  ;;  %v7090_v46 = vld [vmem:[#allocation15_spill] sm:$0xff] }
 0x537   :  { %3517 = vpow2.f32 %v3249_v48  ;;  %v3250_v39 = vmul.f32 -1.442695, %v1423_v31  ;;  %v3251_v7 = vmul.f32 -1.442695, %v1425_v43  ;;  %v7083_v48 = vld [vmem:[#allocation13_spill] sm:$0xff]  ;;  %v7084_v31 = vld [vmem:[#allocation8_spill] sm:$0xff] }
 0x538   :  { %v1379_v45 = vpop.f32.mrf.mxu0  ;;  %v1420_v40 = vpop.f32.mrf.mxu1  ;;  %v7085_v36 = vld [vmem:[#allocation14_spill] sm:$0xff]  ;;  %v7086_v42 = vld [vmem:[#allocation11_spill] sm:$0xff]  ;;  %v7091_v43 = vld [vmem:[#allocation20_spill] sm:$0xff] }
 0x539   :  { %3519 = vpow2.f32 %v3250_v39  ;;  %v7087_v39 = vld [vmem:[#allocation17_spill] sm:$0xff]  ;;  %v7088_v45 = vld [vmem:[#allocation12_spill] sm:$0xff]  ;;  %v7089_v40 = vld [vmem:[#allocation18_spill] sm:$0xff] }
 0x53a   :  { %3521 = vpow2.f32 %v3251_v7  ;;  %v7093_v7 = vld [vmem:[#allocation21_spill] sm:$0xff] }
 0x544   :  { %v3518_v9 = vpop.eup %3517 }
 0x545   :  { %v1429_v11 = vadd.f32 1.0, %v3518_v9  ;;  %v5105_v9 = vld [vmem:[%s6566_s5 + $0x2c] ss:$16 sps:$4 sm:$0xff]  }
 0x546   :  { %v3520_v13 = vpop.eup %3519  ;;  %7094 = vst [vmem:[#allocation26_spill] sm:$0xff] %v5105_v9 }
 0x547   :  { %3523 = vrcp.f32 %v1429_v11  ;;  %v1435_v14 = vadd.f32 1.0, %v3520_v13  ;;  %v3522_v15 = vpop.eup %3521  ;;  %v5112_v11 = vld [vmem:[%s6566_s5 + $0x28] ss:$16 sps:$4 sm:$0xff]   ;;  %v7097_v13 = vld [vmem:[#allocation22_spill] sm:$0xff] }
 0x548   :  { %3525 = vtanh.f32 %v1424_v10  ;;  %v1442_v19 = vadd.f32 1.0, %v3522_v15  ;;  %v7095_v10 = vld [vmem:[#allocation19_spill] sm:$0xff]  ;;  %7096 = vst [vmem:[#allocation27_spill] sm:$0xff] %v5112_v11 }
 0x549   :  { %3527 = vrcp.f32 %v1435_v14  ;;  %v5119_v14 = vld [vmem:[%s6566_s5 + $0xc] ss:$16 sps:$4 sm:$0xff]  }
 0x54a   :  { %3529 = vrcp.f32 %v1442_v19  ;;  %7098 = vst [vmem:[#allocation28_spill] sm:$0xff] %v5119_v14  ;;  %v7099_v15 = vld [vmem:[#allocation23_spill] sm:$0xff] }
 0x554   :  { %v3524_v16 = vpop.eup %3523 }
 0x555   :  { %v3526_v17 = vpop.eup %3525 }
 0x556   :  { %v3528_v18 = vpop.eup %3527  ;;  %v1446_v20 = vmul.f32 %v3526_v17, %v3524_v16  ;;  %v5126_v16 = vld [vmem:[%s6566_s5 + $0x8] ss:$16 sps:$4 sm:$0xff]   ;;  %v5132_v17 = vld [vmem:[%s6567_s3 + $0xe4] ss:$16 sps:$4 sm:$0xff]  }
 0x557   :  { %v1445_v29 = vmul.f32 %v3528_v18, %v4731_v41  ;;  %v3530_v50 = vpop.eup %3529  ;;  %v7077_v41 = vld [vmem:[#allocation6_spill] sm:$0xff]  ;;  %7100 = vst [vmem:[#allocation29_spill] sm:$0xff] %v5126_v16  ;;  %7101 = vst [vmem:[#allocation30_spill] sm:$0xff] %v5132_v17  ;;  %v5138_v18 = vld [vmem:[%s6567_s3 + $0xec] ss:$16 sps:$4 sm:$0xff]  }
 0x558   :  { %7102 = vst [vmem:[#allocation31_spill] sm:$0xff] %v5138_v18 }
 0x559   :  { %v5070_v52 = vadd.f32 %v1446_v20, %v1445_v29 }
 0x55b   :  { %3531 = vtanh.f32 %v5070_v52 }
 0x568   :  { %v3532_v47 = vpop.eup %3531 }
 0x569   :  { %v1449_v60 = vmul.f32 %v3532_v47, %v3530_v50 }
 0x56b   :  { %v5073_v28 = vpack.c.bf16 %v1449_v60, %v1449_v60 }
 0x56d   :  { %1484 = vmatmul.mubr.bf16.vlgmr.msra.gmra.mxu0 %v5073_v28  ;;  %1525 = vmatmul.mubr.bf16.vlgmr.msra.gmra.mxu1 %v5073_v28 }
 0x56e   :  { %1563 = vmatpush1.bf16.msra.mxu0 %v4741_v53  ;;  %1604 = vmatpush1.bf16.msra.mxu1 %v4747_v62 }
 0x56f   :  { %1564 = vmatprep.subr.bf16.mxu0 %v4753_v55  ;;  %1605 = vmatprep.subr.bf16.mxu1 %v4759_v58 }
 0x570   :  { %1594 = vmatprep.mubr.bf16.mxu0 %v6947_v56  ;;  %1635 = vmatprep.mubr.bf16.mxu1 %v6947_v56 }
 0x572   :  { %1565 = vmatpush1.bf16.msra.mxu0 %v4767_v57  ;;  %1606 = vmatpush1.bf16.msra.mxu1 %v4773_v0 }
 0x573   :  { %1566 = vmatprep.subr.bf16.mxu0 %v7077_v41  ;;  %1607 = vmatprep.subr.bf16.mxu1 %v7078_v3 }
 0x576   :  { %1567 = vmatpush1.bf16.msra.mxu0 %v7079_v4  ;;  %1608 = vmatpush1.bf16.msra.mxu1 %v7080_v33 }
 0x577   :  { %1568 = vmatprep.subr.bf16.mxu0 %v7081_v30  ;;  %1609 = vmatprep.subr.bf16.mxu1 %v7082_v37 }
 0x57a   :  { %1569 = vmatpush1.bf16.msra.mxu0 %v7083_v48  ;;  %1610 = vmatpush1.bf16.msra.mxu1 %v7084_v31 }
 0x57b   :  { %1570 = vmatprep.subr.bf16.mxu0 %v7085_v36  ;;  %1611 = vmatprep.subr.bf16.mxu1 %v7086_v42 }
 0x57e   :  { %1571 = vmatpush1.bf16.msra.mxu0 %v7087_v39  ;;  %1612 = vmatpush1.bf16.msra.mxu1 %v7088_v45 }
 0x57f   :  { %1572 = vmatprep.subr.bf16.mxu0 %v7089_v40  ;;  %1613 = vmatprep.subr.bf16.mxu1 %v7090_v46 }
 0x582   :  { %1573 = vmatpush1.bf16.msra.mxu0 %v7091_v43  ;;  %1614 = vmatpush1.bf16.msra.mxu1 %v7092_v5 }
 0x583   :  { %1574 = vmatprep.subr.bf16.mxu0 %v7093_v7  ;;  %1615 = vmatprep.subr.bf16.mxu1 %v5105_v9 }
 0x586   :  { %1575 = vmatpush1.bf16.msra.mxu0 %v7095_v10  ;;  %1616 = vmatpush1.bf16.msra.mxu1 %v5112_v11 }
 0x587   :  { %1576 = vmatprep.subr.bf16.mxu0 %v7097_v13  ;;  %1617 = vmatprep.subr.bf16.mxu1 %v5119_v14 }
 0x58a   :  { %1577 = vmatpush1.bf16.msra.mxu0 %v7099_v15  ;;  %1618 = vmatpush1.bf16.msra.mxu1 %v5126_v16 }
 0x58b   :  { %1649 = vmatprep.subr.bf16.mxu0 %v5132_v17  ;;  %1690 = vmatprep.subr.bf16.mxu1 %v5138_v18 }
 0x62d   :  { %v1485_v19 = vpop.f32.mrf.mxu0  ;;  %v1526_v20 = vpop.f32.mrf.mxu1 }
 0x62e   :  { %v1486_v29 = vadd.f32 %v1485_v19, %v5049_v23  ;;  %v1527_v19 = vadd.f32 %v1526_v20, %v5051_v24 }
 0x62f   :  { %v1487_v50 = vpop.f32.mrf.mxu0  ;;  %v1528_v47 = vpop.f32.mrf.mxu1 }
 0x630   :  { %v1533_v60 = vadd.f32 %v1486_v29, %v4613_v8  ;;  %v1488_v16 = vadd.f32 %v1487_v50, %v5053_v26  ;;  %v1529_v18 = vadd.f32 %v1528_v47, %v5055_v27  ;;  %v1535_v26 = vadd.f32 %v1527_v19, %v4625_v44  ;;  %v5188_v19 = vld [vmem:[%s6567_s3 + $0x6c] ss:$16 sps:$4 sm:$0xff]  }
 0x631   :  { %v1489_v15 = vpop.f32.mrf.mxu0  ;;  %v1530_v14 = vpop.f32.mrf.mxu1  ;;  %7103 = vst [vmem:[#allocation32_spill] sm:$0xff] %v5188_v19 }
 0x632   :  { %v3252_v17 = vmul.f32 -1.442695, %v1533_v60  ;;  %v1534_v13 = vadd.f32 %v1488_v16, %v4616_v12  ;;  %v1536_v23 = vadd.f32 %v1529_v18, %v4621_v25  ;;  %v5174_v60 = vld [vmem:[%s6567_s3 + $0x8c] ss:$16 sps:$4 sm:$0xff]  }
 0x633   :  { %v1490_v11 = vpop.f32.mrf.mxu0  ;;  %v1531_v10 = vpop.f32.mrf.mxu1 }
 0x634   :  { %3533 = vpow2.f32 %v3252_v17  ;;  %v3253_v9 = vmul.f32 -1.442695, %v1534_v13  ;;  %v3254_v7 = vmul.f32 -1.442695, %v1536_v23  ;;  %v5181_v23 = vld [vmem:[%s6567_s3 + $0x88] ss:$16 sps:$4 sm:$0xff]  }
 0x636   :  { %3535 = vpow2.f32 %v3253_v9 }
 0x637   :  { %3537 = vpow2.f32 %v3254_v7 }
 0x641   :  { %v3534_v29 = vpop.eup %3533 }
 0x642   :  { %v1540_v15 = vadd.f32 1.0, %v3534_v29  ;;  %v5194_v29 = vld [vmem:[%s6567_s3 + $0x60] ss:$16 sps:$4 sm:$0xff]  }
 0x643   :  { %v3536_v14 = vpop.eup %3535  ;;  %7104 = vst [vmem:[#allocation33_spill] sm:$0xff] %v5194_v29 }
 0x644   :  { %3539 = vrcp.f32 %v1540_v15  ;;  %v1546_v16 = vadd.f32 1.0, %v3536_v14  ;;  %v3538_v10 = vpop.eup %3537  ;;  %v5206_v15 = vld [vmem:[%s6567_s3 + $0x44] ss:$16 sps:$4 sm:$0xff]   ;;  %v5212_v14 = vld [vmem:[%s6567_s3 + $0x4c] ss:$16 sps:$4 sm:$0xff]  }
 0x645   :  { %3541 = vtanh.f32 %v1535_v26  ;;  %v1553_v27 = vadd.f32 1.0, %v3538_v10  ;;  %v5200_v26 = vld [vmem:[%s6567_s3 + $0x68] ss:$16 sps:$4 sm:$0xff]   ;;  %7106 = vst [vmem:[#allocation2_spill] sm:$0xff] %v5206_v15  ;;  %7107 = vst [vmem:[#allocation35_spill] sm:$0xff] %v5212_v14 }
 0x646   :  { %3543 = vrcp.f32 %v1546_v16  ;;  %7105 = vst [vmem:[#allocation34_spill] sm:$0xff] %v5200_v26  ;;  %v5218_v16 = vld [vmem:[%s6567_s3 + $0x40] ss:$16 sps:$4 sm:$0xff]   ;;  %v5224_v10 = vld [vmem:[%s6567_s3 + $0x48] ss:$16 sps:$4 sm:$0xff]  }
 0x647   :  { %3545 = vrcp.f32 %v1553_v27  ;;  %7108 = vst [vmem:[#allocation36_spill] sm:$0xff] %v5218_v16  ;;  %7109 = vst [vmem:[#allocation37_spill] sm:$0xff] %v5224_v10  ;;  %v5248_v27 = vld [vmem:[%s6567_s3 + $0x28] ss:$16 sps:$4 sm:$0xff]  }
 0x648   :  { %7113 = vst [vmem:[#allocation41_spill] sm:$0xff] %v5248_v27 }
 0x651   :  { %v3540_v11 = vpop.eup %3539 }
 0x652   :  { %v3542_v9 = vpop.eup %3541 }
 0x653   :  { %v3544_v13 = vpop.eup %3543  ;;  %v1557_v17 = vmul.f32 %v3542_v9, %v3540_v11  ;;  %v5230_v11 = vld [vmem:[%s6567_s3 + $0x24] ss:$16 sps:$4 sm:$0xff]   ;;  %v5236_v9 = vld [vmem:[%s6567_s3 + $0x2c] ss:$16 sps:$4 sm:$0xff]  }
 0x654   :  { %v1556_v18 = vmul.f32 %v3544_v13, %v4911_v6  ;;  %v3546_v20 = vpop.eup %3545  ;;  %v5167_v6 = vld [vmem:[%s6567_s3 + $0xa8] ss:$16 sps:$4 sm:$0xff]   ;;  %7110 = vst [vmem:[#allocation38_spill] sm:$0xff] %v5230_v11  ;;  %7111 = vst [vmem:[#allocation39_spill] sm:$0xff] %v5236_v9  ;;  %v5242_v13 = vld [vmem:[%s6567_s3 + $0x20] ss:$16 sps:$4 sm:$0xff]  }
 0x655   :  { %7112 = vst [vmem:[#allocation40_spill] sm:$0xff] %v5242_v13 }
 0x656   :  { %v5150_v24 = vadd.f32 %v1557_v17, %v1556_v18  ;;  %v5254_v17 = vld [vmem:[%s6567_s3 + $0x4] ss:$16 sps:$4 sm:$0xff]   ;;  %v5260_v18 = vld [vmem:[%s6567_s3 + $0xc] ss:$16 sps:$4 sm:$0xff]  }
 0x657   :  { %7114 = vst [vmem:[#allocation42_spill] sm:$0xff] %v5254_v17  ;;  %7115 = vst [vmem:[#allocation43_spill] sm:$0xff] %v5260_v18 }
 0x658   :  { %3547 = vtanh.f32 %v5150_v24 }
 0x665   :  { %v3548_v50 = vpop.eup %3547 }
 0x666   :  { %v1560_v7 = vmul.f32 %v3548_v50, %v3546_v20  ;;  %v5266_v20 = vld [vmem:[%s6567_s3] ss:$16 sps:$4 sm:$0xff]   ;;  %v5272_v50 = vld [vmem:[%s6567_s3 + $0x8] ss:$16 sps:$4 sm:$0xff]  }
 0x667   :  { %7116 = vst [vmem:[#allocation44_spill] sm:$0xff] %v5266_v20  ;;  %7117 = vst [vmem:[#allocation45_spill] sm:$0xff] %v5272_v50 }
 0x668   :  { %v1561_v47 = vpack.c.bf16 %v1560_v7, %v1560_v7  ;;  %v5278_v7 = vld [vmem:[%s6569_s4 + $0xe4] ss:$16 sps:$4 sm:$0xff]  }
 0x669   :  { %7118 = vst [vmem:[#allocation46_spill] sm:$0xff] %v5278_v7 }
 0x66a   :  { %1595 = vmatmul.mubr.bf16.vlgmr.msra.gmra.mxu0 %v1561_v47  ;;  %1636 = vmatmul.mubr.bf16.vlgmr.msra.gmra.mxu1 %v1561_v47  ;;  %v5284_v47 = vld [vmem:[%s6569_s4 + $0xec] ss:$16 sps:$4 sm:$0xff]  }
 0x66b   :  { %1650 = vmatpush1.bf16.msra.mxu0 %v4917_v38  ;;  %1691 = vmatpush1.bf16.msra.mxu1 %v4923_v1  ;;  %7119 = vst [vmem:[#allocation47_spill] sm:$0xff] %v5284_v47 }
 0x66c   :  { %1651 = vmatprep.subr.bf16.mxu0 %v4929_v59  ;;  %1692 = vmatprep.subr.bf16.mxu1 %v4935_v32 }
 0x66d   :  { %1681 = vmatprep.mubr.bf16.mxu0 %v6947_v56  ;;  %1722 = vmatprep.mubr.bf16.mxu1 %v6947_v56 }
 0x66f   :  { %1652 = vmatpush1.bf16.msra.mxu0 %v4943_v63  ;;  %1693 = vmatpush1.bf16.msra.mxu1 %v4949_v2 }
 0x670   :  { %1653 = vmatprep.subr.bf16.mxu0 %v4955_v34  ;;  %1694 = vmatprep.subr.bf16.mxu1 %v4961_v61 }
 0x673   :  { %1654 = vmatpush1.bf16.msra.mxu0 %v4967_v51  ;;  %1695 = vmatpush1.bf16.msra.mxu1 %v5167_v6 }
 0x674   :  { %1655 = vmatprep.subr.bf16.mxu0 %v4974_v54  ;;  %1696 = vmatprep.subr.bf16.mxu1 %v5174_v60 }
 0x677   :  { %1656 = vmatpush1.bf16.msra.mxu0 %v4981_v35  ;;  %1697 = vmatpush1.bf16.msra.mxu1 %v5181_v23 }
 0x678   :  { %1657 = vmatprep.subr.bf16.mxu0 %v4988_v49  ;;  %1698 = vmatprep.subr.bf16.mxu1 %v5188_v19 }
 0x67b   :  { %1658 = vmatpush1.bf16.msra.mxu0 %v5194_v29  ;;  %1699 = vmatpush1.bf16.msra.mxu1 %v5200_v26  ;;  %v3258_v29 = vld [vmem:[%s6570_s0 + $0x78] sm:$0xff] }
 0x67c   :  { %1659 = vmatprep.subr.bf16.mxu0 %v5206_v15  ;;  %1700 = vmatprep.subr.bf16.mxu1 %v5212_v14 }
 0x67f   :  { %1660 = vmatpush1.bf16.msra.mxu0 %v5218_v16  ;;  %1701 = vmatpush1.bf16.msra.mxu1 %v5224_v10 }
 0x680   :  { %1661 = vmatprep.subr.bf16.mxu0 %v5230_v11  ;;  %1702 = vmatprep.subr.bf16.mxu1 %v5236_v9 }
 0x683   :  { %1662 = vmatpush1.bf16.msra.mxu0 %v5242_v13  ;;  %1703 = vmatpush1.bf16.msra.mxu1 %v5248_v27 }
 0x684   :  { %1663 = vmatprep.subr.bf16.mxu0 %v5254_v17  ;;  %1704 = vmatprep.subr.bf16.mxu1 %v5260_v18 }
 0x687   :  { %1664 = vmatpush1.bf16.msra.mxu0 %v5266_v20  ;;  %1705 = vmatpush1.bf16.msra.mxu1 %v5272_v50  ;;  %v5292_v50 = vld [vmem:[%s6569_s4 + $0xe0] ss:$16 sps:$4 sm:$0xff]  }
 0x688   :  { %1760 = vmatprep.subr.bf16.mxu0 %v5278_v7  ;;  %1801 = vmatprep.subr.bf16.mxu1 %v5284_v47  ;;  %7120 = vst [vmem:[#allocation48_spill] sm:$0xff] %v5292_v50  ;;  %v5298_v7 = vld [vmem:[%s6569_s4 + $0xe8] ss:$16 sps:$4 sm:$0xff]   ;;  %v5304_v47 = vld [vmem:[%s6569_s4 + $0xc4] ss:$16 sps:$4 sm:$0xff]  }
 0x689   :  { %7121 = vst [vmem:[#allocation49_spill] sm:$0xff] %v5298_v7  ;;  %7122 = vst [vmem:[#allocation50_spill] sm:$0xff] %v5304_v47 }
 0x68a   :  { %1682 = vmatmul.mubr.bf16.vlgmr.msra.gmra.mxu0 %v5073_v28  ;;  %1723 = vmatmul.mubr.bf16.vlgmr.msra.gmra.mxu1 %v5073_v28  ;;  %v5310_v28 = vld [vmem:[%s6569_s4 + $0xcc] ss:$16 sps:$4 sm:$0xff]  }
 0x68b   :  { %1761 = vmatpush1.bf16.msra.mxu0 %v5292_v50  ;;  %1802 = vmatpush1.bf16.msra.mxu1 %v5298_v7  ;;  %7123 = vst [vmem:[#allocation51_spill] sm:$0xff] %v5310_v28  ;;  %v5318_v7 = vld [vmem:[%s6569_s4 + $0xc0] ss:$16 sps:$4 sm:$0xff]   ;;  %v5336_v50 = vld [vmem:[%s6569_s4 + $0xac] ss:$16 sps:$4 sm:$0xff]  }
 0x68c   :  { %1762 = vmatprep.subr.bf16.mxu0 %v5304_v47  ;;  %1803 = vmatprep.subr.bf16.mxu1 %v5310_v28  ;;  %7124 = vst [vmem:[#allocation52_spill] sm:$0xff] %v5318_v7  ;;  %v5324_v47 = vld [vmem:[%s6569_s4 + $0xc8] ss:$16 sps:$4 sm:$0xff]   ;;  %v5330_v28 = vld [vmem:[%s6569_s4 + $0xa4] ss:$16 sps:$4 sm:$0xff]   ;;  %7127 = vst [vmem:[#allocation3_spill] sm:$0xff] %v5336_v50 }
 0x68d   :  { %1792 = vmatprep.mubr.bf16.mxu0 %v6947_v56  ;;  %1833 = vmatprep.mubr.bf16.mxu1 %v6947_v56  ;;  %7125 = vst [vmem:[#allocation53_spill] sm:$0xff] %v5324_v47  ;;  %7126 = vst [vmem:[#allocation54_spill] sm:$0xff] %v5330_v28 }
 0x68f   :  { %1763 = vmatpush1.bf16.msra.mxu0 %v5318_v7  ;;  %1804 = vmatpush1.bf16.msra.mxu1 %v5324_v47  ;;  %v5342_v7 = vld [vmem:[%s6569_s4 + $0xa0] ss:$16 sps:$4 sm:$0xff]   ;;  %v5348_v47 = vld [vmem:[%s6569_s4 + $0xa8] ss:$16 sps:$4 sm:$0xff]  }
 0x690   :  { %1764 = vmatprep.subr.bf16.mxu0 %v5330_v28  ;;  %1805 = vmatprep.subr.bf16.mxu1 %v5336_v50  ;;  %7128 = vst [vmem:[#allocation6_spill] sm:$0xff] %v5342_v7  ;;  %7129 = vst [vmem:[#allocation4_spill] sm:$0xff] %v5348_v47  ;;  %v5354_v28 = vld [vmem:[%s6569_s4 + $0x84] ss:$16 sps:$4 sm:$0xff]   ;;  %v5360_v50 = vld [vmem:[%s6569_s4 + $0x8c] ss:$16 sps:$4 sm:$0xff]  }
 0x691   :  { %7130 = vst [vmem:[#allocation9_spill] sm:$0xff] %v5354_v28  ;;  %7131 = vst [vmem:[#allocation5_spill] sm:$0xff] %v5360_v50 }
 0x693   :  { %1765 = vmatpush1.bf16.msra.mxu0 %v5342_v7  ;;  %1806 = vmatpush1.bf16.msra.mxu1 %v5348_v47  ;;  %v5366_v7 = vld [vmem:[%s6569_s4 + $0x80] ss:$16 sps:$4 sm:$0xff]   ;;  %v5372_v47 = vld [vmem:[%s6569_s4 + $0x88] ss:$16 sps:$4 sm:$0xff]  }
 0x694   :  { %1766 = vmatprep.subr.bf16.mxu0 %v5354_v28  ;;  %1807 = vmatprep.subr.bf16.mxu1 %v5360_v50  ;;  %7132 = vst [vmem:[#allocation10_spill] sm:$0xff] %v5366_v7  ;;  %7133 = vst [vmem:[#allocation7_spill] sm:$0xff] %v5372_v47  ;;  %v5378_v28 = vld [vmem:[%s6569_s4 + $0x64] ss:$16 sps:$4 sm:$0xff]   ;;  %v5384_v50 = vld [vmem:[%s6569_s4 + $0x6c] ss:$16 sps:$4 sm:$0xff]  }
 0x695   :  { %7134 = vst [vmem:[#allocation13_spill] sm:$0xff] %v5378_v28  ;;  %7135 = vst [vmem:[#allocation8_spill] sm:$0xff] %v5384_v50 }
 0x697   :  { %1767 = vmatpush1.bf16.msra.mxu0 %v5366_v7  ;;  %1808 = vmatpush1.bf16.msra.mxu1 %v5372_v47  ;;  %v5390_v7 = vld [vmem:[%s6569_s4 + $0x60] ss:$16 sps:$4 sm:$0xff]   ;;  %v5396_v47 = vld [vmem:[%s6569_s4 + $0x68] ss:$16 sps:$4 sm:$0xff]  }
 0x698   :  { %1768 = vmatprep.subr.bf16.mxu0 %v5378_v28  ;;  %1809 = vmatprep.subr.bf16.mxu1 %v5384_v50  ;;  %7136 = vst [vmem:[#allocation14_spill] sm:$0xff] %v5390_v7  ;;  %7137 = vst [vmem:[#allocation11_spill] sm:$0xff] %v5396_v47  ;;  %v5402_v28 = vld [vmem:[%s6569_s4 + $0x44] ss:$16 sps:$4 sm:$0xff]   ;;  %v5408_v50 = vld [vmem:[%s6569_s4 + $0x4c] ss:$16 sps:$4 sm:$0xff]  }
 0x699   :  { %7138 = vst [vmem:[#allocation17_spill] sm:$0xff] %v5402_v28  ;;  %7139 = vst [vmem:[#allocation12_spill] sm:$0xff] %v5408_v50 }
 0x69b   :  { %1769 = vmatpush1.bf16.msra.mxu0 %v5390_v7  ;;  %1810 = vmatpush1.bf16.msra.mxu1 %v5396_v47  ;;  %v5414_v7 = vld [vmem:[%s6569_s4 + $0x40] ss:$16 sps:$4 sm:$0xff]   ;;  %v5420_v47 = vld [vmem:[%s6569_s4 + $0x48] ss:$16 sps:$4 sm:$0xff]  }
 0x69c   :  { %1770 = vmatprep.subr.bf16.mxu0 %v5402_v28  ;;  %1811 = vmatprep.subr.bf16.mxu1 %v5408_v50  ;;  %7140 = vst [vmem:[#allocation18_spill] sm:$0xff] %v5414_v7  ;;  %7141 = vst [vmem:[#allocation15_spill] sm:$0xff] %v5420_v47  ;;  %v5426_v28 = vld [vmem:[%s6569_s4 + $0x24] ss:$16 sps:$4 sm:$0xff]   ;;  %v5432_v50 = vld [vmem:[%s6569_s4 + $0x2c] ss:$16 sps:$4 sm:$0xff]  }
 0x69d   :  { %7142 = vst [vmem:[#allocation20_spill] sm:$0xff] %v5426_v28  ;;  %7143 = vst [vmem:[#allocation16_spill] sm:$0xff] %v5432_v50 }
 0x69f   :  { %1771 = vmatpush1.bf16.msra.mxu0 %v5414_v7  ;;  %1812 = vmatpush1.bf16.msra.mxu1 %v5420_v47  ;;  %v5438_v7 = vld [vmem:[%s6569_s4 + $0x20] ss:$16 sps:$4 sm:$0xff]   ;;  %v5444_v47 = vld [vmem:[%s6569_s4 + $0x28] ss:$16 sps:$4 sm:$0xff]  }
 0x6a0   :  { %1772 = vmatprep.subr.bf16.mxu0 %v5426_v28  ;;  %1813 = vmatprep.subr.bf16.mxu1 %v5432_v50  ;;  %7144 = vst [vmem:[#allocation55_spill] sm:$0xff] %v5438_v7  ;;  %7145 = vst [vmem:[#allocation56_spill] sm:$0xff] %v5444_v47  ;;  %v5450_v28 = vld [vmem:[%s6569_s4 + $0x4] ss:$16 sps:$4 sm:$0xff]   ;;  %v5456_v50 = vld [vmem:[%s6569_s4 + $0xc] ss:$16 sps:$4 sm:$0xff]  }
 0x6a1   :  { %7146 = vst [vmem:[#allocation57_spill] sm:$0xff] %v5450_v28  ;;  %7147 = vst [vmem:[#allocation58_spill] sm:$0xff] %v5456_v50 }
 0x6a3   :  { %1773 = vmatpush1.bf16.msra.mxu0 %v5438_v7  ;;  %1814 = vmatpush1.bf16.msra.mxu1 %v5444_v47  ;;  %v5462_v7 = vld [vmem:[%s6569_s4] ss:$16 sps:$4 sm:$0xff]   ;;  %v5468_v47 = vld [vmem:[%s6569_s4 + $0x8] ss:$16 sps:$4 sm:$0xff]  }
 0x6a4   :  { %1774 = vmatprep.subr.bf16.mxu0 %v5450_v28  ;;  %1815 = vmatprep.subr.bf16.mxu1 %v5456_v50  ;;  %7148 = vst [vmem:[#allocation59_spill] sm:$0xff] %v5462_v7  ;;  %7149 = vst [vmem:[#allocation60_spill] sm:$0xff] %v5468_v47 }
 0x6a7   :  { %1775 = vmatpush1.bf16.msra.mxu0 %v5462_v7  ;;  %1816 = vmatpush1.bf16.msra.mxu1 %v5468_v47  ;;  %v3255_v47 = vld [vmem:[%s6570_s0 + $0x60] sm:$0xff] }
 0x6a8   :  { %1871 = vmatprep.subr.bf16.mxu0 %v7075_v21  ;;  %1912 = vmatprep.subr.bf16.mxu1 %v5046_v22  ;;  %v3256_v22 = vld [vmem:[%s6570_s0 + $0x68] sm:$0xff] }
 0x72a   :  { %v5473_v28 = vpop.f32.mrf.mxu0  ;;  %v5475_v50 = vpop.f32.mrf.mxu1 }
 0x72c   :  { %v5477_v20 = vpop.f32.mrf.mxu0  ;;  %v5479_v18 = vpop.f32.mrf.mxu1 }
 0x72e   :  { %v1600_v7 = vpop.f32.mrf.mxu0  ;;  %v1641_v17 = vpop.f32.mrf.mxu1 }
 0x730   :  { %v1601_v27 = vpop.f32.mrf.mxu0  ;;  %v1642_v13 = vpop.f32.mrf.mxu1 }
 0x74a   :  { %v1683_v9 = vpop.f32.mrf.mxu0  ;;  %v1724_v21 = vpop.f32.mrf.mxu1 }
 0x74b   :  { %v1731_v11 = vadd.f32 %v3255_v47, %v1683_v9  ;;  %v3257_v9 = vld [vmem:[%s6570_s0 + $0x70] sm:$0xff] }
 0x74c   :  { %v1685_v10 = vpop.f32.mrf.mxu0  ;;  %v1726_v16 = vpop.f32.mrf.mxu1 }
 0x74d   :  { %v3259_v14 = vmul.f32 -1.442695, %v1731_v11  ;;  %v1732_v15 = vadd.f32 %v3256_v22, %v1685_v10  ;;  %v1734_v19 = vadd.f32 %v3258_v29, %v1726_v16  ;;  %v1733_v11 = vadd.f32 %v3257_v9, %v1724_v21 }
 0x74e   :  { %v1687_v26 = vpop.f32.mrf.mxu0  ;;  %v1728_v7 = vpop.f32.mrf.mxu1 }
 0x74f   :  { %3549 = vpow2.f32 %v3259_v14  ;;  %v3260_v27 = vmul.f32 -1.442695, %v1732_v15  ;;  %v3261_v47 = vmul.f32 -1.442695, %v1734_v19 }
 0x750   :  { %v1688_v13 = vpop.f32.mrf.mxu0  ;;  %v1729_v17 = vpop.f32.mrf.mxu1 }
 0x751   :  { %3551 = vpow2.f32 %v3260_v27 }
 0x752   :  { %3553 = vpow2.f32 %v3261_v47 }
 0x75c   :  { %v3550_v49 = vpop.eup %3549 }
 0x75d   :  { %v1738_v22 = vadd.f32 1.0, %v3550_v49 }
 0x75e   :  { %v3552_v26 = vpop.eup %3551 }
 0x75f   :  { %3555 = vrcp.f32 %v1738_v22  ;;  %v1744_v15 = vadd.f32 1.0, %v3552_v26  ;;  %v3554_v14 = vpop.eup %3553 }
 0x760   :  { %3557 = vtanh.f32 %v1733_v11  ;;  %v1751_v13 = vadd.f32 1.0, %v3554_v14 }
 0x761   :  { %3559 = vrcp.f32 %v1744_v15 }
 0x762   :  { %3561 = vrcp.f32 %v1751_v13 }
 0x76c   :  { %v3556_v10 = vpop.eup %3555 }
 0x76d   :  { %v3558_v7 = vpop.eup %3557 }
 0x76e   :  { %v3560_v27 = vpop.eup %3559  ;;  %v1755_v29 = vmul.f32 %v3558_v7, %v3556_v10 }
 0x76f   :  { %v1754_v16 = vmul.f32 %v3560_v27, %v5070_v52  ;;  %v3562_v49 = vpop.eup %3561  ;;  %v7156_v52 = vld [vmem:[#allocation23_spill] sm:$0xff] }
 0x771   :  { %v5494_v17 = vadd.f32 %v1755_v29, %v1754_v16 }
 0x773   :  { %3563 = vtanh.f32 %v5494_v17 }
 0x780   :  { %v3564_v19 = vpop.eup %3563 }
 0x781   :  { %v1758_v21 = vmul.f32 %v3564_v19, %v3562_v49 }
 0x783   :  { %v5497_v9 = vpack.c.bf16 %v1758_v21, %v1758_v21 }
 0x785   :  { %1793 = vmatmul.mubr.bf16.vlgmr.msra.gmra.mxu0 %v5497_v9  ;;  %1834 = vmatmul.mubr.bf16.vlgmr.msra.gmra.mxu1 %v5497_v9 }
 0x786   :  { %1872 = vmatpush1.bf16.msra.mxu0 %v4741_v53  ;;  %1913 = vmatpush1.bf16.msra.mxu1 %v4747_v62  ;;  %v7150_v53 = vld [vmem:[#allocation21_spill] sm:$0xff]  ;;  %v7151_v62 = vld [vmem:[#allocation26_spill] sm:$0xff] }
 0x787   :  { %1873 = vmatprep.subr.bf16.mxu0 %v4753_v55  ;;  %1914 = vmatprep.subr.bf16.mxu1 %v4759_v58  ;;  %v7152_v55 = vld [vmem:[#allocation19_spill] sm:$0xff] }
 0x788   :  { %1903 = vmatprep.mubr.bf16.mxu0 %v6947_v56  ;;  %1944 = vmatprep.mubr.bf16.mxu1 %v6947_v56  ;;  %v7153_v58 = vld [vmem:[#allocation27_spill] sm:$0xff] }
 0x78a   :  { %1874 = vmatpush1.bf16.msra.mxu0 %v4767_v57  ;;  %1915 = vmatpush1.bf16.msra.mxu1 %v4773_v0  ;;  %v7154_v57 = vld [vmem:[#allocation22_spill] sm:$0xff]  ;;  %v7155_v0 = vld [vmem:[#allocation28_spill] sm:$0xff] }
 0x78b   :  { %1875 = vmatprep.subr.bf16.mxu0 %v7077_v41  ;;  %1916 = vmatprep.subr.bf16.mxu1 %v7078_v3  ;;  %v7157_v41 = vld [vmem:[#allocation29_spill] sm:$0xff]  ;;  %v7158_v3 = vld [vmem:[#allocation30_spill] sm:$0xff] }
 0x78e   :  { %1876 = vmatpush1.bf16.msra.mxu0 %v7079_v4  ;;  %1917 = vmatpush1.bf16.msra.mxu1 %v7080_v33  ;;  %v7159_v4 = vld [vmem:[#allocation31_spill] sm:$0xff] }
 0x78f   :  { %1877 = vmatprep.subr.bf16.mxu0 %v7081_v30  ;;  %1918 = vmatprep.subr.bf16.mxu1 %v7082_v37 }
 0x792   :  { %1878 = vmatpush1.bf16.msra.mxu0 %v7083_v48  ;;  %1919 = vmatpush1.bf16.msra.mxu1 %v7084_v31 }
 0x793   :  { %1879 = vmatprep.subr.bf16.mxu0 %v7085_v36  ;;  %1920 = vmatprep.subr.bf16.mxu1 %v7086_v42 }
 0x796   :  { %1880 = vmatpush1.bf16.msra.mxu0 %v7087_v39  ;;  %1921 = vmatpush1.bf16.msra.mxu1 %v7088_v45 }
 0x797   :  { %1881 = vmatprep.subr.bf16.mxu0 %v7089_v40  ;;  %1922 = vmatprep.subr.bf16.mxu1 %v7090_v46 }
 0x79a   :  { %1882 = vmatpush1.bf16.msra.mxu0 %v7091_v43  ;;  %1923 = vmatpush1.bf16.msra.mxu1 %v7092_v5 }
 0x79b   :  { %1883 = vmatprep.subr.bf16.mxu0 %v7150_v53  ;;  %1924 = vmatprep.subr.bf16.mxu1 %v7151_v62 }
 0x79e   :  { %1884 = vmatpush1.bf16.msra.mxu0 %v7152_v55  ;;  %1925 = vmatpush1.bf16.msra.mxu1 %v7153_v58 }
 0x79f   :  { %1885 = vmatprep.subr.bf16.mxu0 %v7154_v57  ;;  %1926 = vmatprep.subr.bf16.mxu1 %v7155_v0 }
 0x7a2   :  { %1886 = vmatpush1.bf16.msra.mxu0 %v7156_v52  ;;  %1927 = vmatpush1.bf16.msra.mxu1 %v7157_v41  ;;  %v7172_v52 = vld [vmem:[#allocation42_spill] sm:$0xff] }
 0x7a3   :  { %1958 = vmatprep.subr.bf16.mxu0 %v7158_v3  ;;  %1999 = vmatprep.subr.bf16.mxu1 %v7159_v4 }
 0x845   :  { %v1794_v33 = vpop.f32.mrf.mxu0  ;;  %v1835_v30 = vpop.f32.mrf.mxu1 }
 0x846   :  { %v1795_v37 = vadd.f32 %v1794_v33, %v5473_v28  ;;  %v1836_v22 = vadd.f32 %v1835_v30, %v5475_v50  ;;  %v7173_v33 = vld [vmem:[#allocation43_spill] sm:$0xff]  ;;  %v7174_v30 = vld [vmem:[#allocation44_spill] sm:$0xff] }
 0x847   :  { %v1796_v48 = vpop.f32.mrf.mxu0  ;;  %v1837_v31 = vpop.f32.mrf.mxu1 }
 0x848   :  { %v1842_v36 = vadd.f32 %v1795_v37, %v4613_v8  ;;  %v1797_v42 = vadd.f32 %v1796_v48, %v5477_v20  ;;  %v1838_v11 = vadd.f32 %v1837_v31, %v5479_v18  ;;  %v1844_v20 = vadd.f32 %v1836_v22, %v4625_v44  ;;  %v7175_v37 = vld [vmem:[#allocation45_spill] sm:$0xff]  ;;  %v7176_v48 = vld [vmem:[#allocation46_spill] sm:$0xff]  ;;  %v7177_v31 = vld [vmem:[#allocation47_spill] sm:$0xff] }
 0x849   :  { %v1798_v39 = vpop.f32.mrf.mxu0  ;;  %v1839_v45 = vpop.f32.mrf.mxu1  ;;  %v7190_v22 = vld [vmem:[#allocation10_spill] sm:$0xff] }
 0x84a   :  { %v3262_v40 = vmul.f32 -1.442695, %v1842_v36  ;;  %v1843_v46 = vadd.f32 %v1797_v42, %v4616_v12  ;;  %v1845_v28 = vadd.f32 %v1838_v11, %v4621_v25  ;;  %v7178_v36 = vld [vmem:[#allocation48_spill] sm:$0xff]  ;;  %v7179_v42 = vld [vmem:[#allocation49_spill] sm:$0xff]  ;;  %v7180_v39 = vld [vmem:[#allocation50_spill] sm:$0xff] }
 0x84b   :  { %v1799_v43 = vpop.f32.mrf.mxu0  ;;  %v1840_v5 = vpop.f32.mrf.mxu1  ;;  %v7181_v45 = vld [vmem:[#allocation51_spill] sm:$0xff]  ;;  %v7188_v11 = vld [vmem:[#allocation9_spill] sm:$0xff] }
 0x84c   :  { %3565 = vpow2.f32 %v3262_v40  ;;  %v3263_v47 = vmul.f32 -1.442695, %v1843_v46  ;;  %v3264_v26 = vmul.f32 -1.442695, %v1845_v28  ;;  %v7182_v40 = vld [vmem:[#allocation52_spill] sm:$0xff]  ;;  %v7183_v46 = vld [vmem:[#allocation53_spill] sm:$0xff] }
 0x84d   :  { %v7184_v43 = vld [vmem:[#allocation54_spill] sm:$0xff]  ;;  %v7185_v5 = vld [vmem:[#allocation3_spill] sm:$0xff]  ;;  %v7189_v28 = vld [vmem:[#allocation5_spill] sm:$0xff] }
 0x84e   :  { %3567 = vpow2.f32 %v3263_v47  ;;  %v7187_v47 = vld [vmem:[#allocation4_spill] sm:$0xff] }
 0x84f   :  { %3569 = vpow2.f32 %v3264_v26  ;;  %v7191_v26 = vld [vmem:[#allocation7_spill] sm:$0xff] }
 0x859   :  { %v3566_v15 = vpop.eup %3565 }
 0x85a   :  { %v1849_v14 = vadd.f32 1.0, %v3566_v15  ;;  %v7192_v15 = vld [vmem:[#allocation13_spill] sm:$0xff] }
 0x85b   :  { %v3568_v10 = vpop.eup %3567 }
 0x85c   :  { %3571 = vrcp.f32 %v1849_v14  ;;  %v1855_v7 = vadd.f32 1.0, %v3568_v10  ;;  %v3570_v27 = vpop.eup %3569  ;;  %v7194_v14 = vld [vmem:[#allocation14_spill] sm:$0xff]  ;;  %v7195_v10 = vld [vmem:[#allocation11_spill] sm:$0xff] }
 0x85d   :  { %3573 = vtanh.f32 %v1844_v20  ;;  %v1862_v18 = vadd.f32 1.0, %v3570_v27  ;;  %v7193_v20 = vld [vmem:[#allocation8_spill] sm:$0xff] }
 0x85e   :  { %3575 = vrcp.f32 %v1855_v7  ;;  %v7196_v7 = vld [vmem:[#allocation17_spill] sm:$0xff]  ;;  %v7197_v27 = vld [vmem:[#allocation12_spill] sm:$0xff] }
 0x85f   :  { %3577 = vrcp.f32 %v1862_v18  ;;  %v7201_v18 = vld [vmem:[#allocation16_spill] sm:$0xff] }
 0x869   :  { %v3572_v13 = vpop.eup %3571 }
 0x86a   :  { %v3574_v29 = vpop.eup %3573 }
 0x86b   :  { %v3576_v16 = vpop.eup %3575  ;;  %v1866_v49 = vmul.f32 %v3574_v29, %v3572_v13  ;;  %v7198_v13 = vld [vmem:[#allocation18_spill] sm:$0xff]  ;;  %v7199_v29 = vld [vmem:[#allocation15_spill] sm:$0xff] }
 0x86c   :  { %v1865_v19 = vmul.f32 %v3576_v16, %v5150_v24  ;;  %v3578_v21 = vpop.eup %3577  ;;  %v7171_v24 = vld [vmem:[#allocation41_spill] sm:$0xff]  ;;  %v7200_v16 = vld [vmem:[#allocation20_spill] sm:$0xff] }
 0x86e   :  { %v5544_v50 = vadd.f32 %v1866_v49, %v1865_v19  ;;  %v7202_v49 = vld [vmem:[#allocation55_spill] sm:$0xff]  ;;  %v7203_v19 = vld [vmem:[#allocation56_spill] sm:$0xff] }
 0x870   :  { %3579 = vtanh.f32 %v5544_v50 }
 0x87d   :  { %v3580_v53 = vpop.eup %3579 }
 0x87e   :  { %v1869_v55 = vmul.f32 %v3580_v53, %v3578_v21  ;;  %v7204_v21 = vld [vmem:[#allocation57_spill] sm:$0xff]  ;;  %v7205_v53 = vld [vmem:[#allocation58_spill] sm:$0xff] }
 0x880   :  { %v1870_v57 = vpack.c.bf16 %v1869_v55, %v1869_v55  ;;  %v7206_v55 = vld [vmem:[#allocation59_spill] sm:$0xff] }
 0x882   :  { %1904 = vmatmul.mubr.bf16.vlgmr.msra.gmra.mxu0 %v1870_v57  ;;  %1945 = vmatmul.mubr.bf16.vlgmr.msra.gmra.mxu1 %v1870_v57  ;;  %v7207_v57 = vld [vmem:[#allocation60_spill] sm:$0xff] }
 0x883   :  { %1959 = vmatpush1.bf16.msra.mxu0 %v4917_v38  ;;  %2000 = vmatpush1.bf16.msra.mxu1 %v4923_v1  ;;  %v7160_v38 = vld [vmem:[#allocation24_spill] sm:$0xff] }
 0x884   :  { %1960 = vmatprep.subr.bf16.mxu0 %v4929_v59  ;;  %2001 = vmatprep.subr.bf16.mxu1 %v4935_v32  ;;  %v7161_v1 = vld [vmem:[#allocation32_spill] sm:$0xff]  ;;  %v7162_v59 = vld [vmem:[#allocation33_spill] sm:$0xff]  ;;  %v7163_v32 = vld [vmem:[#allocation34_spill] sm:$0xff] }
 0x885   :  { %1990 = vmatprep.mubr.bf16.mxu0 %v6947_v56  ;;  %2031 = vmatprep.mubr.bf16.mxu1 %v6947_v56 }
 0x887   :  { %1961 = vmatpush1.bf16.msra.mxu0 %v4943_v63  ;;  %2002 = vmatpush1.bf16.msra.mxu1 %v4949_v2  ;;  %v7164_v63 = vld [vmem:[#allocation2_spill] sm:$0xff]  ;;  %v7165_v2 = vld [vmem:[#allocation35_spill] sm:$0xff] }
 0x888   :  { %1962 = vmatprep.subr.bf16.mxu0 %v4955_v34  ;;  %2003 = vmatprep.subr.bf16.mxu1 %v4961_v61  ;;  %v7166_v34 = vld [vmem:[#allocation36_spill] sm:$0xff]  ;;  %v7167_v61 = vld [vmem:[#allocation37_spill] sm:$0xff] }
 0x88b   :  { %1963 = vmatpush1.bf16.msra.mxu0 %v4967_v51  ;;  %2004 = vmatpush1.bf16.msra.mxu1 %v5167_v6  ;;  %v7168_v51 = vld [vmem:[#allocation38_spill] sm:$0xff] }
 0x88c   :  { %1964 = vmatprep.subr.bf16.mxu0 %v4974_v54  ;;  %2005 = vmatprep.subr.bf16.mxu1 %v5174_v60  ;;  %v7169_v54 = vld [vmem:[#allocation39_spill] sm:$0xff] }
 0x88f   :  { %1965 = vmatpush1.bf16.msra.mxu0 %v4981_v35  ;;  %2006 = vmatpush1.bf16.msra.mxu1 %v5181_v23  ;;  %v7170_v35 = vld [vmem:[#allocation40_spill] sm:$0xff] }
 0x890   :  { %1966 = vmatprep.subr.bf16.mxu0 %v7160_v38  ;;  %2007 = vmatprep.subr.bf16.mxu1 %v7161_v1  ;;  %v5618_v38 = vld [vmem:[%s6566_s5 + $0xe4] ss:$16 sps:$4 sm:$0xff]  }
 0x891   :  { %7208 = vst [vmem:[#allocation21_spill] sm:$0xff] %v5618_v38 }
 0x893   :  { %1967 = vmatpush1.bf16.msra.mxu0 %v7162_v59  ;;  %2008 = vmatpush1.bf16.msra.mxu1 %v7163_v32 }
 0x894   :  { %1968 = vmatprep.subr.bf16.mxu0 %v7164_v63  ;;  %2009 = vmatprep.subr.bf16.mxu1 %v7165_v2 }
 0x897   :  { %1969 = vmatpush1.bf16.msra.mxu0 %v7166_v34  ;;  %2010 = vmatpush1.bf16.msra.mxu1 %v7167_v61 }
 0x898   :  { %1970 = vmatprep.subr.bf16.mxu0 %v7168_v51  ;;  %2011 = vmatprep.subr.bf16.mxu1 %v7169_v54 }
 0x89b   :  { %1971 = vmatpush1.bf16.msra.mxu0 %v7170_v35  ;;  %2012 = vmatpush1.bf16.msra.mxu1 %v7171_v24 }
 0x89c   :  { %1972 = vmatprep.subr.bf16.mxu0 %v7172_v52  ;;  %2013 = vmatprep.subr.bf16.mxu1 %v7173_v33 }
 0x89f   :  { %1973 = vmatpush1.bf16.msra.mxu0 %v7174_v30  ;;  %2014 = vmatpush1.bf16.msra.mxu1 %v7175_v37 }
 0x8a0   :  { %2069 = vmatprep.subr.bf16.mxu0 %v7176_v48  ;;  %2110 = vmatprep.subr.bf16.mxu1 %v7177_v31 }
 0x8a2   :  { %1991 = vmatmul.mubr.bf16.vlgmr.msra.gmra.mxu0 %v5497_v9  ;;  %2032 = vmatmul.mubr.bf16.vlgmr.msra.gmra.mxu1 %v5497_v9  ;;  %v7186_v9 = vld [vmem:[#allocation6_spill] sm:$0xff] }
 0x8a3   :  { %2070 = vmatpush1.bf16.msra.mxu0 %v7178_v36  ;;  %2111 = vmatpush1.bf16.msra.mxu1 %v7179_v42 }
 0x8a4   :  { %2071 = vmatprep.subr.bf16.mxu0 %v7180_v39  ;;  %2112 = vmatprep.subr.bf16.mxu1 %v7181_v45 }
 0x8a5   :  { %2101 = vmatprep.mubr.bf16.mxu0 %v6947_v56  ;;  %2142 = vmatprep.mubr.bf16.mxu1 %v6947_v56 }
 0x8a7   :  { %2072 = vmatpush1.bf16.msra.mxu0 %v7182_v40  ;;  %2113 = vmatpush1.bf16.msra.mxu1 %v7183_v46 }
 0x8a8   :  { %2073 = vmatprep.subr.bf16.mxu0 %v7184_v43  ;;  %2114 = vmatprep.subr.bf16.mxu1 %v7185_v5 }
 0x8ab   :  { %2074 = vmatpush1.bf16.msra.mxu0 %v7186_v9  ;;  %2115 = vmatpush1.bf16.msra.mxu1 %v7187_v47 }
 0x8ac   :  { %2075 = vmatprep.subr.bf16.mxu0 %v7188_v11  ;;  %2116 = vmatprep.subr.bf16.mxu1 %v7189_v28 }
 0x8af   :  { %2076 = vmatpush1.bf16.msra.mxu0 %v7190_v22  ;;  %2117 = vmatpush1.bf16.msra.mxu1 %v7191_v26  ;;  %v3268_v22 = vld [vmem:[%s6570_s0 + $0x98] sm:$0xff] }
 0x8b0   :  { %2077 = vmatprep.subr.bf16.mxu0 %v7192_v15  ;;  %2118 = vmatprep.subr.bf16.mxu1 %v7193_v20 }
 0x8b3   :  { %2078 = vmatpush1.bf16.msra.mxu0 %v7194_v14  ;;  %2119 = vmatpush1.bf16.msra.mxu1 %v7195_v10 }
 0x8b4   :  { %2079 = vmatprep.subr.bf16.mxu0 %v7196_v7  ;;  %2120 = vmatprep.subr.bf16.mxu1 %v7197_v27 }
 0x8b7   :  { %2080 = vmatpush1.bf16.msra.mxu0 %v7198_v13  ;;  %2121 = vmatpush1.bf16.msra.mxu1 %v7199_v29  ;;  %v3265_v13 = vld [vmem:[%s6570_s0 + $0x80] sm:$0xff] }
 0x8b8   :  { %2081 = vmatprep.subr.bf16.mxu0 %v7200_v16  ;;  %2122 = vmatprep.subr.bf16.mxu1 %v7201_v18  ;;  %v7209_v18 = vld [vmem:[#allocation25_spill] sm:$0xff] }
 0x8bb   :  { %2082 = vmatpush1.bf16.msra.mxu0 %v7202_v49  ;;  %2123 = vmatpush1.bf16.msra.mxu1 %v7203_v19 }
 0x8bc   :  { %2083 = vmatprep.subr.bf16.mxu0 %v7204_v21  ;;  %2124 = vmatprep.subr.bf16.mxu1 %v7205_v53 }
 0x8bf   :  { %2084 = vmatpush1.bf16.msra.mxu0 %v7206_v55  ;;  %2125 = vmatpush1.bf16.msra.mxu1 %v7207_v57 }
 0x8c0   :  { %2180 = vmatprep.subr.bf16.mxu0 %v5618_v38  ;;  %2221 = vmatprep.subr.bf16.mxu1 %v7209_v18  ;;  %v3266_v18 = vld [vmem:[%s6570_s0 + $0x88] sm:$0xff] }
 0x942   :  { %v5622_v49 = vpop.f32.mrf.mxu0  ;;  %v5624_v19 = vpop.f32.mrf.mxu1 }
 0x944   :  { %v5626_v21 = vpop.f32.mrf.mxu0  ;;  %v5628_v53 = vpop.f32.mrf.mxu1 }
 0x946   :  { %v1909_v55 = vpop.f32.mrf.mxu0  ;;  %v1950_v16 = vpop.f32.mrf.mxu1 }
 0x948   :  { %v1910_v57 = vpop.f32.mrf.mxu0  ;;  %v1951_v29 = vpop.f32.mrf.mxu1 }
 0x962   :  { %v1992_v27 = vpop.f32.mrf.mxu0  ;;  %v2033_v38 = vpop.f32.mrf.mxu1 }
 0x963   :  { %v2040_v7 = vadd.f32 %v3265_v13, %v1992_v27  ;;  %v3267_v27 = vld [vmem:[%s6570_s0 + $0x90] sm:$0xff] }
 0x964   :  { %v1994_v10 = vpop.f32.mrf.mxu0  ;;  %v2035_v14 = vpop.f32.mrf.mxu1 }
 0x965   :  { %v3269_v20 = vmul.f32 -1.442695, %v2040_v7  ;;  %v2041_v15 = vadd.f32 %v3266_v18, %v1994_v10  ;;  %v2043_v28 = vadd.f32 %v3268_v22, %v2035_v14  ;;  %v2042_v7 = vadd.f32 %v3267_v27, %v2033_v38 }
 0x966   :  { %v1996_v26 = vpop.f32.mrf.mxu0  ;;  %v2037_v55 = vpop.f32.mrf.mxu1 }
 0x967   :  { %3581 = vpow2.f32 %v3269_v20  ;;  %v3270_v16 = vmul.f32 -1.442695, %v2041_v15  ;;  %v3271_v13 = vmul.f32 -1.442695, %v2043_v28 }
 0x968   :  { %v1997_v29 = vpop.f32.mrf.mxu0  ;;  %v2038_v57 = vpop.f32.mrf.mxu1 }
 0x969   :  { %3583 = vpow2.f32 %v3270_v16 }
 0x96a   :  { %3585 = vpow2.f32 %v3271_v13  ;;  %v5653_v13 = vld [vmem:[%s6566_s5 + $0xe0] ss:$16 sps:$4 sm:$0xff]  }
 0x974   :  { %v3582_v11 = vpop.eup %3581 }
 0x975   :  { %v2047_v10 = vadd.f32 1.0, %v3582_v11 }
 0x976   :  { %v3584_v26 = vpop.eup %3583 }
 0x977   :  { %3587 = vrcp.f32 %v2047_v10  ;;  %v2053_v15 = vadd.f32 1.0, %v3584_v26  ;;  %v3586_v20 = vpop.eup %3585  ;;  %v5671_v10 = vld [vmem:[%s6566_s5 + $0xcc] ss:$16 sps:$4 sm:$0xff]   ;;  %v5679_v26 = vld [vmem:[%s6566_s5 + $0xc0] ss:$16 sps:$4 sm:$0xff]  }
 0x978   :  { %3589 = vtanh.f32 %v2042_v7  ;;  %v2060_v29 = vadd.f32 1.0, %v3586_v20  ;;  %v5665_v7 = vld [vmem:[%s6566_s5 + $0xc4] ss:$16 sps:$4 sm:$0xff]  }
 0x979   :  { %3591 = vrcp.f32 %v2053_v15  ;;  %v5685_v15 = vld [vmem:[%s6566_s5 + $0xc8] ss:$16 sps:$4 sm:$0xff]   ;;  %v5691_v20 = vld [vmem:[%s6566_s5 + $0xa4] ss:$16 sps:$4 sm:$0xff]  }
 0x97a   :  { %3593 = vrcp.f32 %v2060_v29  ;;  %7210 = vst [vmem:[#allocation26_spill] sm:$0xff] %v5691_v20  ;;  %v5715_v29 = vld [vmem:[%s6566_s5 + $0x84] ss:$16 sps:$4 sm:$0xff]  }
 0x97b   :  { %7214 = vst [vmem:[#allocation28_spill] sm:$0xff] %v5715_v29 }
 0x984   :  { %v3588_v18 = vpop.eup %3587 }
 0x985   :  { %v3590_v55 = vpop.eup %3589 }
 0x986   :  { %v3592_v16 = vpop.eup %3591  ;;  %v2064_v22 = vmul.f32 %v3590_v55, %v3588_v18  ;;  %v5697_v18 = vld [vmem:[%s6566_s5 + $0xac] ss:$16 sps:$4 sm:$0xff]   ;;  %v5703_v55 = vld [vmem:[%s6566_s5 + $0xa0] ss:$16 sps:$4 sm:$0xff]  }
 0x987   :  { %v2063_v14 = vmul.f32 %v3592_v16, %v5494_v17  ;;  %v3594_v11 = vpop.eup %3593  ;;  %v5659_v17 = vld [vmem:[%s6566_s5 + $0xe8] ss:$16 sps:$4 sm:$0xff]   ;;  %7211 = vst [vmem:[#allocation19_spill] sm:$0xff] %v5697_v18  ;;  %7212 = vst [vmem:[#allocation27_spill] sm:$0xff] %v5703_v55 }
 0x988   :  { %v5709_v16 = vld [vmem:[%s6566_s5 + $0xa8] ss:$16 sps:$4 sm:$0xff]  }
 0x989   :  { %v5643_v57 = vadd.f32 %v2064_v22, %v2063_v14  ;;  %7213 = vst [vmem:[#allocation22_spill] sm:$0xff] %v5709_v16  ;;  %v5721_v22 = vld [vmem:[%s6566_s5 + $0x8c] ss:$16 sps:$4 sm:$0xff]   ;;  %v5727_v14 = vld [vmem:[%s6566_s5 + $0x80] ss:$16 sps:$4 sm:$0xff]  }
 0x98a   :  { %7215 = vst [vmem:[#allocation23_spill] sm:$0xff] %v5721_v22  ;;  %7216 = vst [vmem:[#allocation29_spill] sm:$0xff] %v5727_v14 }
 0x98b   :  { %3595 = vtanh.f32 %v5643_v57 }
 0x998   :  { %v3596_v28 = vpop.eup %3595 }
 0x999   :  { %v2067_v38 = vmul.f32 %v3596_v28, %v3594_v11  ;;  %v5733_v11 = vld [vmem:[%s6566_s5 + $0x88] ss:$16 sps:$4 sm:$0xff]   ;;  %v5739_v28 = vld [vmem:[%s6566_s5 + $0x64] ss:$16 sps:$4 sm:$0xff]  }
 0x99a   :  { %7217 = vst [vmem:[#allocation30_spill] sm:$0xff] %v5733_v11  ;;  %7218 = vst [vmem:[#allocation31_spill] sm:$0xff] %v5739_v28 }
 0x99b   :  { %v5646_v27 = vpack.c.bf16 %v2067_v38, %v2067_v38  ;;  %v5745_v38 = vld [vmem:[%s6566_s5 + $0x6c] ss:$16 sps:$4 sm:$0xff]  }
 0x99c   :  { %7219 = vst [vmem:[#allocation24_spill] sm:$0xff] %v5745_v38 }
 0x99d   :  { %2102 = vmatmul.mubr.bf16.vlgmr.msra.gmra.mxu0 %v5646_v27  ;;  %2143 = vmatmul.mubr.bf16.vlgmr.msra.gmra.mxu1 %v5646_v27 }
 0x99e   :  { %2181 = vmatpush1.bf16.msra.mxu0 %v5653_v13  ;;  %2222 = vmatpush1.bf16.msra.mxu1 %v5659_v17 }
 0x99f   :  { %2182 = vmatprep.subr.bf16.mxu0 %v5665_v7  ;;  %2223 = vmatprep.subr.bf16.mxu1 %v5671_v10 }
 0x9a0   :  { %2212 = vmatprep.mubr.bf16.mxu0 %v6947_v56  ;;  %2253 = vmatprep.mubr.bf16.mxu1 %v6947_v56 }
 0x9a2   :  { %2183 = vmatpush1.bf16.msra.mxu0 %v5679_v26  ;;  %2224 = vmatpush1.bf16.msra.mxu1 %v5685_v15 }
 0x9a3   :  { %2184 = vmatprep.subr.bf16.mxu0 %v5691_v20  ;;  %2225 = vmatprep.subr.bf16.mxu1 %v5697_v18 }
 0x9a6   :  { %2185 = vmatpush1.bf16.msra.mxu0 %v5703_v55  ;;  %2226 = vmatpush1.bf16.msra.mxu1 %v5709_v16 }
 0x9a7   :  { %2186 = vmatprep.subr.bf16.mxu0 %v5715_v29  ;;  %2227 = vmatprep.subr.bf16.mxu1 %v5721_v22 }
 0x9aa   :  { %2187 = vmatpush1.bf16.msra.mxu0 %v5727_v14  ;;  %2228 = vmatpush1.bf16.msra.mxu1 %v5733_v11  ;;  %v5751_v14 = vld [vmem:[%s6566_s5 + $0x60] ss:$16 sps:$4 sm:$0xff]   ;;  %v5757_v11 = vld [vmem:[%s6566_s5 + $0x68] ss:$16 sps:$4 sm:$0xff]  }
 0x9ab   :  { %2188 = vmatprep.subr.bf16.mxu0 %v5739_v28  ;;  %2229 = vmatprep.subr.bf16.mxu1 %v5745_v38  ;;  %7220 = vst [vmem:[#allocation32_spill] sm:$0xff] %v5751_v14  ;;  %7221 = vst [vmem:[#allocation33_spill] sm:$0xff] %v5757_v11  ;;  %v5763_v28 = vld [vmem:[%s6566_s5 + $0x44] ss:$16 sps:$4 sm:$0xff]   ;;  %v5769_v38 = vld [vmem:[%s6566_s5 + $0x4c] ss:$16 sps:$4 sm:$0xff]  }
 0x9ac   :  { %7222 = vst [vmem:[#allocation34_spill] sm:$0xff] %v5763_v28  ;;  %7223 = vst [vmem:[#allocation2_spill] sm:$0xff] %v5769_v38 }
 0x9ae   :  { %2189 = vmatpush1.bf16.msra.mxu0 %v5751_v14  ;;  %2230 = vmatpush1.bf16.msra.mxu1 %v5757_v11  ;;  %v5775_v14 = vld [vmem:[%s6566_s5 + $0x40] ss:$16 sps:$4 sm:$0xff]   ;;  %v5781_v11 = vld [vmem:[%s6566_s5 + $0x48] ss:$16 sps:$4 sm:$0xff]  }
 0x9af   :  { %2190 = vmatprep.subr.bf16.mxu0 %v5763_v28  ;;  %2231 = vmatprep.subr.bf16.mxu1 %v5769_v38  ;;  %7224 = vst [vmem:[#allocation35_spill] sm:$0xff] %v5775_v14  ;;  %7225 = vst [vmem:[#allocation36_spill] sm:$0xff] %v5781_v11  ;;  %v5787_v28 = vld [vmem:[%s6566_s5 + $0x24] ss:$16 sps:$4 sm:$0xff]  }
 0x9b0   :  { %7226 = vst [vmem:[#allocation37_spill] sm:$0xff] %v5787_v28 }
 0x9b2   :  { %2191 = vmatpush1.bf16.msra.mxu0 %v5775_v14  ;;  %2232 = vmatpush1.bf16.msra.mxu1 %v5781_v11  ;;  %v5794_v14 = vld [vmem:[%s6566_s5 + $0x20] ss:$16 sps:$4 sm:$0xff]   ;;  %v5801_v11 = vld [vmem:[%s6566_s5 + $0x4] ss:$16 sps:$4 sm:$0xff]  }
 0x9b3   :  { %2192 = vmatprep.subr.bf16.mxu0 %v5787_v28  ;;  %2233 = vmatprep.subr.bf16.mxu1 %v7151_v62  ;;  %7227 = vst [vmem:[#allocation38_spill] sm:$0xff] %v5794_v14  ;;  %7228 = vst [vmem:[#allocation39_spill] sm:$0xff] %v5801_v11  ;;  %v5808_v62 = vld [vmem:[%s6566_s5] ss:$16 sps:$4 sm:$0xff]  }
 0x9b4   :  { %7229 = vst [vmem:[#allocation40_spill] sm:$0xff] %v5808_v62 }
 0x9b6   :  { %2193 = vmatpush1.bf16.msra.mxu0 %v5794_v14  ;;  %2234 = vmatpush1.bf16.msra.mxu1 %v7153_v58 }
 0x9b7   :  { %2194 = vmatprep.subr.bf16.mxu0 %v5801_v11  ;;  %2235 = vmatprep.subr.bf16.mxu1 %v7155_v0 }
 0x9ba   :  { %2195 = vmatpush1.bf16.msra.mxu0 %v5808_v62  ;;  %2236 = vmatpush1.bf16.msra.mxu1 %v7157_v41 }
 0x9bb   :  { %2267 = vmatprep.subr.bf16.mxu0 %v7158_v3  ;;  %2308 = vmatprep.subr.bf16.mxu1 %v7159_v4 }
 0xa5d   :  { %v2103_v58 = vpop.f32.mrf.mxu0  ;;  %v2144_v14 = vpop.f32.mrf.mxu1 }
 0xa5e   :  { %v2104_v28 = vadd.f32 %v2103_v58, %v5622_v49  ;;  %v2145_v58 = vadd.f32 %v2144_v14, %v5624_v19 }
 0xa5f   :  { %v2105_v11 = vpop.f32.mrf.mxu0  ;;  %v2146_v38 = vpop.f32.mrf.mxu1 }
 0xa60   :  { %v2151_v0 = vadd.f32 %v2104_v28, %v4613_v8  ;;  %v2106_v22 = vadd.f32 %v2105_v11, %v5626_v21  ;;  %v2147_v4 = vadd.f32 %v2146_v38, %v5628_v53  ;;  %v2153_v21 = vadd.f32 %v2145_v58, %v4625_v44  ;;  %v5847_v58 = vld [vmem:[%s6567_s3 + $0xcc] ss:$16 sps:$4 sm:$0xff]  }
 0xa61   :  { %v2107_v29 = vpop.f32.mrf.mxu0  ;;  %v2148_v16 = vpop.f32.mrf.mxu1 }
 0xa62   :  { %v3272_v55 = vmul.f32 -1.442695, %v2151_v0  ;;  %v2152_v62 = vadd.f32 %v2106_v22, %v4616_v12  ;;  %v2154_v49 = vadd.f32 %v2147_v4, %v4621_v25  ;;  %v5829_v4 = vld [vmem:[%s6567_s3 + $0xe0] ss:$16 sps:$4 sm:$0xff]  }
 0xa63   :  { %v2108_v41 = vpop.f32.mrf.mxu0  ;;  %v2149_v18 = vpop.f32.mrf.mxu1 }
 0xa64   :  { %3597 = vpow2.f32 %v3272_v55  ;;  %v3273_v3 = vmul.f32 -1.442695, %v2152_v62  ;;  %v3274_v20 = vmul.f32 -1.442695, %v2154_v49  ;;  %v5841_v49 = vld [vmem:[%s6567_s3 + $0xc4] ss:$16 sps:$4 sm:$0xff]  }
 0xa66   :  { %3599 = vpow2.f32 %v3273_v3 }
 0xa67   :  { %3601 = vpow2.f32 %v3274_v20 }
 0xa71   :  { %v3598_v28 = vpop.eup %3597 }
 0xa72   :  { %v2158_v29 = vadd.f32 1.0, %v3598_v28  ;;  %v5855_v28 = vld [vmem:[%s6567_s3 + $0xc0] ss:$16 sps:$4 sm:$0xff]  }
 0xa73   :  { %v3600_v16 = vpop.eup %3599 }
 0xa74   :  { %3603 = vrcp.f32 %v2158_v29  ;;  %v2164_v22 = vadd.f32 1.0, %v3600_v16  ;;  %v3602_v18 = vpop.eup %3601  ;;  %v5867_v29 = vld [vmem:[%s6567_s3 + $0xa4] ss:$16 sps:$4 sm:$0xff]   ;;  %v5873_v16 = vld [vmem:[%s6567_s3 + $0xac] ss:$16 sps:$4 sm:$0xff]  }
 0xa75   :  { %3605 = vtanh.f32 %v2153_v21  ;;  %v2171_v53 = vadd.f32 1.0, %v3602_v18  ;;  %v5861_v21 = vld [vmem:[%s6567_s3 + $0xc8] ss:$16 sps:$4 sm:$0xff]   ;;  %v5886_v18 = vld [vmem:[%s6567_s3 + $0x84] ss:$16 sps:$4 sm:$0xff]  }
 0xa76   :  { %3607 = vrcp.f32 %v2164_v22  ;;  %v5879_v22 = vld [vmem:[%s6567_s3 + $0xa0] ss:$16 sps:$4 sm:$0xff]  }
 0xa77   :  { %3609 = vrcp.f32 %v2171_v53 }
 0xa81   :  { %v3604_v55 = vpop.eup %3603 }
 0xa82   :  { %v3606_v11 = vpop.eup %3605 }
 0xa83   :  { %v3608_v62 = vpop.eup %3607  ;;  %v2175_v38 = vmul.f32 %v3606_v11, %v3604_v55  ;;  %v5893_v55 = vld [vmem:[%s6567_s3 + $0x80] ss:$16 sps:$4 sm:$0xff]  }
 0xa84   :  { %v2174_v0 = vmul.f32 %v3608_v62, %v5544_v50  ;;  %v3610_v14 = vpop.eup %3609  ;;  %v5835_v50 = vld [vmem:[%s6567_s3 + $0xe8] ss:$16 sps:$4 sm:$0xff]   ;;  %v3275_v11 = vld [vmem:[%s6570_s0 + $0xa0] sm:$0xff] }
 0xa86   :  { %v5823_v19 = vadd.f32 %v2175_v38, %v2174_v0  ;;  %v3276_v38 = vld [vmem:[%s6570_s0 + $0xa8] sm:$0xff] }
 0xa88   :  { %3611 = vtanh.f32 %v5823_v19 }
 0xa95   :  { %v3612_v41 = vpop.eup %3611 }
 0xa96   :  { %v2178_v20 = vmul.f32 %v3612_v41, %v3610_v14 }
 0xa98   :  { %v2179_v3 = vpack.c.bf16 %v2178_v20, %v2178_v20 }
 0xa9a   :  { %2213 = vmatmul.mubr.bf16.vlgmr.msra.gmra.mxu0 %v2179_v3  ;;  %2254 = vmatmul.mubr.bf16.vlgmr.msra.gmra.mxu1 %v2179_v3 }
 0xa9b   :  { %2268 = vmatpush1.bf16.msra.mxu0 %v5829_v4  ;;  %2309 = vmatpush1.bf16.msra.mxu1 %v5835_v50 }
 0xa9c   :  { %2269 = vmatprep.subr.bf16.mxu0 %v5841_v49  ;;  %2310 = vmatprep.subr.bf16.mxu1 %v5847_v58 }
 0xa9d   :  { %2299 = vmatprep.mubr.bf16.mxu0 %v6947_v56  ;;  %2340 = vmatprep.mubr.bf16.mxu1 %v6947_v56 }
 0xa9f   :  { %2270 = vmatpush1.bf16.msra.mxu0 %v5855_v28  ;;  %2311 = vmatpush1.bf16.msra.mxu1 %v5861_v21 }
 0xaa0   :  { %2271 = vmatprep.subr.bf16.mxu0 %v5867_v29  ;;  %2312 = vmatprep.subr.bf16.mxu1 %v5873_v16 }
 0xaa3   :  { %2272 = vmatpush1.bf16.msra.mxu0 %v5879_v22  ;;  %2313 = vmatpush1.bf16.msra.mxu1 %v5167_v6  ;;  %v5900_v6 = vld [vmem:[%s6567_s3 + $0x64] ss:$16 sps:$4 sm:$0xff]  }
 0xaa4   :  { %2273 = vmatprep.subr.bf16.mxu0 %v5886_v18  ;;  %2314 = vmatprep.subr.bf16.mxu1 %v5174_v60  ;;  %7230 = vst [vmem:[#allocation41_spill] sm:$0xff] %v5900_v6  ;;  %v7231_v60 = vld [vmem:[#allocation9_spill] sm:$0xff] }
 0xaa7   :  { %2274 = vmatpush1.bf16.msra.mxu0 %v5893_v55  ;;  %2315 = vmatpush1.bf16.msra.mxu1 %v5181_v23  ;;  %v7232_v23 = vld [vmem:[#allocation5_spill] sm:$0xff] }
 0xaa8   :  { %2275 = vmatprep.subr.bf16.mxu0 %v5900_v6  ;;  %2316 = vmatprep.subr.bf16.mxu1 %v7161_v1  ;;  %v7233_v1 = vld [vmem:[#allocation10_spill] sm:$0xff] }
 0xaab   :  { %2276 = vmatpush1.bf16.msra.mxu0 %v7162_v59  ;;  %2317 = vmatpush1.bf16.msra.mxu1 %v7163_v32  ;;  %v7234_v59 = vld [vmem:[#allocation7_spill] sm:$0xff]  ;;  %v7235_v32 = vld [vmem:[#allocation13_spill] sm:$0xff] }
 0xaac   :  { %2277 = vmatprep.subr.bf16.mxu0 %v7164_v63  ;;  %2318 = vmatprep.subr.bf16.mxu1 %v7165_v2  ;;  %v7236_v63 = vld [vmem:[#allocation8_spill] sm:$0xff]  ;;  %v7237_v2 = vld [vmem:[#allocation14_spill] sm:$0xff] }
 0xaaf   :  { %2278 = vmatpush1.bf16.msra.mxu0 %v7166_v34  ;;  %2319 = vmatpush1.bf16.msra.mxu1 %v7167_v61  ;;  %v7238_v34 = vld [vmem:[#allocation11_spill] sm:$0xff]  ;;  %v7239_v61 = vld [vmem:[#allocation17_spill] sm:$0xff] }
 0xab0   :  { %2279 = vmatprep.subr.bf16.mxu0 %v7168_v51  ;;  %2320 = vmatprep.subr.bf16.mxu1 %v7169_v54  ;;  %v7240_v51 = vld [vmem:[#allocation12_spill] sm:$0xff]  ;;  %v7241_v54 = vld [vmem:[#allocation18_spill] sm:$0xff] }
 0xab3   :  { %2280 = vmatpush1.bf16.msra.mxu0 %v7170_v35  ;;  %2321 = vmatpush1.bf16.msra.mxu1 %v7171_v24  ;;  %v7242_v35 = vld [vmem:[#allocation15_spill] sm:$0xff]  ;;  %v7243_v24 = vld [vmem:[#allocation20_spill] sm:$0xff] }
 0xab4   :  { %2281 = vmatprep.subr.bf16.mxu0 %v7172_v52  ;;  %2322 = vmatprep.subr.bf16.mxu1 %v7173_v33  ;;  %v7244_v52 = vld [vmem:[#allocation16_spill] sm:$0xff]  ;;  %v7245_v33 = vld [vmem:[#allocation55_spill] sm:$0xff] }
 0xab7   :  { %2282 = vmatpush1.bf16.msra.mxu0 %v7174_v30  ;;  %2323 = vmatpush1.bf16.msra.mxu1 %v7175_v37  ;;  %v7246_v30 = vld [vmem:[#allocation56_spill] sm:$0xff]  ;;  %v7247_v37 = vld [vmem:[#allocation57_spill] sm:$0xff] }
 0xab8   :  { %2378 = vmatprep.subr.bf16.mxu0 %v7176_v48  ;;  %2419 = vmatprep.subr.bf16.mxu1 %v7177_v31  ;;  %v7248_v48 = vld [vmem:[#allocation58_spill] sm:$0xff]  ;;  %v7249_v31 = vld [vmem:[#allocation59_spill] sm:$0xff] }
 0xaba   :  { %2300 = vmatmul.mubr.bf16.vlgmr.msra.gmra.mxu0 %v5646_v27  ;;  %2341 = vmatmul.mubr.bf16.vlgmr.msra.gmra.mxu1 %v5646_v27 }
 0xabb   :  { %2379 = vmatpush1.bf16.msra.mxu0 %v7178_v36  ;;  %2420 = vmatpush1.bf16.msra.mxu1 %v7179_v42  ;;  %v7250_v36 = vld [vmem:[#allocation60_spill] sm:$0xff]  ;;  %v7251_v42 = vld [vmem:[#allocation21_spill] sm:$0xff] }
 0xabc   :  { %2380 = vmatprep.subr.bf16.mxu0 %v7180_v39  ;;  %2421 = vmatprep.subr.bf16.mxu1 %v7181_v45  ;;  %v5958_v39 = vld [vmem:[%s6566_s5 + $0xec] ss:$16 sps:$4 sm:$0xff]  }
 0xabd   :  { %2410 = vmatprep.mubr.bf16.mxu0 %v6947_v56  ;;  %2451 = vmatprep.mubr.bf16.mxu1 %v6947_v56 }
 0xabf   :  { %2381 = vmatpush1.bf16.msra.mxu0 %v7182_v40  ;;  %2422 = vmatpush1.bf16.msra.mxu1 %v7183_v46 }
 0xac0   :  { %2382 = vmatprep.subr.bf16.mxu0 %v7184_v43  ;;  %2423 = vmatprep.subr.bf16.mxu1 %v7185_v5 }
 0xac3   :  { %2383 = vmatpush1.bf16.msra.mxu0 %v7186_v9  ;;  %2424 = vmatpush1.bf16.msra.mxu1 %v7187_v47 }
 0xac4   :  { %2384 = vmatprep.subr.bf16.mxu0 %v7231_v60  ;;  %2425 = vmatprep.subr.bf16.mxu1 %v7232_v23 }
 0xac7   :  { %2385 = vmatpush1.bf16.msra.mxu0 %v7233_v1  ;;  %2426 = vmatpush1.bf16.msra.mxu1 %v7234_v59 }
 0xac8   :  { %2386 = vmatprep.subr.bf16.mxu0 %v7235_v32  ;;  %2427 = vmatprep.subr.bf16.mxu1 %v7236_v63  ;;  %v3278_v63 = vld [vmem:[%s6570_s0 + $0xb8] sm:$0xff] }
 0xacb   :  { %2387 = vmatpush1.bf16.msra.mxu0 %v7237_v2  ;;  %2428 = vmatpush1.bf16.msra.mxu1 %v7238_v34  ;;  %v3277_v34 = vld [vmem:[%s6570_s0 + $0xb0] sm:$0xff] }
 0xacc   :  { %2388 = vmatprep.subr.bf16.mxu0 %v7239_v61  ;;  %2429 = vmatprep.subr.bf16.mxu1 %v7240_v51 }
 0xacf   :  { %2389 = vmatpush1.bf16.msra.mxu0 %v7241_v54  ;;  %2430 = vmatpush1.bf16.msra.mxu1 %v7242_v35 }
 0xad0   :  { %2390 = vmatprep.subr.bf16.mxu0 %v7243_v24  ;;  %2431 = vmatprep.subr.bf16.mxu1 %v7244_v52 }
 0xad3   :  { %2391 = vmatpush1.bf16.msra.mxu0 %v7245_v33  ;;  %2432 = vmatpush1.bf16.msra.mxu1 %v7246_v30 }
 0xad4   :  { %2392 = vmatprep.subr.bf16.mxu0 %v7247_v37  ;;  %2433 = vmatprep.subr.bf16.mxu1 %v7248_v48 }
 0xad7   :  { %2393 = vmatpush1.bf16.msra.mxu0 %v7249_v31  ;;  %2434 = vmatpush1.bf16.msra.mxu1 %v7250_v36 }
 0xad8   :  { %2489 = vmatprep.subr.bf16.mxu0 %v7251_v42  ;;  %2530 = vmatprep.subr.bf16.mxu1 %v5958_v39 }
 0xb5a   :  { %v5961_v45 = vpop.f32.mrf.mxu0  ;;  %v5963_v40 = vpop.f32.mrf.mxu1 }
 0xb5c   :  { %v5965_v46 = vpop.f32.mrf.mxu0  ;;  %v5967_v43 = vpop.f32.mrf.mxu1 }
 0xb5e   :  { %v2218_v5 = vpop.f32.mrf.mxu0  ;;  %v2259_v9 = vpop.f32.mrf.mxu1 }
 0xb60   :  { %v2219_v47 = vpop.f32.mrf.mxu0  ;;  %v2260_v27 = vpop.f32.mrf.mxu1 }
 0xb7a   :  { %v2301_v62 = vpop.f32.mrf.mxu0  ;;  %v2342_v53 = vpop.f32.mrf.mxu1 }
 0xb7b   :  { %v2349_v0 = vadd.f32 %v3275_v11, %v2301_v62  ;;  %v2351_v54 = vadd.f32 %v3277_v34, %v2342_v53  ;;  %v7253_v53 = vld [vmem:[#allocation19_spill] sm:$0xff]  ;;  %v7267_v34 = vld [vmem:[#allocation36_spill] sm:$0xff] }
 0xb7c   :  { %v2303_v14 = vpop.f32.mrf.mxu0  ;;  %v2344_v41 = vpop.f32.mrf.mxu1 }
 0xb7d   :  { %v3279_v20 = vmul.f32 -1.442695, %v2349_v0  ;;  %v2350_v3 = vadd.f32 %v3276_v38, %v2303_v14  ;;  %v2352_v2 = vadd.f32 %v3278_v63, %v2344_v41  ;;  %v7254_v38 = vld [vmem:[#allocation27_spill] sm:$0xff]  ;;  %v7255_v0 = vld [vmem:[#allocation22_spill] sm:$0xff]  ;;  %v7256_v14 = vld [vmem:[#allocation28_spill] sm:$0xff] }
 0xb7e   :  { %v2305_v60 = vpop.f32.mrf.mxu0  ;;  %v2346_v23 = vpop.f32.mrf.mxu1  ;;  %v7257_v41 = vld [vmem:[#allocation23_spill] sm:$0xff]  ;;  %v7265_v63 = vld [vmem:[#allocation2_spill] sm:$0xff] }
 0xb7f   :  { %3613 = vpow2.f32 %v3279_v20  ;;  %v3280_v1 = vmul.f32 -1.442695, %v2350_v3  ;;  %v3281_v61 = vmul.f32 -1.442695, %v2352_v2  ;;  %v7258_v20 = vld [vmem:[#allocation29_spill] sm:$0xff]  ;;  %v7259_v3 = vld [vmem:[#allocation30_spill] sm:$0xff] }
 0xb80   :  { %v2306_v59 = vpop.f32.mrf.mxu0  ;;  %v2347_v32 = vpop.f32.mrf.mxu1  ;;  %v7260_v60 = vld [vmem:[#allocation31_spill] sm:$0xff]  ;;  %v7261_v23 = vld [vmem:[#allocation24_spill] sm:$0xff] }
 0xb81   :  { %3615 = vpow2.f32 %v3280_v1  ;;  %v7262_v1 = vld [vmem:[#allocation32_spill] sm:$0xff]  ;;  %v7263_v59 = vld [vmem:[#allocation33_spill] sm:$0xff]  ;;  %v7264_v32 = vld [vmem:[#allocation34_spill] sm:$0xff] }
 0xb82   :  { %3617 = vpow2.f32 %v3281_v61  ;;  %v7266_v2 = vld [vmem:[#allocation35_spill] sm:$0xff]  ;;  %v7268_v61 = vld [vmem:[#allocation37_spill] sm:$0xff] }
 0xb8c   :  { %v3614_v51 = vpop.eup %3613 }
 0xb8d   :  { %v2356_v35 = vadd.f32 1.0, %v3614_v51  ;;  %v6017_v51 = vld [vmem:[%s6566_s5 + $0x2c] ss:$16 sps:$4 sm:$0xff]  }
 0xb8e   :  { %v3616_v24 = vpop.eup %3615  ;;  %7269 = vst [vmem:[#allocation42_spill] sm:$0xff] %v6017_v51 }
 0xb8f   :  { %3619 = vrcp.f32 %v2356_v35  ;;  %v2362_v52 = vadd.f32 1.0, %v3616_v24  ;;  %v3618_v33 = vpop.eup %3617  ;;  %v6024_v35 = vld [vmem:[%s6566_s5 + $0x28] ss:$16 sps:$4 sm:$0xff]  }
 0xb90   :  { %3621 = vtanh.f32 %v2351_v54  ;;  %v2369_v31 = vadd.f32 1.0, %v3618_v33  ;;  %v7270_v54 = vld [vmem:[#allocation38_spill] sm:$0xff]  ;;  %7271 = vst [vmem:[#allocation43_spill] sm:$0xff] %v6024_v35  ;;  %v7272_v24 = vld [vmem:[#allocation39_spill] sm:$0xff]  ;;  %v7274_v33 = vld [vmem:[#allocation40_spill] sm:$0xff] }
 0xb91   :  { %3623 = vrcp.f32 %v2362_v52  ;;  %v6031_v52 = vld [vmem:[%s6566_s5 + $0xc] ss:$16 sps:$4 sm:$0xff]  }
 0xb92   :  { %3625 = vrcp.f32 %v2369_v31  ;;  %7273 = vst [vmem:[#allocation44_spill] sm:$0xff] %v6031_v52 }
 0xb9c   :  { %v3620_v30 = vpop.eup %3619 }
 0xb9d   :  { %v3622_v37 = vpop.eup %3621 }
 0xb9e   :  { %v3624_v48 = vpop.eup %3623  ;;  %v2373_v36 = vmul.f32 %v3622_v37, %v3620_v30  ;;  %v6038_v30 = vld [vmem:[%s6566_s5 + $0x8] ss:$16 sps:$4 sm:$0xff]   ;;  %v6044_v37 = vld [vmem:[%s6567_s3 + $0xe4] ss:$16 sps:$4 sm:$0xff]  }
 0xb9f   :  { %v2372_v5 = vmul.f32 %v3624_v48, %v5643_v57  ;;  %v3626_v47 = vpop.eup %3625  ;;  %v7252_v57 = vld [vmem:[#allocation26_spill] sm:$0xff]  ;;  %7275 = vst [vmem:[#allocation45_spill] sm:$0xff] %v6038_v30  ;;  %7276 = vst [vmem:[#allocation46_spill] sm:$0xff] %v6044_v37  ;;  %v6050_v48 = vld [vmem:[%s6567_s3 + $0xec] ss:$16 sps:$4 sm:$0xff]  }
 0xba0   :  { %7277 = vst [vmem:[#allocation47_spill] sm:$0xff] %v6050_v48 }
 0xba1   :  { %v5982_v9 = vadd.f32 %v2373_v36, %v2372_v5 }
 0xba3   :  { %3627 = vtanh.f32 %v5982_v9 }
 0xbb0   :  { %v3628_v27 = vpop.eup %3627 }
 0xbb1   :  { %v2376_v11 = vmul.f32 %v3628_v27, %v3626_v47 }
 0xbb3   :  { %v5985_v62 = vpack.c.bf16 %v2376_v11, %v2376_v11 }
 0xbb5   :  { %2411 = vmatmul.mubr.bf16.vlgmr.msra.gmra.mxu0 %v5985_v62  ;;  %2452 = vmatmul.mubr.bf16.vlgmr.msra.gmra.mxu1 %v5985_v62 }
 0xbb6   :  { %2490 = vmatpush1.bf16.msra.mxu0 %v5653_v13  ;;  %2531 = vmatpush1.bf16.msra.mxu1 %v5659_v17 }
 0xbb7   :  { %2491 = vmatprep.subr.bf16.mxu0 %v5665_v7  ;;  %2532 = vmatprep.subr.bf16.mxu1 %v5671_v10 }
 0xbb8   :  { %2521 = vmatprep.mubr.bf16.mxu0 %v6947_v56  ;;  %2562 = vmatprep.mubr.bf16.mxu1 %v6947_v56 }
 0xbba   :  { %2492 = vmatpush1.bf16.msra.mxu0 %v5679_v26  ;;  %2533 = vmatpush1.bf16.msra.mxu1 %v5685_v15 }
 0xbbb   :  { %2493 = vmatprep.subr.bf16.mxu0 %v7252_v57  ;;  %2534 = vmatprep.subr.bf16.mxu1 %v7253_v53 }
 0xbbe   :  { %2494 = vmatpush1.bf16.msra.mxu0 %v7254_v38  ;;  %2535 = vmatpush1.bf16.msra.mxu1 %v7255_v0 }
 0xbbf   :  { %2495 = vmatprep.subr.bf16.mxu0 %v7256_v14  ;;  %2536 = vmatprep.subr.bf16.mxu1 %v7257_v41 }
 0xbc2   :  { %2496 = vmatpush1.bf16.msra.mxu0 %v7258_v20  ;;  %2537 = vmatpush1.bf16.msra.mxu1 %v7259_v3 }
 0xbc3   :  { %2497 = vmatprep.subr.bf16.mxu0 %v7260_v60  ;;  %2538 = vmatprep.subr.bf16.mxu1 %v7261_v23 }
 0xbc6   :  { %2498 = vmatpush1.bf16.msra.mxu0 %v7262_v1  ;;  %2539 = vmatpush1.bf16.msra.mxu1 %v7263_v59 }
 0xbc7   :  { %2499 = vmatprep.subr.bf16.mxu0 %v7264_v32  ;;  %2540 = vmatprep.subr.bf16.mxu1 %v7265_v63 }
 0xbca   :  { %2500 = vmatpush1.bf16.msra.mxu0 %v7266_v2  ;;  %2541 = vmatpush1.bf16.msra.mxu1 %v7267_v34 }
 0xbcb   :  { %2501 = vmatprep.subr.bf16.mxu0 %v7268_v61  ;;  %2542 = vmatprep.subr.bf16.mxu1 %v6017_v51 }
 0xbce   :  { %2502 = vmatpush1.bf16.msra.mxu0 %v7270_v54  ;;  %2543 = vmatpush1.bf16.msra.mxu1 %v6024_v35 }
 0xbcf   :  { %2503 = vmatprep.subr.bf16.mxu0 %v7272_v24  ;;  %2544 = vmatprep.subr.bf16.mxu1 %v6031_v52 }
 0xbd2   :  { %2504 = vmatpush1.bf16.msra.mxu0 %v7274_v33  ;;  %2545 = vmatpush1.bf16.msra.mxu1 %v6038_v30 }
 0xbd3   :  { %2576 = vmatprep.subr.bf16.mxu0 %v6044_v37  ;;  %2617 = vmatprep.subr.bf16.mxu1 %v6050_v48 }
 0xc75   :  { %v2412_v31 = vpop.f32.mrf.mxu0  ;;  %v2453_v36 = vpop.f32.mrf.mxu1 }
 0xc76   :  { %v2413_v5 = vadd.f32 %v2412_v31, %v5961_v45  ;;  %v2454_v31 = vadd.f32 %v2453_v36, %v5963_v40 }
 0xc77   :  { %v2414_v47 = vpop.f32.mrf.mxu0  ;;  %v2455_v27 = vpop.f32.mrf.mxu1 }
 0xc78   :  { %v2460_v11 = vadd.f32 %v2413_v5, %v4613_v8  ;;  %v2415_v30 = vadd.f32 %v2414_v47, %v5965_v46  ;;  %v2456_v48 = vadd.f32 %v2455_v27, %v5967_v43  ;;  %v2462_v46 = vadd.f32 %v2454_v31, %v4625_v44  ;;  %v6100_v31 = vld [vmem:[%s6567_s3 + $0x6c] ss:$16 sps:$4 sm:$0xff]  }
 0xc79   :  { %v2416_v33 = vpop.f32.mrf.mxu0  ;;  %v2457_v52 = vpop.f32.mrf.mxu1  ;;  %7278 = vst [vmem:[#allocation48_spill] sm:$0xff] %v6100_v31 }
 0xc7a   :  { %v3282_v37 = vmul.f32 -1.442695, %v2460_v11  ;;  %v2461_v24 = vadd.f32 %v2415_v30, %v4616_v12  ;;  %v2463_v45 = vadd.f32 %v2456_v48, %v4621_v25  ;;  %v6086_v11 = vld [vmem:[%s6567_s3 + $0x8c] ss:$16 sps:$4 sm:$0xff]  }
 0xc7b   :  { %v2417_v35 = vpop.f32.mrf.mxu0  ;;  %v2458_v54 = vpop.f32.mrf.mxu1 }
 0xc7c   :  { %3629 = vpow2.f32 %v3282_v37  ;;  %v3283_v51 = vmul.f32 -1.442695, %v2461_v24  ;;  %v3284_v61 = vmul.f32 -1.442695, %v2463_v45  ;;  %v6093_v45 = vld [vmem:[%s6567_s3 + $0x88] ss:$16 sps:$4 sm:$0xff]  }
 0xc7e   :  { %3631 = vpow2.f32 %v3283_v51 }
 0xc7f   :  { %3633 = vpow2.f32 %v3284_v61 }
 0xc89   :  { %v3630_v5 = vpop.eup %3629 }
 0xc8a   :  { %v2467_v33 = vadd.f32 1.0, %v3630_v5  ;;  %v6106_v5 = vld [vmem:[%s6567_s3 + $0x60] ss:$16 sps:$4 sm:$0xff]  }
 0xc8b   :  { %v3632_v52 = vpop.eup %3631  ;;  %7279 = vst [vmem:[#allocation49_spill] sm:$0xff] %v6106_v5 }
 0xc8c   :  { %3635 = vrcp.f32 %v2467_v33  ;;  %v2473_v30 = vadd.f32 1.0, %v3632_v52  ;;  %v3634_v54 = vpop.eup %3633  ;;  %v6118_v33 = vld [vmem:[%s6567_s3 + $0x44] ss:$16 sps:$4 sm:$0xff]   ;;  %v6124_v52 = vld [vmem:[%s6567_s3 + $0x4c] ss:$16 sps:$4 sm:$0xff]  }
 0xc8d   :  { %3637 = vtanh.f32 %v2462_v46  ;;  %v2480_v43 = vadd.f32 1.0, %v3634_v54  ;;  %v6112_v46 = vld [vmem:[%s6567_s3 + $0x68] ss:$16 sps:$4 sm:$0xff]   ;;  %7281 = vst [vmem:[#allocation51_spill] sm:$0xff] %v6118_v33  ;;  %7282 = vst [vmem:[#allocation52_spill] sm:$0xff] %v6124_v52 }
 0xc8e   :  { %3639 = vrcp.f32 %v2473_v30  ;;  %7280 = vst [vmem:[#allocation50_spill] sm:$0xff] %v6112_v46  ;;  %v6130_v30 = vld [vmem:[%s6567_s3 + $0x40] ss:$16 sps:$4 sm:$0xff]   ;;  %v6136_v54 = vld [vmem:[%s6567_s3 + $0x48] ss:$16 sps:$4 sm:$0xff]  }
 0xc8f   :  { %3641 = vrcp.f32 %v2480_v43  ;;  %7283 = vst [vmem:[#allocation53_spill] sm:$0xff] %v6130_v30  ;;  %7284 = vst [vmem:[#allocation54_spill] sm:$0xff] %v6136_v54  ;;  %v6160_v43 = vld [vmem:[%s6567_s3 + $0x28] ss:$16 sps:$4 sm:$0xff]  }
 0xc90   :  { %7288 = vst [vmem:[#allocation25_spill] sm:$0xff] %v6160_v43 }
 0xc99   :  { %v3636_v35 = vpop.eup %3635 }
 0xc9a   :  { %v3638_v51 = vpop.eup %3637 }
 0xc9b   :  { %v3640_v24 = vpop.eup %3639  ;;  %v2484_v37 = vmul.f32 %v3638_v51, %v3636_v35  ;;  %v6142_v35 = vld [vmem:[%s6567_s3 + $0x24] ss:$16 sps:$4 sm:$0xff]   ;;  %v6148_v51 = vld [vmem:[%s6567_s3 + $0x2c] ss:$16 sps:$4 sm:$0xff]  }
 0xc9c   :  { %v2483_v48 = vmul.f32 %v3640_v24, %v5823_v19  ;;  %v3642_v36 = vpop.eup %3641  ;;  %v6079_v19 = vld [vmem:[%s6567_s3 + $0xa8] ss:$16 sps:$4 sm:$0xff]   ;;  %7285 = vst [vmem:[#allocation3_spill] sm:$0xff] %v6142_v35  ;;  %7286 = vst [vmem:[#allocation6_spill] sm:$0xff] %v6148_v51  ;;  %v6154_v24 = vld [vmem:[%s6567_s3 + $0x20] ss:$16 sps:$4 sm:$0xff]  }
 0xc9d   :  { %7287 = vst [vmem:[#allocation4_spill] sm:$0xff] %v6154_v24 }
 0xc9e   :  { %v6062_v40 = vadd.f32 %v2484_v37, %v2483_v48  ;;  %v6166_v37 = vld [vmem:[%s6567_s3 + $0x4] ss:$16 sps:$4 sm:$0xff]   ;;  %v6172_v48 = vld [vmem:[%s6567_s3 + $0xc] ss:$16 sps:$4 sm:$0xff]  }
 0xc9f   :  { %7289 = vst [vmem:[#allocation9_spill] sm:$0xff] %v6166_v37  ;;  %7290 = vst [vmem:[#allocation5_spill] sm:$0xff] %v6172_v48 }
 0xca0   :  { %3643 = vtanh.f32 %v6062_v40 }
 0xcad   :  { %v3644_v47 = vpop.eup %3643 }
 0xcae   :  { %v2487_v61 = vmul.f32 %v3644_v47, %v3642_v36  ;;  %v6178_v36 = vld [vmem:[%s6567_s3] ss:$16 sps:$4 sm:$0xff]   ;;  %v6184_v47 = vld [vmem:[%s6567_s3 + $0x8] ss:$16 sps:$4 sm:$0xff]  }
 0xcaf   :  { %7291 = vst [vmem:[#allocation10_spill] sm:$0xff] %v6178_v36  ;;  %7292 = vst [vmem:[#allocation7_spill] sm:$0xff] %v6184_v47 }
 0xcb0   :  { %v2488_v27 = vpack.c.bf16 %v2487_v61, %v2487_v61  ;;  %v6190_v61 = vld [vmem:[%s6569_s4 + $0xe4] ss:$16 sps:$4 sm:$0xff]  }
 0xcb1   :  { %7293 = vst [vmem:[#allocation13_spill] sm:$0xff] %v6190_v61 }
 0xcb2   :  { %2522 = vmatmul.mubr.bf16.vlgmr.msra.gmra.mxu0 %v2488_v27  ;;  %2563 = vmatmul.mubr.bf16.vlgmr.msra.gmra.mxu1 %v2488_v27  ;;  %v6196_v27 = vld [vmem:[%s6569_s4 + $0xec] ss:$16 sps:$4 sm:$0xff]  }
 0xcb3   :  { %2577 = vmatpush1.bf16.msra.mxu0 %v5829_v4  ;;  %2618 = vmatpush1.bf16.msra.mxu1 %v5835_v50  ;;  %7294 = vst [vmem:[#allocation8_spill] sm:$0xff] %v6196_v27 }
 0xcb4   :  { %2578 = vmatprep.subr.bf16.mxu0 %v5841_v49  ;;  %2619 = vmatprep.subr.bf16.mxu1 %v5847_v58 }
 0xcb5   :  { %2608 = vmatprep.mubr.bf16.mxu0 %v6947_v56  ;;  %2649 = vmatprep.mubr.bf16.mxu1 %v6947_v56 }
 0xcb7   :  { %2579 = vmatpush1.bf16.msra.mxu0 %v5855_v28  ;;  %2620 = vmatpush1.bf16.msra.mxu1 %v5861_v21 }
 0xcb8   :  { %2580 = vmatprep.subr.bf16.mxu0 %v5867_v29  ;;  %2621 = vmatprep.subr.bf16.mxu1 %v5873_v16 }
 0xcbb   :  { %2581 = vmatpush1.bf16.msra.mxu0 %v5879_v22  ;;  %2622 = vmatpush1.bf16.msra.mxu1 %v6079_v19 }
 0xcbc   :  { %2582 = vmatprep.subr.bf16.mxu0 %v5886_v18  ;;  %2623 = vmatprep.subr.bf16.mxu1 %v6086_v11 }
 0xcbf   :  { %2583 = vmatpush1.bf16.msra.mxu0 %v5893_v55  ;;  %2624 = vmatpush1.bf16.msra.mxu1 %v6093_v45 }
 0xcc0   :  { %2584 = vmatprep.subr.bf16.mxu0 %v5900_v6  ;;  %2625 = vmatprep.subr.bf16.mxu1 %v6100_v31 }
 0xcc3   :  { %2585 = vmatpush1.bf16.msra.mxu0 %v6106_v5  ;;  %2626 = vmatpush1.bf16.msra.mxu1 %v6112_v46  ;;  %v3288_v5 = vld [vmem:[%s6570_s0 + $0xd8] sm:$0xff] }
 0xcc4   :  { %2586 = vmatprep.subr.bf16.mxu0 %v6118_v33  ;;  %2627 = vmatprep.subr.bf16.mxu1 %v6124_v52 }
 0xcc7   :  { %2587 = vmatpush1.bf16.msra.mxu0 %v6130_v30  ;;  %2628 = vmatpush1.bf16.msra.mxu1 %v6136_v54 }
 0xcc8   :  { %2588 = vmatprep.subr.bf16.mxu0 %v6142_v35  ;;  %2629 = vmatprep.subr.bf16.mxu1 %v6148_v51 }
 0xccb   :  { %2589 = vmatpush1.bf16.msra.mxu0 %v6154_v24  ;;  %2630 = vmatpush1.bf16.msra.mxu1 %v6160_v43 }
 0xccc   :  { %2590 = vmatprep.subr.bf16.mxu0 %v6166_v37  ;;  %2631 = vmatprep.subr.bf16.mxu1 %v6172_v48 }
 0xccf   :  { %2591 = vmatpush1.bf16.msra.mxu0 %v6178_v36  ;;  %2632 = vmatpush1.bf16.msra.mxu1 %v6184_v47  ;;  %v6204_v47 = vld [vmem:[%s6569_s4 + $0xe0] ss:$16 sps:$4 sm:$0xff]  }
 0xcd0   :  { %2687 = vmatprep.subr.bf16.mxu0 %v6190_v61  ;;  %2728 = vmatprep.subr.bf16.mxu1 %v6196_v27  ;;  %7295 = vst [vmem:[#allocation14_spill] sm:$0xff] %v6204_v47  ;;  %v6210_v61 = vld [vmem:[%s6569_s4 + $0xe8] ss:$16 sps:$4 sm:$0xff]   ;;  %v6216_v27 = vld [vmem:[%s6569_s4 + $0xc4] ss:$16 sps:$4 sm:$0xff]  }
 0xcd1   :  { %7296 = vst [vmem:[#allocation11_spill] sm:$0xff] %v6210_v61  ;;  %7297 = vst [vmem:[#allocation17_spill] sm:$0xff] %v6216_v27 }
 0xcd2   :  { %2609 = vmatmul.mubr.bf16.vlgmr.msra.gmra.mxu0 %v5985_v62  ;;  %2650 = vmatmul.mubr.bf16.vlgmr.msra.gmra.mxu1 %v5985_v62  ;;  %v6222_v62 = vld [vmem:[%s6569_s4 + $0xcc] ss:$16 sps:$4 sm:$0xff]  }
 0xcd3   :  { %2688 = vmatpush1.bf16.msra.mxu0 %v6204_v47  ;;  %2729 = vmatpush1.bf16.msra.mxu1 %v6210_v61  ;;  %7298 = vst [vmem:[#allocation12_spill] sm:$0xff] %v6222_v62  ;;  %v6230_v61 = vld [vmem:[%s6569_s4 + $0xc0] ss:$16 sps:$4 sm:$0xff]   ;;  %v6248_v47 = vld [vmem:[%s6569_s4 + $0xac] ss:$16 sps:$4 sm:$0xff]  }
 0xcd4   :  { %2689 = vmatprep.subr.bf16.mxu0 %v6216_v27  ;;  %2730 = vmatprep.subr.bf16.mxu1 %v6222_v62  ;;  %7299 = vst [vmem:[#allocation18_spill] sm:$0xff] %v6230_v61  ;;  %v6236_v27 = vld [vmem:[%s6569_s4 + $0xc8] ss:$16 sps:$4 sm:$0xff]   ;;  %v6242_v62 = vld [vmem:[%s6569_s4 + $0xa4] ss:$16 sps:$4 sm:$0xff]   ;;  %7302 = vst [vmem:[#allocation16_spill] sm:$0xff] %v6248_v47 }
 0xcd5   :  { %2719 = vmatprep.mubr.bf16.mxu0 %v6947_v56  ;;  %2760 = vmatprep.mubr.bf16.mxu1 %v6947_v56  ;;  %7300 = vst [vmem:[#allocation15_spill] sm:$0xff] %v6236_v27  ;;  %7301 = vst [vmem:[#allocation20_spill] sm:$0xff] %v6242_v62 }
 0xcd7   :  { %2690 = vmatpush1.bf16.msra.mxu0 %v6230_v61  ;;  %2731 = vmatpush1.bf16.msra.mxu1 %v6236_v27  ;;  %v6254_v61 = vld [vmem:[%s6569_s4 + $0xa0] ss:$16 sps:$4 sm:$0xff]   ;;  %v6260_v27 = vld [vmem:[%s6569_s4 + $0xa8] ss:$16 sps:$4 sm:$0xff]  }
 0xcd8   :  { %2691 = vmatprep.subr.bf16.mxu0 %v6242_v62  ;;  %2732 = vmatprep.subr.bf16.mxu1 %v6248_v47  ;;  %7303 = vst [vmem:[#allocation55_spill] sm:$0xff] %v6254_v61  ;;  %7304 = vst [vmem:[#allocation56_spill] sm:$0xff] %v6260_v27  ;;  %v6266_v62 = vld [vmem:[%s6569_s4 + $0x84] ss:$16 sps:$4 sm:$0xff]   ;;  %v6272_v47 = vld [vmem:[%s6569_s4 + $0x8c] ss:$16 sps:$4 sm:$0xff]  }
 0xcd9   :  { %7305 = vst [vmem:[#allocation57_spill] sm:$0xff] %v6266_v62  ;;  %7306 = vst [vmem:[#allocation58_spill] sm:$0xff] %v6272_v47 }
 0xcdb   :  { %2692 = vmatpush1.bf16.msra.mxu0 %v6254_v61  ;;  %2733 = vmatpush1.bf16.msra.mxu1 %v6260_v27  ;;  %v6278_v61 = vld [vmem:[%s6569_s4 + $0x80] ss:$16 sps:$4 sm:$0xff]   ;;  %v6284_v27 = vld [vmem:[%s6569_s4 + $0x88] ss:$16 sps:$4 sm:$0xff]  }
 0xcdc   :  { %2693 = vmatprep.subr.bf16.mxu0 %v6266_v62  ;;  %2734 = vmatprep.subr.bf16.mxu1 %v6272_v47  ;;  %7307 = vst [vmem:[#allocation59_spill] sm:$0xff] %v6278_v61  ;;  %7308 = vst [vmem:[#allocation60_spill] sm:$0xff] %v6284_v27  ;;  %v6290_v62 = vld [vmem:[%s6569_s4 + $0x64] ss:$16 sps:$4 sm:$0xff]   ;;  %v6296_v47 = vld [vmem:[%s6569_s4 + $0x6c] ss:$16 sps:$4 sm:$0xff]  }
 0xcdd   :  { %7309 = vst [vmem:[#allocation21_spill] sm:$0xff] %v6290_v62  ;;  %7310 = vst [vmem:[#allocation26_spill] sm:$0xff] %v6296_v47 }
 0xcdf   :  { %2694 = vmatpush1.bf16.msra.mxu0 %v6278_v61  ;;  %2735 = vmatpush1.bf16.msra.mxu1 %v6284_v27  ;;  %v6302_v61 = vld [vmem:[%s6569_s4 + $0x60] ss:$16 sps:$4 sm:$0xff]   ;;  %v6308_v27 = vld [vmem:[%s6569_s4 + $0x68] ss:$16 sps:$4 sm:$0xff]  }
 0xce0   :  { %2695 = vmatprep.subr.bf16.mxu0 %v6290_v62  ;;  %2736 = vmatprep.subr.bf16.mxu1 %v6296_v47  ;;  %7311 = vst [vmem:[#allocation19_spill] sm:$0xff] %v6302_v61  ;;  %7312 = vst [vmem:[#allocation27_spill] sm:$0xff] %v6308_v27  ;;  %v6314_v62 = vld [vmem:[%s6569_s4 + $0x44] ss:$16 sps:$4 sm:$0xff]   ;;  %v6320_v47 = vld [vmem:[%s6569_s4 + $0x4c] ss:$16 sps:$4 sm:$0xff]  }
 0xce1   :  { %7313 = vst [vmem:[#allocation22_spill] sm:$0xff] %v6314_v62  ;;  %7314 = vst [vmem:[#allocation28_spill] sm:$0xff] %v6320_v47 }
 0xce3   :  { %2696 = vmatpush1.bf16.msra.mxu0 %v6302_v61  ;;  %2737 = vmatpush1.bf16.msra.mxu1 %v6308_v27  ;;  %v6326_v61 = vld [vmem:[%s6569_s4 + $0x40] ss:$16 sps:$4 sm:$0xff]   ;;  %v6332_v27 = vld [vmem:[%s6569_s4 + $0x48] ss:$16 sps:$4 sm:$0xff]  }
 0xce4   :  { %2697 = vmatprep.subr.bf16.mxu0 %v6314_v62  ;;  %2738 = vmatprep.subr.bf16.mxu1 %v6320_v47  ;;  %7315 = vst [vmem:[#allocation23_spill] sm:$0xff] %v6326_v61  ;;  %7316 = vst [vmem:[#allocation29_spill] sm:$0xff] %v6332_v27  ;;  %v6338_v62 = vld [vmem:[%s6569_s4 + $0x24] ss:$16 sps:$4 sm:$0xff]   ;;  %v6344_v47 = vld [vmem:[%s6569_s4 + $0x2c] ss:$16 sps:$4 sm:$0xff]  }
 0xce5   :  { %7317 = vst [vmem:[#allocation30_spill] sm:$0xff] %v6338_v62  ;;  %7318 = vst [vmem:[#allocation31_spill] sm:$0xff] %v6344_v47 }
 0xce7   :  { %2698 = vmatpush1.bf16.msra.mxu0 %v6326_v61  ;;  %2739 = vmatpush1.bf16.msra.mxu1 %v6332_v27  ;;  %v6350_v61 = vld [vmem:[%s6569_s4 + $0x20] ss:$16 sps:$4 sm:$0xff]   ;;  %v6356_v27 = vld [vmem:[%s6569_s4 + $0x28] ss:$16 sps:$4 sm:$0xff]  }
 0xce8   :  { %2699 = vmatprep.subr.bf16.mxu0 %v6338_v62  ;;  %2740 = vmatprep.subr.bf16.mxu1 %v6344_v47  ;;  %7319 = vst [vmem:[#allocation24_spill] sm:$0xff] %v6350_v61  ;;  %7320 = vst [vmem:[#allocation32_spill] sm:$0xff] %v6356_v27  ;;  %v6362_v62 = vld [vmem:[%s6569_s4 + $0x4] ss:$16 sps:$4 sm:$0xff]   ;;  %v6368_v47 = vld [vmem:[%s6569_s4 + $0xc] ss:$16 sps:$4 sm:$0xff]  }
 0xce9   :  { %7321 = vst [vmem:[#allocation33_spill] sm:$0xff] %v6362_v62  ;;  %7322 = vst [vmem:[#allocation34_spill] sm:$0xff] %v6368_v47 }
 0xceb   :  { %2700 = vmatpush1.bf16.msra.mxu0 %v6350_v61  ;;  %2741 = vmatpush1.bf16.msra.mxu1 %v6356_v27  ;;  %v6374_v61 = vld [vmem:[%s6569_s4] ss:$16 sps:$4 sm:$0xff]   ;;  %v6380_v27 = vld [vmem:[%s6569_s4 + $0x8] ss:$16 sps:$4 sm:$0xff]  }
 0xcec   :  { %2701 = vmatprep.subr.bf16.mxu0 %v6362_v62  ;;  %2742 = vmatprep.subr.bf16.mxu1 %v6368_v47  ;;  %7323 = vst [vmem:[#allocation2_spill] sm:$0xff] %v6374_v61  ;;  %7324 = vst [vmem:[#allocation35_spill] sm:$0xff] %v6380_v27 }
 0xcef   :  { %2702 = vmatpush1.bf16.msra.mxu0 %v6374_v61  ;;  %2743 = vmatpush1.bf16.msra.mxu1 %v6380_v27  ;;  %v3285_v27 = vld [vmem:[%s6570_s0 + $0xc0] sm:$0xff] }
 0xcf0   :  { %2798 = vmatprep.subr.bf16.mxu0 %v7251_v42  ;;  %2839 = vmatprep.subr.bf16.mxu1 %v5958_v39  ;;  %v3286_v39 = vld [vmem:[%s6570_s0 + $0xc8] sm:$0xff] }
 0xd72   :  { %v6385_v62 = vpop.f32.mrf.mxu0  ;;  %v6387_v47 = vpop.f32.mrf.mxu1 }
 0xd74   :  { %v6389_v36 = vpop.f32.mrf.mxu0  ;;  %v6391_v48 = vpop.f32.mrf.mxu1 }
 0xd76   :  { %v2527_v61 = vpop.f32.mrf.mxu0  ;;  %v2568_v37 = vpop.f32.mrf.mxu1 }
 0xd78   :  { %v2528_v43 = vpop.f32.mrf.mxu0  ;;  %v2569_v24 = vpop.f32.mrf.mxu1 }
 0xd92   :  { %v2610_v51 = vpop.f32.mrf.mxu0  ;;  %v2651_v42 = vpop.f32.mrf.mxu1 }
 0xd93   :  { %v2658_v35 = vadd.f32 %v3285_v27, %v2610_v51  ;;  %v3287_v51 = vld [vmem:[%s6570_s0 + $0xd0] sm:$0xff] }
 0xd94   :  { %v2612_v54 = vpop.f32.mrf.mxu0  ;;  %v2653_v30 = vpop.f32.mrf.mxu1 }
 0xd95   :  { %v3289_v52 = vmul.f32 -1.442695, %v2658_v35  ;;  %v2659_v33 = vadd.f32 %v3286_v39, %v2612_v54  ;;  %v2661_v31 = vadd.f32 %v3288_v5, %v2653_v30  ;;  %v2660_v35 = vadd.f32 %v3287_v51, %v2651_v42 }
 0xd96   :  { %v2614_v46 = vpop.f32.mrf.mxu0  ;;  %v2655_v61 = vpop.f32.mrf.mxu1 }
 0xd97   :  { %3645 = vpow2.f32 %v3289_v52  ;;  %v3290_v43 = vmul.f32 -1.442695, %v2659_v33  ;;  %v3291_v27 = vmul.f32 -1.442695, %v2661_v31 }
 0xd98   :  { %v2615_v24 = vpop.f32.mrf.mxu0  ;;  %v2656_v37 = vpop.f32.mrf.mxu1 }
 0xd99   :  { %3647 = vpow2.f32 %v3290_v43 }
 0xd9a   :  { %3649 = vpow2.f32 %v3291_v27 }
 0xda4   :  { %v3646_v6 = vpop.eup %3645 }
 0xda5   :  { %v2665_v54 = vadd.f32 1.0, %v3646_v6 }
 0xda6   :  { %v3648_v46 = vpop.eup %3647 }
 0xda7   :  { %3651 = vrcp.f32 %v2665_v54  ;;  %v2671_v33 = vadd.f32 1.0, %v3648_v46  ;;  %v3650_v52 = vpop.eup %3649 }
 0xda8   :  { %3653 = vtanh.f32 %v2660_v35  ;;  %v2678_v24 = vadd.f32 1.0, %v3650_v52 }
 0xda9   :  { %3655 = vrcp.f32 %v2671_v33 }
 0xdaa   :  { %3657 = vrcp.f32 %v2678_v24 }
 0xdb4   :  { %v3652_v39 = vpop.eup %3651 }
 0xdb5   :  { %v3654_v61 = vpop.eup %3653 }
 0xdb6   :  { %v3656_v43 = vpop.eup %3655  ;;  %v2682_v5 = vmul.f32 %v3654_v61, %v3652_v39 }
 0xdb7   :  { %v2681_v30 = vmul.f32 %v3656_v43, %v5982_v9  ;;  %v3658_v6 = vpop.eup %3657  ;;  %v7331_v9 = vld [vmem:[#allocation40_spill] sm:$0xff] }
 0xdb9   :  { %v6406_v37 = vadd.f32 %v2682_v5, %v2681_v30 }
 0xdbb   :  { %3659 = vtanh.f32 %v6406_v37 }
 0xdc8   :  { %v3660_v31 = vpop.eup %3659 }
 0xdc9   :  { %v2685_v42 = vmul.f32 %v3660_v31, %v3658_v6 }
 0xdcb   :  { %v6409_v51 = vpack.c.bf16 %v2685_v42, %v2685_v42 }
 0xdcd   :  { %2720 = vmatmul.mubr.bf16.vlgmr.msra.gmra.mxu0 %v6409_v51  ;;  %2761 = vmatmul.mubr.bf16.vlgmr.msra.gmra.mxu1 %v6409_v51 }
 0xdce   :  { %2799 = vmatpush1.bf16.msra.mxu0 %v5653_v13  ;;  %2840 = vmatpush1.bf16.msra.mxu1 %v5659_v17  ;;  %v7325_v13 = vld [vmem:[#allocation37_spill] sm:$0xff]  ;;  %v7326_v17 = vld [vmem:[#allocation42_spill] sm:$0xff] }
 0xdcf   :  { %2800 = vmatprep.subr.bf16.mxu0 %v5665_v7  ;;  %2841 = vmatprep.subr.bf16.mxu1 %v5671_v10  ;;  %v7327_v7 = vld [vmem:[#allocation38_spill] sm:$0xff]  ;;  %v7328_v10 = vld [vmem:[#allocation43_spill] sm:$0xff] }
 0xdd0   :  { %2830 = vmatprep.mubr.bf16.mxu0 %v6947_v56  ;;  %2871 = vmatprep.mubr.bf16.mxu1 %v6947_v56 }
 0xdd2   :  { %2801 = vmatpush1.bf16.msra.mxu0 %v5679_v26  ;;  %2842 = vmatpush1.bf16.msra.mxu1 %v5685_v15  ;;  %v7329_v26 = vld [vmem:[#allocation39_spill] sm:$0xff]  ;;  %v7330_v15 = vld [vmem:[#allocation44_spill] sm:$0xff] }
 0xdd3   :  { %2802 = vmatprep.subr.bf16.mxu0 %v7252_v57  ;;  %2843 = vmatprep.subr.bf16.mxu1 %v7253_v53  ;;  %v7332_v57 = vld [vmem:[#allocation45_spill] sm:$0xff]  ;;  %v7333_v53 = vld [vmem:[#allocation46_spill] sm:$0xff] }
 0xdd6   :  { %2803 = vmatpush1.bf16.msra.mxu0 %v7254_v38  ;;  %2844 = vmatpush1.bf16.msra.mxu1 %v7255_v0  ;;  %v7334_v38 = vld [vmem:[#allocation47_spill] sm:$0xff] }
 0xdd7   :  { %2804 = vmatprep.subr.bf16.mxu0 %v7256_v14  ;;  %2845 = vmatprep.subr.bf16.mxu1 %v7257_v41 }
 0xdda   :  { %2805 = vmatpush1.bf16.msra.mxu0 %v7258_v20  ;;  %2846 = vmatpush1.bf16.msra.mxu1 %v7259_v3 }
 0xddb   :  { %2806 = vmatprep.subr.bf16.mxu0 %v7260_v60  ;;  %2847 = vmatprep.subr.bf16.mxu1 %v7261_v23 }
 0xdde   :  { %2807 = vmatpush1.bf16.msra.mxu0 %v7262_v1  ;;  %2848 = vmatpush1.bf16.msra.mxu1 %v7263_v59 }
 0xddf   :  { %2808 = vmatprep.subr.bf16.mxu0 %v7264_v32  ;;  %2849 = vmatprep.subr.bf16.mxu1 %v7265_v63 }
 0xde2   :  { %2809 = vmatpush1.bf16.msra.mxu0 %v7266_v2  ;;  %2850 = vmatpush1.bf16.msra.mxu1 %v7267_v34 }
 0xde3   :  { %2810 = vmatprep.subr.bf16.mxu0 %v7325_v13  ;;  %2851 = vmatprep.subr.bf16.mxu1 %v7326_v17 }
 0xde6   :  { %2811 = vmatpush1.bf16.msra.mxu0 %v7327_v7  ;;  %2852 = vmatpush1.bf16.msra.mxu1 %v7328_v10  ;;  %v7350_v10 = vld [vmem:[#allocation7_spill] sm:$0xff] }
 0xde7   :  { %2812 = vmatprep.subr.bf16.mxu0 %v7329_v26  ;;  %2853 = vmatprep.subr.bf16.mxu1 %v7330_v15  ;;  %v7351_v26 = vld [vmem:[#allocation13_spill] sm:$0xff]  ;;  %v7352_v15 = vld [vmem:[#allocation8_spill] sm:$0xff] }
 0xdea   :  { %2813 = vmatpush1.bf16.msra.mxu0 %v7331_v9  ;;  %2854 = vmatpush1.bf16.msra.mxu1 %v7332_v57  ;;  %v7353_v9 = vld [vmem:[#allocation14_spill] sm:$0xff]  ;;  %v7354_v57 = vld [vmem:[#allocation11_spill] sm:$0xff] }
 0xdeb   :  { %2885 = vmatprep.subr.bf16.mxu0 %v7333_v53  ;;  %2926 = vmatprep.subr.bf16.mxu1 %v7334_v38  ;;  %v7355_v53 = vld [vmem:[#allocation17_spill] sm:$0xff]  ;;  %v7356_v38 = vld [vmem:[#allocation12_spill] sm:$0xff] }
 0xe8d   :  { %v2721_v0 = vpop.f32.mrf.mxu0  ;;  %v2762_v14 = vpop.f32.mrf.mxu1 }
 0xe8e   :  { %v2722_v41 = vadd.f32 %v2721_v0, %v6385_v62  ;;  %v2763_v54 = vadd.f32 %v2762_v14, %v6387_v47  ;;  %v7357_v0 = vld [vmem:[#allocation18_spill] sm:$0xff]  ;;  %v7358_v14 = vld [vmem:[#allocation15_spill] sm:$0xff] }
 0xe8f   :  { %v2723_v20 = vpop.f32.mrf.mxu0  ;;  %v2764_v3 = vpop.f32.mrf.mxu1 }
 0xe90   :  { %v2769_v60 = vadd.f32 %v2722_v41, %v4613_v8  ;;  %v2724_v23 = vadd.f32 %v2723_v20, %v6389_v36  ;;  %v2765_v35 = vadd.f32 %v2764_v3, %v6391_v48  ;;  %v2771_v36 = vadd.f32 %v2763_v54, %v4625_v44  ;;  %v7359_v41 = vld [vmem:[#allocation20_spill] sm:$0xff]  ;;  %v7375_v54 = vld [vmem:[#allocation30_spill] sm:$0xff] }
 0xe91   :  { %v2725_v1 = vpop.f32.mrf.mxu0  ;;  %v2766_v59 = vpop.f32.mrf.mxu1  ;;  %v7360_v20 = vld [vmem:[#allocation16_spill] sm:$0xff] }
 0xe92   :  { %v3292_v32 = vmul.f32 -1.442695, %v2769_v60  ;;  %v2770_v63 = vadd.f32 %v2724_v23, %v4616_v12  ;;  %v2772_v62 = vadd.f32 %v2765_v35, %v4621_v25  ;;  %v7362_v3 = vld [vmem:[#allocation56_spill] sm:$0xff]  ;;  %v7363_v60 = vld [vmem:[#allocation57_spill] sm:$0xff]  ;;  %v7364_v23 = vld [vmem:[#allocation58_spill] sm:$0xff] }
 0xe93   :  { %v2726_v2 = vpop.f32.mrf.mxu0  ;;  %v2767_v34 = vpop.f32.mrf.mxu1  ;;  %v7365_v1 = vld [vmem:[#allocation59_spill] sm:$0xff]  ;;  %v7366_v59 = vld [vmem:[#allocation60_spill] sm:$0xff] }
 0xe94   :  { %3661 = vpow2.f32 %v3292_v32  ;;  %v3293_v27 = vmul.f32 -1.442695, %v2770_v63  ;;  %v3294_v46 = vmul.f32 -1.442695, %v2772_v62  ;;  %v7368_v32 = vld [vmem:[#allocation26_spill] sm:$0xff]  ;;  %v7369_v63 = vld [vmem:[#allocation19_spill] sm:$0xff] }
 0xe95   :  { %v7370_v2 = vld [vmem:[#allocation27_spill] sm:$0xff]  ;;  %v7371_v34 = vld [vmem:[#allocation22_spill] sm:$0xff]  ;;  %v7374_v62 = vld [vmem:[#allocation29_spill] sm:$0xff] }
 0xe96   :  { %3663 = vpow2.f32 %v3293_v27  ;;  %v7372_v27 = vld [vmem:[#allocation28_spill] sm:$0xff]  ;;  %v7373_v35 = vld [vmem:[#allocation23_spill] sm:$0xff] }
 0xe97   :  { %3665 = vpow2.f32 %v3294_v46  ;;  %v7376_v46 = vld [vmem:[#allocation31_spill] sm:$0xff] }
 0xea1   :  { %v3662_v33 = vpop.eup %3661 }
 0xea2   :  { %v2776_v52 = vadd.f32 1.0, %v3662_v33  ;;  %v7377_v33 = vld [vmem:[#allocation24_spill] sm:$0xff] }
 0xea3   :  { %v3664_v39 = vpop.eup %3663 }
 0xea4   :  { %3667 = vrcp.f32 %v2776_v52  ;;  %v2782_v61 = vadd.f32 1.0, %v3664_v39  ;;  %v3666_v43 = vpop.eup %3665  ;;  %v7379_v52 = vld [vmem:[#allocation33_spill] sm:$0xff]  ;;  %v7380_v39 = vld [vmem:[#allocation34_spill] sm:$0xff] }
 0xea5   :  { %3669 = vtanh.f32 %v2771_v36  ;;  %v2789_v48 = vadd.f32 1.0, %v3666_v43  ;;  %v7378_v36 = vld [vmem:[#allocation32_spill] sm:$0xff]  ;;  %v7382_v43 = vld [vmem:[#allocation35_spill] sm:$0xff] }
 0xea6   :  { %3671 = vrcp.f32 %v2782_v61  ;;  %v7381_v61 = vld [vmem:[#allocation2_spill] sm:$0xff] }
 0xea7   :  { %3673 = vrcp.f32 %v2789_v48 }
 0xeb1   :  { %v3668_v24 = vpop.eup %3667 }
 0xeb2   :  { %v3670_v5 = vpop.eup %3669 }
 0xeb3   :  { %v3672_v30 = vpop.eup %3671  ;;  %v2793_v6 = vmul.f32 %v3670_v5, %v3668_v24 }
 0xeb4   :  { %v2792_v31 = vmul.f32 %v3672_v30, %v6062_v40  ;;  %v3674_v42 = vpop.eup %3673  ;;  %v7346_v40 = vld [vmem:[#allocation25_spill] sm:$0xff] }
 0xeb6   :  { %v6456_v47 = vadd.f32 %v2793_v6, %v2792_v31 }
 0xeb8   :  { %3675 = vtanh.f32 %v6456_v47 }
 0xec5   :  { %v3676_v13 = vpop.eup %3675 }
 0xec6   :  { %v2796_v17 = vmul.f32 %v3676_v13, %v3674_v42 }
 0xec8   :  { %v2797_v7 = vpack.c.bf16 %v2796_v17, %v2796_v17  ;;  %v3295_v17 = vld [vmem:[%s6570_s0 + $0xe0] sm:$0xff] }
 0xeca   :  { %2831 = vmatmul.mubr.bf16.vlgmr.msra.gmra.mxu0 %v2797_v7  ;;  %2872 = vmatmul.mubr.bf16.vlgmr.msra.gmra.mxu1 %v2797_v7 }
 0xecb   :  { %2886 = vmatpush1.bf16.msra.mxu0 %v5829_v4  ;;  %2927 = vmatpush1.bf16.msra.mxu1 %v5835_v50  ;;  %v7335_v4 = vld [vmem:[#allocation41_spill] sm:$0xff]  ;;  %v7336_v50 = vld [vmem:[#allocation48_spill] sm:$0xff] }
 0xecc   :  { %2887 = vmatprep.subr.bf16.mxu0 %v5841_v49  ;;  %2928 = vmatprep.subr.bf16.mxu1 %v5847_v58  ;;  %v7337_v49 = vld [vmem:[#allocation49_spill] sm:$0xff]  ;;  %v7338_v58 = vld [vmem:[#allocation50_spill] sm:$0xff] }
 0xecd   :  { %2917 = vmatprep.mubr.bf16.mxu0 %v6947_v56  ;;  %2958 = vmatprep.mubr.bf16.mxu1 %v6947_v56 }
 0xecf   :  { %2888 = vmatpush1.bf16.msra.mxu0 %v5855_v28  ;;  %2929 = vmatpush1.bf16.msra.mxu1 %v5861_v21  ;;  %v7339_v28 = vld [vmem:[#allocation51_spill] sm:$0xff]  ;;  %v7340_v21 = vld [vmem:[#allocation52_spill] sm:$0xff] }
 0xed0   :  { %2889 = vmatprep.subr.bf16.mxu0 %v5867_v29  ;;  %2930 = vmatprep.subr.bf16.mxu1 %v5873_v16  ;;  %v7341_v29 = vld [vmem:[#allocation53_spill] sm:$0xff]  ;;  %v7342_v16 = vld [vmem:[#allocation54_spill] sm:$0xff] }
 0xed3   :  { %2890 = vmatpush1.bf16.msra.mxu0 %v5879_v22  ;;  %2931 = vmatpush1.bf16.msra.mxu1 %v6079_v19  ;;  %v7343_v22 = vld [vmem:[#allocation3_spill] sm:$0xff]  ;;  %v7347_v19 = vld [vmem:[#allocation9_spill] sm:$0xff] }
 0xed4   :  { %2891 = vmatprep.subr.bf16.mxu0 %v5886_v18  ;;  %2932 = vmatprep.subr.bf16.mxu1 %v6086_v11  ;;  %v7344_v18 = vld [vmem:[#allocation6_spill] sm:$0xff]  ;;  %v7348_v11 = vld [vmem:[#allocation5_spill] sm:$0xff] }
 0xed7   :  { %2892 = vmatpush1.bf16.msra.mxu0 %v5893_v55  ;;  %2933 = vmatpush1.bf16.msra.mxu1 %v6093_v45  ;;  %v7345_v55 = vld [vmem:[#allocation4_spill] sm:$0xff]  ;;  %v7349_v45 = vld [vmem:[#allocation10_spill] sm:$0xff] }
 0xed8   :  { %2893 = vmatprep.subr.bf16.mxu0 %v7335_v4  ;;  %2934 = vmatprep.subr.bf16.mxu1 %v7336_v50  ;;  %v3296_v50 = vld [vmem:[%s6570_s0 + $0xe8] sm:$0xff] }
 0xedb   :  { %2894 = vmatpush1.bf16.msra.mxu0 %v7337_v49  ;;  %2935 = vmatpush1.bf16.msra.mxu1 %v7338_v58 }
 0xedc   :  { %2895 = vmatprep.subr.bf16.mxu0 %v7339_v28  ;;  %2936 = vmatprep.subr.bf16.mxu1 %v7340_v21 }
 0xedf   :  { %2896 = vmatpush1.bf16.msra.mxu0 %v7341_v29  ;;  %2937 = vmatpush1.bf16.msra.mxu1 %v7342_v16 }
 0xee0   :  { %2897 = vmatprep.subr.bf16.mxu0 %v7343_v22  ;;  %2938 = vmatprep.subr.bf16.mxu1 %v7344_v18 }
 0xee3   :  { %2898 = vmatpush1.bf16.msra.mxu0 %v7345_v55  ;;  %2939 = vmatpush1.bf16.msra.mxu1 %v7346_v40 }
 0xee4   :  { %2899 = vmatprep.subr.bf16.mxu0 %v7347_v19  ;;  %2940 = vmatprep.subr.bf16.mxu1 %v7348_v11  ;;  %v3298_v19 = vld [vmem:[%s6570_s0 + $0xf8] sm:$0xff] }
 0xee7   :  { %2900 = vmatpush1.bf16.msra.mxu0 %v7349_v45  ;;  %2941 = vmatpush1.bf16.msra.mxu1 %v7350_v10  ;;  %v3297_v45 = vld [vmem:[%s6570_s0 + $0xf0] sm:$0xff] }
 0xee8   :  { %2996 = vmatprep.subr.bf16.mxu0 %v7351_v26  ;;  %3037 = vmatprep.subr.bf16.mxu1 %v7352_v15 }
 0xeea   :  { %2918 = vmatmul.mubr.bf16.vlgmr.msra.gmra.mxu0 %v6409_v51  ;;  %2959 = vmatmul.mubr.bf16.vlgmr.msra.gmra.mxu1 %v6409_v51  ;;  %v7361_v51 = vld [vmem:[#allocation55_spill] sm:$0xff] }
 0xeeb   :  { %2997 = vmatpush1.bf16.msra.mxu0 %v7353_v9  ;;  %3038 = vmatpush1.bf16.msra.mxu1 %v7354_v57 }
 0xeec   :  { %2998 = vmatprep.subr.bf16.mxu0 %v7355_v53  ;;  %3039 = vmatprep.subr.bf16.mxu1 %v7356_v38 }
 0xeed   :  { %3028 = vmatprep.mubr.bf16.mxu0 %v6947_v56  ;;  %3069 = vmatprep.mubr.bf16.mxu1 %v6947_v56  ;;  %v7367_v56 = vld [vmem:[#allocation21_spill] sm:$0xff] }
 0xeef   :  { %2999 = vmatpush1.bf16.msra.mxu0 %v7357_v0  ;;  %3040 = vmatpush1.bf16.msra.mxu1 %v7358_v14 }
 0xef0   :  { %3000 = vmatprep.subr.bf16.mxu0 %v7359_v41  ;;  %3041 = vmatprep.subr.bf16.mxu1 %v7360_v20 }
 0xef3   :  { %3001 = vmatpush1.bf16.msra.mxu0 %v7361_v51  ;;  %3042 = vmatpush1.bf16.msra.mxu1 %v7362_v3 }
 0xef4   :  { %3002 = vmatprep.subr.bf16.mxu0 %v7363_v60  ;;  %3043 = vmatprep.subr.bf16.mxu1 %v7364_v23 }
 0xef7   :  { %3003 = vmatpush1.bf16.msra.mxu0 %v7365_v1  ;;  %3044 = vmatpush1.bf16.msra.mxu1 %v7366_v59 }
 0xef8   :  { %3004 = vmatprep.subr.bf16.mxu0 %v7367_v56  ;;  %3045 = vmatprep.subr.bf16.mxu1 %v7368_v32 }
 0xefb   :  { %3005 = vmatpush1.bf16.msra.mxu0 %v7369_v63  ;;  %3046 = vmatpush1.bf16.msra.mxu1 %v7370_v2 }
 0xefc   :  { %3006 = vmatprep.subr.bf16.mxu0 %v7371_v34  ;;  %3047 = vmatprep.subr.bf16.mxu1 %v7372_v27 }
 0xeff   :  { %3007 = vmatpush1.bf16.msra.mxu0 %v7373_v35  ;;  %3048 = vmatpush1.bf16.msra.mxu1 %v7374_v62 }
 0xf00   :  { %3008 = vmatprep.subr.bf16.mxu0 %v7375_v54  ;;  %3049 = vmatprep.subr.bf16.mxu1 %v7376_v46 }
 0xf03   :  { %3009 = vmatpush1.bf16.msra.mxu0 %v7377_v33  ;;  %3050 = vmatpush1.bf16.msra.mxu1 %v7378_v36 }
 0xf04   :  { %3010 = vmatprep.subr.bf16.mxu0 %v7379_v52  ;;  %3051 = vmatprep.subr.bf16.mxu1 %v7380_v39 }
 0xf07   :  { %3011 = vmatpush1.bf16.msra.mxu0 %v7381_v61  ;;  %3052 = vmatpush1.bf16.msra.mxu1 %v7382_v43 }
 0xf8a   :  { %v2832_v24 = vpop.f32.mrf.mxu0  ;;  %v6527_v5 = vpop.f32.mrf.mxu1 }
 0xf8c   :  { %v2834_v30 = vpop.f32.mrf.mxu0  ;;  %v6529_v48 = vpop.f32.mrf.mxu1 }
 0xf8e   :  { %v2836_v6 = vpop.f32.mrf.mxu0  ;;  %v2877_v31 = vpop.f32.mrf.mxu1 }
 0xf90   :  { %v2837_v42 = vpop.f32.mrf.mxu0  ;;  %v2878_v13 = vpop.f32.mrf.mxu1 }
 0xfaa   :  { %v2919_v7 = vpop.f32.mrf.mxu0  ;;  %v2960_v4 = vpop.f32.mrf.mxu1 }
 0xfab   :  { %v2967_v49 = vadd.f32 %v3295_v17, %v2919_v7  ;;  %v2969_v15 = vadd.f32 %v3297_v45, %v2960_v4 }
 0xfac   :  { %v2921_v58 = vpop.f32.mrf.mxu0  ;;  %v2962_v28 = vpop.f32.mrf.mxu1 }
 0xfad   :  { %v3299_v21 = vmul.f32 -1.442695, %v2967_v49  ;;  %v2968_v29 = vadd.f32 %v3296_v50, %v2921_v58  ;;  %v2970_v11 = vadd.f32 %v3298_v19, %v2962_v28 }
 0xfae   :  { %v2923_v16 = vpop.f32.mrf.mxu0  ;;  %v2964_v22 = vpop.f32.mrf.mxu1 }
 0xfaf   :  { %3677 = vpow2.f32 %v3299_v21  ;;  %v3300_v18 = vmul.f32 -1.442695, %v2968_v29  ;;  %v3301_v10 = vmul.f32 -1.442695, %v2970_v11 }
 0xfb0   :  { %v2924_v55 = vpop.f32.mrf.mxu0  ;;  %v2965_v40 = vpop.f32.mrf.mxu1 }
 0xfb1   :  { %3679 = vpow2.f32 %v3300_v18 }
 0xfb2   :  { %3681 = vpow2.f32 %v3301_v10 }
 0xfbc   :  { %v3678_v26 = vpop.eup %3677 }
 0xfbd   :  { %v2974_v9 = vadd.f32 1.0, %v3678_v26 }
 0xfbe   :  { %v3680_v57 = vpop.eup %3679 }
 0xfbf   :  { %3683 = vrcp.f32 %v2974_v9  ;;  %v2980_v53 = vadd.f32 1.0, %v3680_v57  ;;  %v3682_v38 = vpop.eup %3681 }
 0xfc0   :  { %3685 = vtanh.f32 %v2969_v15  ;;  %v2987_v20 = vadd.f32 1.0, %v3682_v38 }
 0xfc1   :  { %3687 = vrcp.f32 %v2980_v53 }
 0xfc2   :  { %3689 = vrcp.f32 %v2987_v20 }
 0xfcc   :  { %v3684_v0 = vpop.eup %3683 }
 0xfcd   :  { %v3686_v14 = vpop.eup %3685 }
 0xfce   :  { %v3688_v41 = vpop.eup %3687  ;;  %v2991_v51 = vmul.f32 %v3686_v14, %v3684_v0 }
 0xfcf   :  { %v2990_v3 = vmul.f32 %v3688_v41, %v6406_v37  ;;  %v3690_v23 = vpop.eup %3689 }
 0xfd1   :  { %v2992_v60 = vadd.f32 %v2991_v51, %v2990_v3 }
 0xfd3   :  { %3116 = vst [vmem:[%s6573_s9] sm:$0xff] %v2992_v60  ;;  %3691 = vtanh.f32 %v2992_v60 }
 0xfe0   :  { %v3692_v1 = vpop.eup %3691 }
 0xfe1   :  { %v2994_v59 = vmul.f32 %v3692_v1, %v3690_v23 }
 0xfe3   :  { %v2995_v56 = vpack.c.bf16 %v2994_v59, %v2994_v59  ;;  %3113 = vst [vmem:[%s6574_s8] sm:$0xff] %v2994_v59 }
 0xfe5   :  { %3029 = vmatmul.mubr.bf16.vlgmr.msra.gmra.mxu0 %v2995_v56  ;;  %3070 = vmatmul.mubr.bf16.vlgmr.msra.gmra.mxu1 %v2995_v56 }
0x10a5   :  { %v3030_v32 = vpop.f32.mrf.mxu0  ;;  %v3071_v63 = vpop.f32.mrf.mxu1 }
0x10a6   :  { %v3031_v37 = vadd.f32 %v3030_v32, %v2832_v24  ;;  %v3072_v24 = vadd.f32 %v3071_v63, %v6527_v5 }
0x10a7   :  { %v3032_v2 = vpop.f32.mrf.mxu0  ;;  %v3073_v34 = vpop.f32.mrf.mxu1 }
0x10a8   :  { %v3078_v27 = vadd.f32 %v3031_v37, %v4613_v8  ;;  %v3033_v35 = vadd.f32 %v3032_v2, %v2834_v30  ;;  %v3074_v61 = vadd.f32 %v3073_v34, %v6529_v48  ;;  %v3080_v8 = vadd.f32 %v3072_v24, %v4625_v44 }
0x10a9   :  { %v3034_v62 = vpop.f32.mrf.mxu0  ;;  %v3075_v54 = vpop.f32.mrf.mxu1 }
0x10aa   :  { %v3302_v46 = vmul.f32 -1.442695, %v3078_v27  ;;  %v3079_v33 = vadd.f32 %v3033_v35, %v4616_v12  ;;  %v3081_v43 = vadd.f32 %v3074_v61, %v4621_v25 }
0x10ab   :  { %v3035_v36 = vpop.f32.mrf.mxu0  ;;  %v3076_v52 = vpop.f32.mrf.mxu1 }
0x10ac   :  { %3693 = vpow2.f32 %v3302_v46  ;;  %v3303_v39 = vmul.f32 -1.442695, %v3079_v33  ;;  %v3304_v6 = vmul.f32 -1.442695, %v3081_v43 }
0x10ae   :  { %3695 = vpow2.f32 %v3303_v39 }
0x10af   :  { %3697 = vpow2.f32 %v3304_v6 }
0x10b9   :  { %v3694_v31 = vpop.eup %3693 }
0x10ba   :  { %v3085_v30 = vadd.f32 1.0, %v3694_v31 }
0x10bb   :  { %v3696_v42 = vpop.eup %3695 }
0x10bc   :  { %3699 = vrcp.f32 %v3085_v30  ;;  %v3091_v12 = vadd.f32 1.0, %v3696_v42  ;;  %v3698_v13 = vpop.eup %3697 }
0x10bd   :  { %3701 = vtanh.f32 %v3080_v8  ;;  %v3098_v48 = vadd.f32 1.0, %v3698_v13 }
0x10be   :  { %3703 = vrcp.f32 %v3091_v12 }
0x10bf   :  { %3705 = vrcp.f32 %v3098_v48 }
0x10c9   :  { %v3700_v17 = vpop.eup %3699 }
0x10ca   :  { %v3702_v7 = vpop.eup %3701 }
0x10cb   :  { %v3704_v4 = vpop.eup %3703  ;;  %v3102_v50 = vmul.f32 %v3702_v7, %v3700_v17 }
0x10cc   :  { %v3101_v25 = vmul.f32 %v3704_v4, %v6456_v47  ;;  %v3706_v44 = vpop.eup %3705 }
0x10ce   :  { %v3103_v5 = vadd.f32 %v3102_v50, %v3101_v25 }
0x10d0   :  { %3707 = vtanh.f32 %v3103_v5  ;;  %3307 = vst [vmem:[%s6573_s9 + $0x8] sm:$0xff] %v3103_v5 }
0x10dd   :  { %v3708_v49 = vpop.eup %3707 }
0x10de   :  { %v3105_v58 = vmul.f32 %v3708_v49, %v3706_v44 }
0x10e0   :  { %v3305_v28 = vmul.f32 -1.442695, %v3105_v58  ;;  %3306 = vst [vmem:[%s6574_s8 + $0x8] sm:$0xff] %v3105_v58 }
0x10e2   :  { %3709 = vpow2.f32 %v3305_v28 }
0x10ef   :  { %v3710_v21 = vpop.eup %3709 }
0x10f0   :  { %v3109_v29 = vadd.f32 1.0, %v3710_v21 }
0x10f2   :  { %3711 = vrcp.f32 %v3109_v29 }
0x10ff   :  { %v3712_v47 = vpop.eup %3711 }
0x1100   :  { %3112 = vst [vmem:[%s6575_s7] sm:$0xff] %v3712_v47 }

</bundles_post_ra>
